<compile_context>
chip_gen: v7x
topology: tpu7x:2x2x1
jax: 0.10.0
libtpu: 0.0.40
codegen_flags: <defaults>
</compile_context>

<pallas_src>
from functools import partial

import jax
import jax.numpy as jnp
from jax.experimental import pallas as pl
from jax.experimental.pallas import tpu as pltpu


def _ceil_to(x, m):
    return (x + m - 1) // m * m


# ----------------------------------------------------------------------------
# Pallas kernel: fused conv (tap-accumulated matmul) + bias (+ReLU) (+residual)
# ----------------------------------------------------------------------------
def _conv_bn_kernel(x_ref, w_ref, b_ref, *rest, ks, stride, ho, wo,
                    relu, has_residual):
    """x_ref : (stride*stride, Hq, Wq, Cin_p)  phase-decomposed padded input (bf16)
       w_ref : (ks*ks, Cin_p, 128)            BN-scale-folded weights (bf16)
       b_ref : (1, 128)                       BN bias (f32)
       r_ref : (1, Ho, Wo, 128)               optional residual (bf16)
       o_ref : (1, Ho, Wo, 128)               output (bf16)"""
    if has_residual:
        r_ref, o_ref = rest
    else:
        (o_ref,) = rest
    cin = x_ref.shape[-1]
    cout = o_ref.shape[-1]

    acc = jnp.zeros((ho * wo, cout), jnp.float32)
    for ki in range(ks):
        for kj in range(ks):
            p = (ki % stride) * stride + (kj % stride)      # phase index
            oy0, ox0 = ki // stride, kj // stride            # static offsets
            slab = x_ref[p, oy0:oy0 + ho, ox0:ox0 + wo, :]   # (Ho, Wo, Cin_p)
            acc = acc + jnp.dot(slab.reshape(ho * wo, cin),
                                w_ref[ki * ks + kj],
                                preferred_element_type=jnp.float32)

    y = acc + b_ref[...]                                     # fused BN bias
    if relu:
        y = jnp.maximum(y, 0.0)
    if has_residual:                                         # fused residual add
        y = y + r_ref[...].reshape(ho * wo, cout).astype(jnp.float32)
    o_ref[...] = y.reshape(1, ho, wo, cout).astype(o_ref.dtype)


# ----------------------------------------------------------------------------
# Wrapper glue
# ----------------------------------------------------------------------------
def _split_phases(x_pad, stride, ho, wo, ks):
    """Stride-2 convs are rewritten as stride-1 tap gathers over 4 spatial
    phases of the padded input (writes ~1x the input to HBM, not KH*KW x)."""
    if stride == 1:
        return x_pad
    b, hp, wp, c = x_pad.shape
    hq = (ks - 1) // stride + ho
    wq = (ks - 1) // stride + wo
    phases = []
    for py in range(stride):
        for px in range(stride):
            phases.append(jax.lax.slice(
                x_pad, (0, py, px, 0),
                (b, py + stride * (hq - 1) + 1, px + stride * (wq - 1) + 1, c),
                (1, stride, stride, 1)))
    stacked = jnp.stack(phases, axis=1)            # (B, s*s, Hq, Wq, C)
    return stacked.reshape(b * stride * stride, hq, wq, c)


def conv_bn_pallas(x, prep, *, ks, stride, pad, relu, residual=None):
    """x: (B, H, W, Cin_p) bf16 NHWC, channels padded to a 128 multiple.
       prep['w']: (ks*ks, Cin_p, Cout_p) bf16 (BN scale folded in);
       prep['b']: (1, Cout_p) f32.  residual: (B, Ho, Wo, Cout_p) bf16."""
    assert not (relu and residual is not None)     # never co-occurs in ResNet
    b, h, w, cp = x.shape
    coutp = prep['w'].shape[-1]
    assert prep['w'].shape[0] == ks * ks and prep['w'].shape[1] == cp
    ho = (h + 2 * pad - ks) // stride + 1
    wo = (w + 2 * pad - ks) // stride + 1
    if stride > 1:
        assert ks == 3 and h % 2 == 0 and w % 2 == 0

    if pad:
        x = jnp.pad(x, ((0, 0), (pad, pad), (pad, pad), (0, 0)))
    phases = _split_phases(x, stride, ho, wo, ks)
    nphase = stride * stride
    _, hq, wq, _ = phases.shape

    ct = 128                                       # lane-dense output tile
    grid = (b, coutp // ct)

    in_specs = [
        pl.BlockSpec((nphase, hq, wq, cp), lambda i, j: (i, 0, 0, 0)),
        pl.BlockSpec((ks * ks, cp, ct), lambda i, j: (0, 0, j)),
        pl.BlockSpec((1, ct), lambda i, j: (0, j)),
    ]
    args = [phases, prep['w'], prep['b']]
    if residual is not None:
        in_specs.append(pl.BlockSpec((1, ho, wo, ct), lambda i, j: (i, 0, 0, j)))
        args.append(residual)

    kernel = partial(_conv_bn_kernel, ks=ks, stride=stride, ho=ho, wo=wo,
                     relu=relu, has_residual=residual is not None)
    return pl.pallas_call(
        kernel,
        out_shape=jax.ShapeDtypeStruct((b, ho, wo, coutp), x.dtype),
        grid=grid,
        in_specs=in_specs,
        out_specs=pl.BlockSpec((1, ho, wo, ct), lambda i, j: (i, 0, 0, j)),
        compiler_params=pltpu.CompilerParams(
            dimension_semantics=("parallel", "parallel")),
    )(*args)


# ----------------------------------------------------------------------------
# Parameters: synthetic deterministic init + kernel-format preparation
# ----------------------------------------------------------------------------
def init_resnet_layer_params(key, in_channels, out_channels, n):
    keys = iter(jax.random.split(key, 128))

    def nk():
        return next(keys)

    def conv_bn_p(cin, cout, k, eps=1e-5):
        w = jax.random.normal(nk(), (cout, cin, k, k), jnp.float32) * (cin * k * k) ** -0.5
        gamma = jax.random.uniform(nk(), (cout,), jnp.float32, 0.5, 1.5)
        beta = jax.random.normal(nk(), (cout,), jnp.float32) * 0.1
        mean = jax.random.normal(nk(), (cout,), jnp.float32) * 0.1
        var = jax.random.uniform(nk(), (cout,), jnp.float32, 0.5, 1.5)
        scale = gamma / jnp.sqrt(var + eps)
        bias = beta - mean * scale
        return {'w': w, 'scale': scale, 'bias': bias}

    downsampling = 2 if in_channels != out_channels else 1
    blocks, cin, s = [], in_channels, downsampling
    for _ in range(n):
        blocks.append({
            'stride': s,
            'conv1': conv_bn_p(cin, out_channels, 3),
            'conv2': conv_bn_p(out_channels, out_channels, 3),
            'shortcut': conv_bn_p(cin, out_channels, 1) if cin != out_channels else None,
        })
        cin, s = out_channels, 1
    return blocks


def _prepare_conv(p, cin_pad, cout_pad):
    w = p['w']                                     # (Cout, Cin, K, K) torch layout
    cout, cin, k, _ = w.shape
    wf = w * p['scale'][:, None, None, None]       # fold BN scale into weights
    wm = jnp.transpose(wf, (2, 3, 1, 0)).reshape(k * k, cin, cout)
    wm = jnp.pad(wm, ((0, 0), (0, cin_pad - cin), (0, cout_pad - cout)))
    bias = jnp.pad(p['bias'], (0, cout_pad - cout)).reshape(1, cout_pad)
    return {'w': wm.astype(jnp.bfloat16), 'b': bias.astype(jnp.float32)}


def prepare_kernel_params(raw_blocks, in_channels, out_channels):
    cinp = _ceil_to(in_channels, 128)
    coutp = _ceil_to(out_channels, 128)
    blocks, cprev = [], cinp
    for blk in raw_blocks:
        blocks.append({
            'stride': blk['stride'],
            'conv1': _prepare_conv(blk['conv1'], cprev, coutp),
            'conv2': _prepare_conv(blk['conv2'], coutp, coutp),
            'shortcut': (_prepare_conv(blk['shortcut'], cprev, coutp)
                         if blk['shortcut'] is not None else None),
        })
        cprev = coutp
    return {'blocks': blocks, 'out_channels': out_channels}


# ----------------------------------------------------------------------------
# Forward pass (mirrors ResNetLayer.forward, eval mode)
# ----------------------------------------------------------------------------
def resnet_layer_forward(x_nchw, kparams):
    x = jnp.transpose(x_nchw, (0, 2, 3, 1)).astype(jnp.bfloat16)   # NCHW->NHWC, bf16
    cin = x.shape[-1]
    x = jnp.pad(x, ((0, 0), (0, 0), (0, 0), (0, _ceil_to(cin, 128) - cin)))

    for blk in kparams['blocks']:
        s = blk['stride']
        if blk['shortcut'] is not None:            # 1x1 conv + BN on (subsampled) x
            xs = x[:, ::s, ::s, :] if s > 1 else x
            residual = conv_bn_pallas(xs, blk['shortcut'], ks=1, stride=1,
                                      pad=0, relu=False)
        else:
            residual = x
        h = conv_bn_pallas(x, blk['conv1'], ks=3, stride=s, pad=1, relu=True)
        x = conv_bn_pallas(h, blk['conv2'], ks=3, stride=1, pad=1,
                           relu=False, residual=residual)          # add fused, no ReLU
    out = x[..., :kparams['out_channels']]
    return jnp.transpose(out, (0, 3, 1, 2)).astype(jnp.float32)    # NHWC->NCHW


# ----------------------------------------------------------------------------
# Pure-JAX reference (precision-matched: bf16 operands, f32 accumulation)
# ----------------------------------------------------------------------------
def reference_forward(x_nchw, raw_blocks):
    x = jnp.transpose(x_nchw, (0, 2, 3, 1)).astype(jnp.bfloat16)

    def cbn(x, p, stride, pad, relu):
        w = jnp.transpose(p['w'], (2, 3, 1, 0))                    # HWIO
        w = (w * p['scale']).astype(jnp.bfloat16)                  # same fold as kernel
        y = jax.lax.conv_general_dilated(
            x, w, (stride, stride), [(pad, pad), (pad, pad)],
            dimension_numbers=('NHWC', 'HWIO', 'NHWC'),
            preferred_element_type=jnp.float32)
        y = y + p['bias']
        return jnp.maximum(y, 0.0) if relu else y

    for blk in raw_blocks:
        s = blk['stride']
        if blk['shortcut'] is not None:
            res = cbn(x, blk['shortcut'], s, 0, False).astype(jnp.bfloat16)
        else:
            res = x
        h = cbn(x, blk['conv1'], s, 1, True).astype(jnp.bfloat16)
        y = cbn(h, blk['conv2'], 1, 1, False) + res.astype(jnp.float32)
        x = y.astype(jnp.bfloat16)
    return jnp.transpose(x, (0, 3, 1, 2)).astype(jnp.float32)


# ----------------------------------------------------------------------------
if __name__ == "__main__":
    key = jax.random.PRNGKey(0)
    pkey, xkey = jax.random.split(key)

    in_channels, out_channels, n = 32, 64, 2
    raw = init_resnet_layer_params(pkey, in_channels, out_channels, n)
    kparams = prepare_kernel_params(raw, in_channels, out_channels)

    x = jax.random.normal(xkey, (2, in_channels, 16, 16), jnp.float32)

    fwd = jax.jit(lambda inp: resnet_layer_forward(inp, kparams))
    out = jax.block_until_ready(fwd(x))

    expected_shape = (2, out_channels, 8, 8)       # first block downsamples 16 -> 8
    assert out.shape == expected_shape, (out.shape, expected_shape)

    ref = jax.block_until_ready(reference_forward(x, raw))
    max_err = float(jnp.max(jnp.abs(out - ref)))
    assert jnp.allclose(out, ref, rtol=1e-2, atol=1e-2), max_err

    print("KERNEL_OK")
</pallas_src>

<mosaic_0001>
module attributes {stable_mosaic.version = 11 : i64} {
  func.func @_conv_bn_kernel(%arg0: i32, %arg1: i32, %arg2: memref<1x8x8x128xbf16, #tpu.memory_space<vmem>>, %arg3: memref<1x128x128xbf16, #tpu.memory_space<vmem>>, %arg4: memref<1x128xf32, #tpu.memory_space<vmem>>, %arg5: memref<1x8x8x128xbf16, #tpu.memory_space<vmem>>) attributes {dimension_semantics = [#tpu.dimension_semantics<parallel>, #tpu.dimension_semantics<parallel>], iteration_bounds = array<i64: 2, 1>, scalar_prefetch = 0 : i64, scratch_operands = 0 : i64, tpu.core_type = #tpu.core_type<tc>, window_params = [{transform_indices = @transform_0, window_bounds = array<i64: 1, 8, 8, 128>}, {transform_indices = @transform_1, window_bounds = array<i64: 1, 128, 128>}, {transform_indices = @transform_2, window_bounds = array<i64: 1, 128>}, {transform_indices = @transform_3, window_bounds = array<i64: 1, 8, 8, 128>}]} {
    %cst = arith.constant 0.000000e+00 : f32
    %0 = vector.broadcast %cst : f32 to vector<64x128xf32>
    %c0 = arith.constant 0 : index
    %c0_0 = arith.constant 0 : index
    %c0_1 = arith.constant 0 : index
    %c0_2 = arith.constant 0 : index
    %1 = vector.load %arg2[%c0, %c0_0, %c0_1, %c0_2] : memref<1x8x8x128xbf16, #tpu.memory_space<vmem>>, vector<1x8x8x128xbf16>
    %2 = vector.shape_cast %1 : vector<1x8x8x128xbf16> to vector<8x8x128xbf16>
    %3 = vector.shape_cast %2 : vector<8x8x128xbf16> to vector<64x128xbf16>
    %c0_3 = arith.constant 0 : index
    %c0_4 = arith.constant 0 : index
    %c0_5 = arith.constant 0 : index
    %4 = vector.load %arg3[%c0_3, %c0_4, %c0_5] : memref<1x128x128xbf16, #tpu.memory_space<vmem>>, vector<1x128x128xbf16>
    %5 = vector.shape_cast %4 : vector<1x128x128xbf16> to vector<128x128xbf16>
    %cst_6 = arith.constant dense<0.000000e+00> : vector<64x128xf32>
    %6 = tpu.matmul %3, %5, %cst_6 {dimension_numbers = #tpu.dot_dimension_numbers<[1], [0], [0], [1], [0, 0, 1, 1], [], []>} : vector<64x128xbf16>, vector<128x128xbf16>, vector<64x128xf32> -> vector<64x128xf32>
    %7 = arith.addf %0, %6 : vector<64x128xf32>
    %c0_7 = arith.constant 0 : index
    %c0_8 = arith.constant 0 : index
    %8 = vector.load %arg4[%c0_7, %c0_8] : memref<1x128xf32, #tpu.memory_space<vmem>>, vector<1x128xf32>
    %9 = vector.broadcast %8 : vector<1x128xf32> to vector<64x128xf32>
    %10 = arith.addf %7, %9 : vector<64x128xf32>
    %11 = vector.shape_cast %10 : vector<64x128xf32> to vector<1x8x8x128xf32>
    %12 = arith.truncf %11 : vector<1x8x8x128xf32> to vector<1x8x8x128xbf16>
    %c0_9 = arith.constant 0 : index
    %c0_10 = arith.constant 0 : index
    %c0_11 = arith.constant 0 : index
    %c0_12 = arith.constant 0 : index
    %13 = vector.load %arg5[%c0_9, %c0_10, %c0_11, %c0_12] : memref<1x8x8x128xbf16, #tpu.memory_space<vmem>>, vector<1x8x8x128xbf16>
    tpu.vector_store %arg5[%c0_9, %c0_10, %c0_11, %c0_12], %12 {strides = array<i32>} : memref<1x8x8x128xbf16, #tpu.memory_space<vmem>>, vector<1x8x8x128xbf16>,
    return
  }
  func.func @transform_0(%arg0: i32, %arg1: i32) -> (i32, i32, i32, i32) {
    %c0_i32 = arith.constant 0 : i32
    %c0_i32_0 = arith.constant 0 : i32
    %c0_i32_1 = arith.constant 0 : i32
    %c0_i32_2 = arith.constant 0 : i32
    return %arg0, %c0_i32, %c0_i32_0, %c0_i32_1 : i32, i32, i32, i32
  }
  func.func @transform_1(%arg0: i32, %arg1: i32) -> (i32, i32, i32) {
    %c0_i32 = arith.constant 0 : i32
    %c0_i32_0 = arith.constant 0 : i32
    %c0_i32_1 = arith.constant 0 : i32
    return %c0_i32, %c0_i32_0, %arg1 : i32, i32, i32
  }
  func.func @transform_2(%arg0: i32, %arg1: i32) -> (i32, i32) {
    %c0_i32 = arith.constant 0 : i32
    %c0_i32_0 = arith.constant 0 : i32
    return %c0_i32, %arg1 : i32, i32
  }
  func.func @transform_3(%arg0: i32, %arg1: i32) -> (i32, i32, i32, i32) {
    %c0_i32 = arith.constant 0 : i32
    %c0_i32_0 = arith.constant 0 : i32
    %c0_i32_1 = arith.constant 0 : i32
    return %arg0, %c0_i32, %c0_i32_0, %arg1 : i32, i32, i32, i32
  }
}

module attributes {stable_mosaic.version = 11 : i64} {
  func.func @_conv_bn_kernel(%arg0: i32, %arg1: i32, %arg2: memref<4x9x9x128xbf16, #tpu.memory_space<vmem>>, %arg3: memref<9x128x128xbf16, #tpu.memory_space<vmem>>, %arg4: memref<1x128xf32, #tpu.memory_space<vmem>>, %arg5: memref<1x8x8x128xbf16, #tpu.memory_space<vmem>>) attributes {dimension_semantics = [#tpu.dimension_semantics<parallel>, #tpu.dimension_semantics<parallel>], iteration_bounds = array<i64: 2, 1>, scalar_prefetch = 0 : i64, scratch_operands = 0 : i64, tpu.core_type = #tpu.core_type<tc>, window_params = [{transform_indices = @transform_0, window_bounds = array<i64: 4, 9, 9, 128>}, {transform_indices = @transform_1, window_bounds = array<i64: 9, 128, 128>}, {transform_indices = @transform_2, window_bounds = array<i64: 1, 128>}, {transform_indices = @transform_3, window_bounds = array<i64: 1, 8, 8, 128>}]} {
    %cst = arith.constant 0.000000e+00 : f32
    %0 = vector.broadcast %cst : f32 to vector<64x128xf32>
    %c0 = arith.constant 0 : index
    %c0_0 = arith.constant 0 : index
    %c0_1 = arith.constant 0 : index
    %c0_2 = arith.constant 0 : index
    %1 = vector.load %arg2[%c0, %c0_0, %c0_1, %c0_2] : memref<4x9x9x128xbf16, #tpu.memory_space<vmem>>, vector<1x8x8x128xbf16>
    %2 = vector.shape_cast %1 : vector<1x8x8x128xbf16> to vector<8x8x128xbf16>
    %3 = vector.shape_cast %2 : vector<8x8x128xbf16> to vector<64x128xbf16>
    %c0_3 = arith.constant 0 : index
    %c0_4 = arith.constant 0 : index
    %c0_5 = arith.constant 0 : index
    %4 = vector.load %arg3[%c0_3, %c0_4, %c0_5] : memref<9x128x128xbf16, #tpu.memory_space<vmem>>, vector<1x128x128xbf16>
    %5 = vector.shape_cast %4 : vector<1x128x128xbf16> to vector<128x128xbf16>
    %cst_6 = arith.constant dense<0.000000e+00> : vector<64x128xf32>
    %6 = tpu.matmul %3, %5, %cst_6 {dimension_numbers = #tpu.dot_dimension_numbers<[1], [0], [0], [1], [0, 0, 1, 1], [], []>} : vector<64x128xbf16>, vector<128x128xbf16>, vector<64x128xf32> -> vector<64x128xf32>
    %7 = arith.addf %0, %6 : vector<64x128xf32>
    %c1 = arith.constant 1 : index
    %c0_7 = arith.constant 0 : index
    %c0_8 = arith.constant 0 : index
    %c0_9 = arith.constant 0 : index
    %8 = vector.load %arg2[%c1, %c0_7, %c0_8, %c0_9] : memref<4x9x9x128xbf16, #tpu.memory_space<vmem>>, vector<1x8x8x128xbf16>
    %9 = vector.shape_cast %8 : vector<1x8x8x128xbf16> to vector<8x8x128xbf16>
    %10 = vector.shape_cast %9 : vector<8x8x128xbf16> to vector<64x128xbf16>
    %c1_10 = arith.constant 1 : index
    %c0_11 = arith.constant 0 : index
    %c0_12 = arith.constant 0 : index
    %11 = vector.load %arg3[%c1_10, %c0_11, %c0_12] : memref<9x128x128xbf16, #tpu.memory_space<vmem>>, vector<1x128x128xbf16>
    %12 = vector.shape_cast %11 : vector<1x128x128xbf16> to vector<128x128xbf16>
    %cst_13 = arith.constant dense<0.000000e+00> : vector<64x128xf32>
    %13 = tpu.matmul %10, %12, %cst_13 {dimension_numbers = #tpu.dot_dimension_numbers<[1], [0], [0], [1], [0, 0, 1, 1], [], []>} : vector<64x128xbf16>, vector<128x128xbf16>, vector<64x128xf32> -> vector<64x128xf32>
    %14 = arith.addf %7, %13 : vector<64x128xf32>
    %c0_14 = arith.constant 0 : index
    %c0_15 = arith.constant 0 : index
    %c1_16 = arith.constant 1 : index
    %c0_17 = arith.constant 0 : index
    %15 = vector.load %arg2[%c0_14, %c0_15, %c1_16, %c0_17] : memref<4x9x9x128xbf16, #tpu.memory_space<vmem>>, vector<1x8x8x128xbf16>
    %16 = vector.shape_cast %15 : vector<1x8x8x128xbf16> to vector<8x8x128xbf16>
    %17 = vector.shape_cast %16 : vector<8x8x128xbf16> to vector<64x128xbf16>
    %c2 = arith.constant 2 : index
    %c0_18 = arith.constant 0 : index
    %c0_19 = arith.constant 0 : index
    %18 = vector.load %arg3[%c2, %c0_18, %c0_19] : memref<9x128x128xbf16, #tpu.memory_space<vmem>>, vector<1x128x128xbf16>
    %19 = vector.shape_cast %18 : vector<1x128x128xbf16> to vector<128x128xbf16>
    %cst_20 = arith.constant dense<0.000000e+00> : vector<64x128xf32>
    %20 = tpu.matmul %17, %19, %cst_20 {dimension_numbers = #tpu.dot_dimension_numbers<[1], [0], [0], [1], [0, 0, 1, 1], [], []>} : vector<64x128xbf16>, vector<128x128xbf16>, vector<64x128xf32> -> vector<64x128xf32>
    %21 = arith.addf %14, %20 : vector<64x128xf32>
    %c2_21 = arith.constant 2 : index
    %c0_22 = arith.constant 0 : index
    %c0_23 = arith.constant 0 : index
    %c0_24 = arith.constant 0 : index
    %22 = vector.load %arg2[%c2_21, %c0_22, %c0_23, %c0_24] : memref<4x9x9x128xbf16, #tpu.memory_space<vmem>>, vector<1x8x8x128xbf16>
    %23 = vector.shape_cast %22 : vector<1x8x8x128xbf16> to vector<8x8x128xbf16>
    %24 = vector.shape_cast %23 : vector<8x8x128xbf16> to vector<64x128xbf16>
    %c3 = arith.constant 3 : index
    %c0_25 = arith.constant 0 : index
    %c0_26 = arith.constant 0 : index
    %25 = vector.load %arg3[%c3, %c0_25, %c0_26] : memref<9x128x128xbf16, #tpu.memory_space<vmem>>, vector<1x128x128xbf16>
    %26 = vector.shape_cast %25 : vector<1x128x128xbf16> to vector<128x128xbf16>
    %cst_27 = arith.constant dense<0.000000e+00> : vector<64x128xf32>
    %27 = tpu.matmul %24, %26, %cst_27 {dimension_numbers = #tpu.dot_dimension_numbers<[1], [0], [0], [1], [0, 0, 1, 1], [], []>} : vector<64x128xbf16>, vector<128x128xbf16>, vector<64x128xf32> -> vector<64x128xf32>
    %28 = arith.addf %21, %27 : vector<64x128xf32>
    %c3_28 = arith.constant 3 : index
    %c0_29 = arith.constant 0 : index
    %c0_30 = arith.constant 0 : index
    %c0_31 = arith.constant 0 : index
    %29 = vector.load %arg2[%c3_28, %c0_29, %c0_30, %c0_31] : memref<4x9x9x128xbf16, #tpu.memory_space<vmem>>, vector<1x8x8x128xbf16>
    %30 = vector.shape_cast %29 : vector<1x8x8x128xbf16> to vector<8x8x128xbf16>
    %31 = vector.shape_cast %30 : vector<8x8x128xbf16> to vector<64x128xbf16>
    %c4 = arith.constant 4 : index
    %c0_32 = arith.constant 0 : index
    %c0_33 = arith.constant 0 : index
    %32 = vector.load %arg3[%c4, %c0_32, %c0_33] : memref<9x128x128xbf16, #tpu.memory_space<vmem>>, vector<1x128x128xbf16>
    %33 = vector.shape_cast %32 : vector<1x128x128xbf16> to vector<128x128xbf16>
    %cst_34 = arith.constant dense<0.000000e+00> : vector<64x128xf32>
    %34 = tpu.matmul %31, %33, %cst_34 {dimension_numbers = #tpu.dot_dimension_numbers<[1], [0], [0], [1], [0, 0, 1, 1], [], []>} : vector<64x128xbf16>, vector<128x128xbf16>, vector<64x128xf32> -> vector<64x128xf32>
    %35 = arith.addf %28, %34 : vector<64x128xf32>
    %c2_35 = arith.constant 2 : index
    %c0_36 = arith.constant 0 : index
    %c1_37 = arith.constant 1 : index
    %c0_38 = arith.constant 0 : index
    %36 = vector.load %arg2[%c2_35, %c0_36, %c1_37, %c0_38] : memref<4x9x9x128xbf16, #tpu.memory_space<vmem>>, vector<1x8x8x128xbf16>
    %37 = vector.shape_cast %36 : vector<1x8x8x128xbf16> to vector<8x8x128xbf16>
    %38 = vector.shape_cast %37 : vector<8x8x128xbf16> to vector<64x128xbf16>
    %c5 = arith.constant 5 : index
    %c0_39 = arith.constant 0 : index
    %c0_40 = arith.constant 0 : index
    %39 = vector.load %arg3[%c5, %c0_39, %c0_40] : memref<9x128x128xbf16, #tpu.memory_space<vmem>>, vector<1x128x128xbf16>
    %40 = vector.shape_cast %39 : vector<1x128x128xbf16> to vector<128x128xbf16>
    %cst_41 = arith.constant dense<0.000000e+00> : vector<64x128xf32>
    %41 = tpu.matmul %38, %40, %cst_41 {dimension_numbers = #tpu.dot_dimension_numbers<[1], [0], [0], [1], [0, 0, 1, 1], [], []>} : vector<64x128xbf16>, vector<128x128xbf16>, vector<64x128xf32> -> vector<64x128xf32>
    %42 = arith.addf %35, %41 : vector<64x128xf32>
    %c0_42 = arith.constant 0 : index
    %c1_43 = arith.constant 1 : index
    %c0_44 = arith.constant 0 : index
    %c0_45 = arith.constant 0 : index
    %43 = vector.load %arg2[%c0_42, %c1_43, %c0_44, %c0_45] : memref<4x9x9x128xbf16, #tpu.memory_space<vmem>>, vector<1x8x8x128xbf16>
    %44 = vector.shape_cast %43 : vector<1x8x8x128xbf16> to vector<8x8x128xbf16>
    %45 = vector.shape_cast %44 : vector<8x8x128xbf16> to vector<64x128xbf16>
    %c6 = arith.constant 6 : index
    %c0_46 = arith.constant 0 : index
    %c0_47 = arith.constant 0 : index
    %46 = vector.load %arg3[%c6, %c0_46, %c0_47] : memref<9x128x128xbf16, #tpu.memory_space<vmem>>, vector<1x128x128xbf16>
    %47 = vector.shape_cast %46 : vector<1x128x128xbf16> to vector<128x128xbf16>
    %cst_48 = arith.constant dense<0.000000e+00> : vector<64x128xf32>
    %48 = tpu.matmul %45, %47, %cst_48 {dimension_numbers = #tpu.dot_dimension_numbers<[1], [0], [0], [1], [0, 0, 1, 1], [], []>} : vector<64x128xbf16>, vector<128x128xbf16>, vector<64x128xf32> -> vector<64x128xf32>
    %49 = arith.addf %42, %48 : vector<64x128xf32>
    %c1_49 = arith.constant 1 : index
    %c1_50 = arith.constant 1 : index
    %c0_51 = arith.constant 0 : index
    %c0_52 = arith.constant 0 : index
    %50 = vector.load %arg2[%c1_49, %c1_50, %c0_51, %c0_52] : memref<4x9x9x128xbf16, #tpu.memory_space<vmem>>, vector<1x8x8x128xbf16>
    %51 = vector.shape_cast %50 : vector<1x8x8x128xbf16> to vector<8x8x128xbf16>
    %52 = vector.shape_cast %51 : vector<8x8x128xbf16> to vector<64x128xbf16>
    %c7 = arith.constant 7 : index
    %c0_53 = arith.constant 0 : index
    %c0_54 = arith.constant 0 : index
    %53 = vector.load %arg3[%c7, %c0_53, %c0_54] : memref<9x128x128xbf16, #tpu.memory_space<vmem>>, vector<1x128x128xbf16>
    %54 = vector.shape_cast %53 : vector<1x128x128xbf16> to vector<128x128xbf16>
    %cst_55 = arith.constant dense<0.000000e+00> : vector<64x128xf32>
    %55 = tpu.matmul %52, %54, %cst_55 {dimension_numbers = #tpu.dot_dimension_numbers<[1], [0], [0], [1], [0, 0, 1, 1], [], []>} : vector<64x128xbf16>, vector<128x128xbf16>, vector<64x128xf32> -> vector<64x128xf32>
    %56 = arith.addf %49, %55 : vector<64x128xf32>
    %c0_56 = arith.constant 0 : index
    %c1_57 = arith.constant 1 : index
    %c1_58 = arith.constant 1 : index
    %c0_59 = arith.constant 0 : index
    %57 = vector.load %arg2[%c0_56, %c1_57, %c1_58, %c0_59] : memref<4x9x9x128xbf16, #tpu.memory_space<vmem>>, vector<1x8x8x128xbf16>
    %58 = vector.shape_cast %57 : vector<1x8x8x128xbf16> to vector<8x8x128xbf16>
    %59 = vector.shape_cast %58 : vector<8x8x128xbf16> to vector<64x128xbf16>
    %c8 = arith.constant 8 : index
    %c0_60 = arith.constant 0 : index
    %c0_61 = arith.constant 0 : index
    %60 = vector.load %arg3[%c8, %c0_60, %c0_61] : memref<9x128x128xbf16, #tpu.memory_space<vmem>>, vector<1x128x128xbf16>
    %61 = vector.shape_cast %60 : vector<1x128x128xbf16> to vector<128x128xbf16>
    %cst_62 = arith.constant dense<0.000000e+00> : vector<64x128xf32>
    %62 = tpu.matmul %59, %61, %cst_62 {dimension_numbers = #tpu.dot_dimension_numbers<[1], [0], [0], [1], [0, 0, 1, 1], [], []>} : vector<64x128xbf16>, vector<128x128xbf16>, vector<64x128xf32> -> vector<64x128xf32>
    %63 = arith.addf %56, %62 : vector<64x128xf32>
    %c0_63 = arith.constant 0 : index
    %c0_64 = arith.constant 0 : index
    %64 = vector.load %arg4[%c0_63, %c0_64] : memref<1x128xf32, #tpu.memory_space<vmem>>, vector<1x128xf32>
    %65 = vector.broadcast %64 : vector<1x128xf32> to vector<64x128xf32>
    %66 = arith.addf %63, %65 : vector<64x128xf32>
    %cst_65 = arith.constant 0.000000e+00 : f32
    %67 = vector.broadcast %cst_65 : f32 to vector<64x128xf32>
    %68 = arith.maximumf %66, %67 : vector<64x128xf32>
    %69 = vector.shape_cast %68 : vector<64x128xf32> to vector<1x8x8x128xf32>
    %70 = arith.truncf %69 : vector<1x8x8x128xf32> to vector<1x8x8x128xbf16>
    %c0_66 = arith.constant 0 : index
    %c0_67 = arith.constant 0 : index
    %c0_68 = arith.constant 0 : index
    %c0_69 = arith.constant 0 : index
    %71 = vector.load %arg5[%c0_66, %c0_67, %c0_68, %c0_69] : memref<1x8x8x128xbf16, #tpu.memory_space<vmem>>, vector<1x8x8x128xbf16>
    tpu.vector_store %arg5[%c0_66, %c0_67, %c0_68, %c0_69], %70 {strides = array<i32>} : memref<1x8x8x128xbf16, #tpu.memory_space<vmem>>, vector<1x8x8x128xbf16>,
    return
  }
  func.func @transform_0(%arg0: i32, %arg1: i32) -> (i32, i32, i32, i32) {
    %c0_i32 = arith.constant 0 : i32
    %c0_i32_0 = arith.constant 0 : i32
    %c0_i32_1 = arith.constant 0 : i32
    %c0_i32_2 = arith.constant 0 : i32
    return %arg0, %c0_i32, %c0_i32_0, %c0_i32_1 : i32, i32, i32, i32
  }
  func.func @transform_1(%arg0: i32, %arg1: i32) -> (i32, i32, i32) {
    %c0_i32 = arith.constant 0 : i32
    %c0_i32_0 = arith.constant 0 : i32
    %c0_i32_1 = arith.constant 0 : i32
    return %c0_i32, %c0_i32_0, %arg1 : i32, i32, i32
  }
  func.func @transform_2(%arg0: i32, %arg1: i32) -> (i32, i32) {
    %c0_i32 = arith.constant 0 : i32
    %c0_i32_0 = arith.constant 0 : i32
    return %c0_i32, %arg1 : i32, i32
  }
  func.func @transform_3(%arg0: i32, %arg1: i32) -> (i32, i32, i32, i32) {
    %c0_i32 = arith.constant 0 : i32
    %c0_i32_0 = arith.constant 0 : i32
    %c0_i32_1 = arith.constant 0 : i32
    return %arg0, %c0_i32, %c0_i32_0, %arg1 : i32, i32, i32, i32
  }
}

module attributes {stable_mosaic.version = 11 : i64} {
  func.func @_conv_bn_kernel(%arg0: i32, %arg1: i32, %arg2: memref<1x10x10x128xbf16, #tpu.memory_space<vmem>>, %arg3: memref<9x128x128xbf16, #tpu.memory_space<vmem>>, %arg4: memref<1x128xf32, #tpu.memory_space<vmem>>, %arg5: memref<1x8x8x128xbf16, #tpu.memory_space<vmem>>, %arg6: memref<1x8x8x128xbf16, #tpu.memory_space<vmem>>) attributes {dimension_semantics = [#tpu.dimension_semantics<parallel>, #tpu.dimension_semantics<parallel>], iteration_bounds = array<i64: 2, 1>, scalar_prefetch = 0 : i64, scratch_operands = 0 : i64, tpu.core_type = #tpu.core_type<tc>, window_params = [{transform_indices = @transform_0, window_bounds = array<i64: 1, 10, 10, 128>}, {transform_indices = @transform_1, window_bounds = array<i64: 9, 128, 128>}, {transform_indices = @transform_2, window_bounds = array<i64: 1, 128>}, {transform_indices = @transform_3, window_bounds = array<i64: 1, 8, 8, 128>}, {transform_indices = @transform_4, window_bounds = array<i64: 1, 8, 8, 128>}]} {
    %cst = arith.constant 0.000000e+00 : f32
    %0 = vector.broadcast %cst : f32 to vector<64x128xf32>
    %c0 = arith.constant 0 : index
    %c0_0 = arith.constant 0 : index
    %c0_1 = arith.constant 0 : index
    %c0_2 = arith.constant 0 : index
    %1 = vector.load %arg2[%c0, %c0_0, %c0_1, %c0_2] : memref<1x10x10x128xbf16, #tpu.memory_space<vmem>>, vector<1x8x8x128xbf16>
    %2 = vector.shape_cast %1 : vector<1x8x8x128xbf16> to vector<8x8x128xbf16>
    %3 = vector.shape_cast %2 : vector<8x8x128xbf16> to vector<64x128xbf16>
    %c0_3 = arith.constant 0 : index
    %c0_4 = arith.constant 0 : index
    %c0_5 = arith.constant 0 : index
    %4 = vector.load %arg3[%c0_3, %c0_4, %c0_5] : memref<9x128x128xbf16, #tpu.memory_space<vmem>>, vector<1x128x128xbf16>
    %5 = vector.shape_cast %4 : vector<1x128x128xbf16> to vector<128x128xbf16>
    %cst_6 = arith.constant dense<0.000000e+00> : vector<64x128xf32>
    %6 = tpu.matmul %3, %5, %cst_6 {dimension_numbers = #tpu.dot_dimension_numbers<[1], [0], [0], [1], [0, 0, 1, 1], [], []>} : vector<64x128xbf16>, vector<128x128xbf16>, vector<64x128xf32> -> vector<64x128xf32>
    %7 = arith.addf %0, %6 : vector<64x128xf32>
    %c0_7 = arith.constant 0 : index
    %c0_8 = arith.constant 0 : index
    %c1 = arith.constant 1 : index
    %c0_9 = arith.constant 0 : index
    %8 = vector.load %arg2[%c0_7, %c0_8, %c1, %c0_9] : memref<1x10x10x128xbf16, #tpu.memory_space<vmem>>, vector<1x8x8x128xbf16>
    %9 = vector.shape_cast %8 : vector<1x8x8x128xbf16> to vector<8x8x128xbf16>
    %10 = vector.shape_cast %9 : vector<8x8x128xbf16> to vector<64x128xbf16>
    %c1_10 = arith.constant 1 : index
    %c0_11 = arith.constant 0 : index
    %c0_12 = arith.constant 0 : index
    %11 = vector.load %arg3[%c1_10, %c0_11, %c0_12] : memref<9x128x128xbf16, #tpu.memory_space<vmem>>, vector<1x128x128xbf16>
    %12 = vector.shape_cast %11 : vector<1x128x128xbf16> to vector<128x128xbf16>
    %cst_13 = arith.constant dense<0.000000e+00> : vector<64x128xf32>
    %13 = tpu.matmul %10, %12, %cst_13 {dimension_numbers = #tpu.dot_dimension_numbers<[1], [0], [0], [1], [0, 0, 1, 1], [], []>} : vector<64x128xbf16>, vector<128x128xbf16>, vector<64x128xf32> -> vector<64x128xf32>
    %14 = arith.addf %7, %13 : vector<64x128xf32>
    %c0_14 = arith.constant 0 : index
    %c0_15 = arith.constant 0 : index
    %c2 = arith.constant 2 : index
    %c0_16 = arith.constant 0 : index
    %15 = vector.load %arg2[%c0_14, %c0_15, %c2, %c0_16] : memref<1x10x10x128xbf16, #tpu.memory_space<vmem>>, vector<1x8x8x128xbf16>
    %16 = vector.shape_cast %15 : vector<1x8x8x128xbf16> to vector<8x8x128xbf16>
    %17 = vector.shape_cast %16 : vector<8x8x128xbf16> to vector<64x128xbf16>
    %c2_17 = arith.constant 2 : index
    %c0_18 = arith.constant 0 : index
    %c0_19 = arith.constant 0 : index
    %18 = vector.load %arg3[%c2_17, %c0_18, %c0_19] : memref<9x128x128xbf16, #tpu.memory_space<vmem>>, vector<1x128x128xbf16>
    %19 = vector.shape_cast %18 : vector<1x128x128xbf16> to vector<128x128xbf16>
    %cst_20 = arith.constant dense<0.000000e+00> : vector<64x128xf32>
    %20 = tpu.matmul %17, %19, %cst_20 {dimension_numbers = #tpu.dot_dimension_numbers<[1], [0], [0], [1], [0, 0, 1, 1], [], []>} : vector<64x128xbf16>, vector<128x128xbf16>, vector<64x128xf32> -> vector<64x128xf32>
    %21 = arith.addf %14, %20 : vector<64x128xf32>
    %c0_21 = arith.constant 0 : index
    %c1_22 = arith.constant 1 : index
    %c0_23 = arith.constant 0 : index
    %c0_24 = arith.constant 0 : index
    %22 = vector.load %arg2[%c0_21, %c1_22, %c0_23, %c0_24] : memref<1x10x10x128xbf16, #tpu.memory_space<vmem>>, vector<1x8x8x128xbf16>
    %23 = vector.shape_cast %22 : vector<1x8x8x128xbf16> to vector<8x8x128xbf16>
    %24 = vector.shape_cast %23 : vector<8x8x128xbf16> to vector<64x128xbf16>
    %c3 = arith.constant 3 : index
    %c0_25 = arith.constant 0 : index
    %c0_26 = arith.constant 0 : index
    %25 = vector.load %arg3[%c3, %c0_25, %c0_26] : memref<9x128x128xbf16, #tpu.memory_space<vmem>>, vector<1x128x128xbf16>
    %26 = vector.shape_cast %25 : vector<1x128x128xbf16> to vector<128x128xbf16>
    %cst_27 = arith.constant dense<0.000000e+00> : vector<64x128xf32>
    %27 = tpu.matmul %24, %26, %cst_27 {dimension_numbers = #tpu.dot_dimension_numbers<[1], [0], [0], [1], [0, 0, 1, 1], [], []>} : vector<64x128xbf16>, vector<128x128xbf16>, vector<64x128xf32> -> vector<64x128xf32>
    %28 = arith.addf %21, %27 : vector<64x128xf32>
    %c0_28 = arith.constant 0 : index
    %c1_29 = arith.constant 1 : index
    %c1_30 = arith.constant 1 : index
    %c0_31 = arith.constant 0 : index
    %29 = vector.load %arg2[%c0_28, %c1_29, %c1_30, %c0_31] : memref<1x10x10x128xbf16, #tpu.memory_space<vmem>>, vector<1x8x8x128xbf16>
    %30 = vector.shape_cast %29 : vector<1x8x8x128xbf16> to vector<8x8x128xbf16>
    %31 = vector.shape_cast %30 : vector<8x8x128xbf16> to vector<64x128xbf16>
    %c4 = arith.constant 4 : index
    %c0_32 = arith.constant 0 : index
    %c0_33 = arith.constant 0 : index
    %32 = vector.load %arg3[%c4, %c0_32, %c0_33] : memref<9x128x128xbf16, #tpu.memory_space<vmem>>, vector<1x128x128xbf16>
    %33 = vector.shape_cast %32 : vector<1x128x128xbf16> to vector<128x128xbf16>
    %cst_34 = arith.constant dense<0.000000e+00> : vector<64x128xf32>
    %34 = tpu.matmul %31, %33, %cst_34 {dimension_numbers = #tpu.dot_dimension_numbers<[1], [0], [0], [1], [0, 0, 1, 1], [], []>} : vector<64x128xbf16>, vector<128x128xbf16>, vector<64x128xf32> -> vector<64x128xf32>
    %35 = arith.addf %28, %34 : vector<64x128xf32>
    %c0_35 = arith.constant 0 : index
    %c1_36 = arith.constant 1 : index
    %c2_37 = arith.constant 2 : index
    %c0_38 = arith.constant 0 : index
    %36 = vector.load %arg2[%c0_35, %c1_36, %c2_37, %c0_38] : memref<1x10x10x128xbf16, #tpu.memory_space<vmem>>, vector<1x8x8x128xbf16>
    %37 = vector.shape_cast %36 : vector<1x8x8x128xbf16> to vector<8x8x128xbf16>
    %38 = vector.shape_cast %37 : vector<8x8x128xbf16> to vector<64x128xbf16>
    %c5 = arith.constant 5 : index
    %c0_39 = arith.constant 0 : index
    %c0_40 = arith.constant 0 : index
    %39 = vector.load %arg3[%c5, %c0_39, %c0_40] : memref<9x128x128xbf16, #tpu.memory_space<vmem>>, vector<1x128x128xbf16>
    %40 = vector.shape_cast %39 : vector<1x128x128xbf16> to vector<128x128xbf16>
    %cst_41 = arith.constant dense<0.000000e+00> : vector<64x128xf32>
    %41 = tpu.matmul %38, %40, %cst_41 {dimension_numbers = #tpu.dot_dimension_numbers<[1], [0], [0], [1], [0, 0, 1, 1], [], []>} : vector<64x128xbf16>, vector<128x128xbf16>, vector<64x128xf32> -> vector<64x128xf32>
    %42 = arith.addf %35, %41 : vector<64x128xf32>
    %c0_42 = arith.constant 0 : index
    %c2_43 = arith.constant 2 : index
    %c0_44 = arith.constant 0 : index
    %c0_45 = arith.constant 0 : index
    %43 = vector.load %arg2[%c0_42, %c2_43, %c0_44, %c0_45] : memref<1x10x10x128xbf16, #tpu.memory_space<vmem>>, vector<1x8x8x128xbf16>
    %44 = vector.shape_cast %43 : vector<1x8x8x128xbf16> to vector<8x8x128xbf16>
    %45 = vector.shape_cast %44 : vector<8x8x128xbf16> to vector<64x128xbf16>
    %c6 = arith.constant 6 : index
    %c0_46 = arith.constant 0 : index
    %c0_47 = arith.constant 0 : index
    %46 = vector.load %arg3[%c6, %c0_46, %c0_47] : memref<9x128x128xbf16, #tpu.memory_space<vmem>>, vector<1x128x128xbf16>
    %47 = vector.shape_cast %46 : vector<1x128x128xbf16> to vector<128x128xbf16>
    %cst_48 = arith.constant dense<0.000000e+00> : vector<64x128xf32>
    %48 = tpu.matmul %45, %47, %cst_48 {dimension_numbers = #tpu.dot_dimension_numbers<[1], [0], [0], [1], [0, 0, 1, 1], [], []>} : vector<64x128xbf16>, vector<128x128xbf16>, vector<64x128xf32> -> vector<64x128xf32>
    %49 = arith.addf %42, %48 : vector<64x128xf32>
    %c0_49 = arith.constant 0 : index
    %c2_50 = arith.constant 2 : index
    %c1_51 = arith.constant 1 : index
    %c0_52 = arith.constant 0 : index
    %50 = vector.load %arg2[%c0_49, %c2_50, %c1_51, %c0_52] : memref<1x10x10x128xbf16, #tpu.memory_space<vmem>>, vector<1x8x8x128xbf16>
    %51 = vector.shape_cast %50 : vector<1x8x8x128xbf16> to vector<8x8x128xbf16>
    %52 = vector.shape_cast %51 : vector<8x8x128xbf16> to vector<64x128xbf16>
    %c7 = arith.constant 7 : index
    %c0_53 = arith.constant 0 : index
    %c0_54 = arith.constant 0 : index
    %53 = vector.load %arg3[%c7, %c0_53, %c0_54] : memref<9x128x128xbf16, #tpu.memory_space<vmem>>, vector<1x128x128xbf16>
    %54 = vector.shape_cast %53 : vector<1x128x128xbf16> to vector<128x128xbf16>
    %cst_55 = arith.constant dense<0.000000e+00> : vector<64x128xf32>
    %55 = tpu.matmul %52, %54, %cst_55 {dimension_numbers = #tpu.dot_dimension_numbers<[1], [0], [0], [1], [0, 0, 1, 1], [], []>} : vector<64x128xbf16>, vector<128x128xbf16>, vector<64x128xf32> -> vector<64x128xf32>
    %56 = arith.addf %49, %55 : vector<64x128xf32>
    %c0_56 = arith.constant 0 : index
    %c2_57 = arith.constant 2 : index
    %c2_58 = arith.constant 2 : index
    %c0_59 = arith.constant 0 : index
    %57 = vector.load %arg2[%c0_56, %c2_57, %c2_58, %c0_59] : memref<1x10x10x128xbf16, #tpu.memory_space<vmem>>, vector<1x8x8x128xbf16>
    %58 = vector.shape_cast %57 : vector<1x8x8x128xbf16> to vector<8x8x128xbf16>
    %59 = vector.shape_cast %58 : vector<8x8x128xbf16> to vector<64x128xbf16>
    %c8 = arith.constant 8 : index
    %c0_60 = arith.constant 0 : index
    %c0_61 = arith.constant 0 : index
    %60 = vector.load %arg3[%c8, %c0_60, %c0_61] : memref<9x128x128xbf16, #tpu.memory_space<vmem>>, vector<1x128x128xbf16>
    %61 = vector.shape_cast %60 : vector<1x128x128xbf16> to vector<128x128xbf16>
    %cst_62 = arith.constant dense<0.000000e+00> : vector<64x128xf32>
    %62 = tpu.matmul %59, %61, %cst_62 {dimension_numbers = #tpu.dot_dimension_numbers<[1], [0], [0], [1], [0, 0, 1, 1], [], []>} : vector<64x128xbf16>, vector<128x128xbf16>, vector<64x128xf32> -> vector<64x128xf32>
    %63 = arith.addf %56, %62 : vector<64x128xf32>
    %c0_63 = arith.constant 0 : index
    %c0_64 = arith.constant 0 : index
    %64 = vector.load %arg4[%c0_63, %c0_64] : memref<1x128xf32, #tpu.memory_space<vmem>>, vector<1x128xf32>
    %65 = vector.broadcast %64 : vector<1x128xf32> to vector<64x128xf32>
    %66 = arith.addf %63, %65 : vector<64x128xf32>
    %c0_65 = arith.constant 0 : index
    %c0_66 = arith.constant 0 : index
    %c0_67 = arith.constant 0 : index
    %c0_68 = arith.constant 0 : index
    %67 = vector.load %arg5[%c0_65, %c0_66, %c0_67, %c0_68] : memref<1x8x8x128xbf16, #tpu.memory_space<vmem>>, vector<1x8x8x128xbf16>
    %68 = vector.shape_cast %67 : vector<1x8x8x128xbf16> to vector<64x128xbf16>
    %69 = arith.extf %68 : vector<64x128xbf16> to vector<64x128xf32>
    %70 = arith.addf %66, %69 : vector<64x128xf32>
    %71 = vector.shape_cast %70 : vector<64x128xf32> to vector<1x8x8x128xf32>
    %72 = arith.truncf %71 : vector<1x8x8x128xf32> to vector<1x8x8x128xbf16>
    %c0_69 = arith.constant 0 : index
    %c0_70 = arith.constant 0 : index
    %c0_71 = arith.constant 0 : index
    %c0_72 = arith.constant 0 : index
    %73 = vector.load %arg6[%c0_69, %c0_70, %c0_71, %c0_72] : memref<1x8x8x128xbf16, #tpu.memory_space<vmem>>, vector<1x8x8x128xbf16>
    tpu.vector_store %arg6[%c0_69, %c0_70, %c0_71, %c0_72], %72 {strides = array<i32>} : memref<1x8x8x128xbf16, #tpu.memory_space<vmem>>, vector<1x8x8x128xbf16>,
    return
  }
  func.func @transform_0(%arg0: i32, %arg1: i32) -> (i32, i32, i32, i32) {
    %c0_i32 = arith.constant 0 : i32
    %c0_i32_0 = arith.constant 0 : i32
    %c0_i32_1 = arith.constant 0 : i32
    %c0_i32_2 = arith.constant 0 : i32
    return %arg0, %c0_i32, %c0_i32_0, %c0_i32_1 : i32, i32, i32, i32
  }
  func.func @transform_1(%arg0: i32, %arg1: i32) -> (i32, i32, i32) {
    %c0_i32 = arith.constant 0 : i32
    %c0_i32_0 = arith.constant 0 : i32
    %c0_i32_1 = arith.constant 0 : i32
    return %c0_i32, %c0_i32_0, %arg1 : i32, i32, i32
  }
  func.func @transform_2(%arg0: i32, %arg1: i32) -> (i32, i32) {
    %c0_i32 = arith.constant 0 : i32
    %c0_i32_0 = arith.constant 0 : i32
    return %c0_i32, %arg1 : i32, i32
  }
  func.func @transform_3(%arg0: i32, %arg1: i32) -> (i32, i32, i32, i32) {
    %c0_i32 = arith.constant 0 : i32
    %c0_i32_0 = arith.constant 0 : i32
    %c0_i32_1 = arith.constant 0 : i32
    return %arg0, %c0_i32, %c0_i32_0, %arg1 : i32, i32, i32, i32
  }
  func.func @transform_4(%arg0: i32, %arg1: i32) -> (i32, i32, i32, i32) {
    %c0_i32 = arith.constant 0 : i32
    %c0_i32_0 = arith.constant 0 : i32
    %c0_i32_1 = arith.constant 0 : i32
    return %arg0, %c0_i32, %c0_i32_0, %arg1 : i32, i32, i32, i32
  }
}

module attributes {stable_mosaic.version = 11 : i64} {
  func.func @_conv_bn_kernel(%arg0: i32, %arg1: i32, %arg2: memref<1x10x10x128xbf16, #tpu.memory_space<vmem>>, %arg3: memref<9x128x128xbf16, #tpu.memory_space<vmem>>, %arg4: memref<1x128xf32, #tpu.memory_space<vmem>>, %arg5: memref<1x8x8x128xbf16, #tpu.memory_space<vmem>>) attributes {dimension_semantics = [#tpu.dimension_semantics<parallel>, #tpu.dimension_semantics<parallel>], iteration_bounds = array<i64: 2, 1>, scalar_prefetch = 0 : i64, scratch_operands = 0 : i64, tpu.core_type = #tpu.core_type<tc>, window_params = [{transform_indices = @transform_0, window_bounds = array<i64: 1, 10, 10, 128>}, {transform_indices = @transform_1, window_bounds = array<i64: 9, 128, 128>}, {transform_indices = @transform_2, window_bounds = array<i64: 1, 128>}, {transform_indices = @transform_3, window_bounds = array<i64: 1, 8, 8, 128>}]} {
    %cst = arith.constant 0.000000e+00 : f32
    %0 = vector.broadcast %cst : f32 to vector<64x128xf32>
    %c0 = arith.constant 0 : index
    %c0_0 = arith.constant 0 : index
    %c0_1 = arith.constant 0 : index
    %c0_2 = arith.constant 0 : index
    %1 = vector.load %arg2[%c0, %c0_0, %c0_1, %c0_2] : memref<1x10x10x128xbf16, #tpu.memory_space<vmem>>, vector<1x8x8x128xbf16>
    %2 = vector.shape_cast %1 : vector<1x8x8x128xbf16> to vector<8x8x128xbf16>
    %3 = vector.shape_cast %2 : vector<8x8x128xbf16> to vector<64x128xbf16>
    %c0_3 = arith.constant 0 : index
    %c0_4 = arith.constant 0 : index
    %c0_5 = arith.constant 0 : index
    %4 = vector.load %arg3[%c0_3, %c0_4, %c0_5] : memref<9x128x128xbf16, #tpu.memory_space<vmem>>, vector<1x128x128xbf16>
    %5 = vector.shape_cast %4 : vector<1x128x128xbf16> to vector<128x128xbf16>
    %cst_6 = arith.constant dense<0.000000e+00> : vector<64x128xf32>
    %6 = tpu.matmul %3, %5, %cst_6 {dimension_numbers = #tpu.dot_dimension_numbers<[1], [0], [0], [1], [0, 0, 1, 1], [], []>} : vector<64x128xbf16>, vector<128x128xbf16>, vector<64x128xf32> -> vector<64x128xf32>
    %7 = arith.addf %0, %6 : vector<64x128xf32>
    %c0_7 = arith.constant 0 : index
    %c0_8 = arith.constant 0 : index
    %c1 = arith.constant 1 : index
    %c0_9 = arith.constant 0 : index
    %8 = vector.load %arg2[%c0_7, %c0_8, %c1, %c0_9] : memref<1x10x10x128xbf16, #tpu.memory_space<vmem>>, vector<1x8x8x128xbf16>
    %9 = vector.shape_cast %8 : vector<1x8x8x128xbf16> to vector<8x8x128xbf16>
    %10 = vector.shape_cast %9 : vector<8x8x128xbf16> to vector<64x128xbf16>
    %c1_10 = arith.constant 1 : index
    %c0_11 = arith.constant 0 : index
    %c0_12 = arith.constant 0 : index
    %11 = vector.load %arg3[%c1_10, %c0_11, %c0_12] : memref<9x128x128xbf16, #tpu.memory_space<vmem>>, vector<1x128x128xbf16>
    %12 = vector.shape_cast %11 : vector<1x128x128xbf16> to vector<128x128xbf16>
    %cst_13 = arith.constant dense<0.000000e+00> : vector<64x128xf32>
    %13 = tpu.matmul %10, %12, %cst_13 {dimension_numbers = #tpu.dot_dimension_numbers<[1], [0], [0], [1], [0, 0, 1, 1], [], []>} : vector<64x128xbf16>, vector<128x128xbf16>, vector<64x128xf32> -> vector<64x128xf32>
    %14 = arith.addf %7, %13 : vector<64x128xf32>
    %c0_14 = arith.constant 0 : index
    %c0_15 = arith.constant 0 : index
    %c2 = arith.constant 2 : index
    %c0_16 = arith.constant 0 : index
    %15 = vector.load %arg2[%c0_14, %c0_15, %c2, %c0_16] : memref<1x10x10x128xbf16, #tpu.memory_space<vmem>>, vector<1x8x8x128xbf16>
    %16 = vector.shape_cast %15 : vector<1x8x8x128xbf16> to vector<8x8x128xbf16>
    %17 = vector.shape_cast %16 : vector<8x8x128xbf16> to vector<64x128xbf16>
    %c2_17 = arith.constant 2 : index
    %c0_18 = arith.constant 0 : index
    %c0_19 = arith.constant 0 : index
    %18 = vector.load %arg3[%c2_17, %c0_18, %c0_19] : memref<9x128x128xbf16, #tpu.memory_space<vmem>>, vector<1x128x128xbf16>
    %19 = vector.shape_cast %18 : vector<1x128x128xbf16> to vector<128x128xbf16>
    %cst_20 = arith.constant dense<0.000000e+00> : vector<64x128xf32>
    %20 = tpu.matmul %17, %19, %cst_20 {dimension_numbers = #tpu.dot_dimension_numbers<[1], [0], [0], [1], [0, 0, 1, 1], [], []>} : vector<64x128xbf16>, vector<128x128xbf16>, vector<64x128xf32> -> vector<64x128xf32>
    %21 = arith.addf %14, %20 : vector<64x128xf32>
    %c0_21 = arith.constant 0 : index
    %c1_22 = arith.constant 1 : index
    %c0_23 = arith.constant 0 : index
    %c0_24 = arith.constant 0 : index
    %22 = vector.load %arg2[%c0_21, %c1_22, %c0_23, %c0_24] : memref<1x10x10x128xbf16, #tpu.memory_space<vmem>>, vector<1x8x8x128xbf16>
    %23 = vector.shape_cast %22 : vector<1x8x8x128xbf16> to vector<8x8x128xbf16>
    %24 = vector.shape_cast %23 : vector<8x8x128xbf16> to vector<64x128xbf16>
    %c3 = arith.constant 3 : index
    %c0_25 = arith.constant 0 : index
    %c0_26 = arith.constant 0 : index
    %25 = vector.load %arg3[%c3, %c0_25, %c0_26] : memref<9x128x128xbf16, #tpu.memory_space<vmem>>, vector<1x128x128xbf16>
    %26 = vector.shape_cast %25 : vector<1x128x128xbf16> to vector<128x128xbf16>
    %cst_27 = arith.constant dense<0.000000e+00> : vector<64x128xf32>
    %27 = tpu.matmul %24, %26, %cst_27 {dimension_numbers = #tpu.dot_dimension_numbers<[1], [0], [0], [1], [0, 0, 1, 1], [], []>} : vector<64x128xbf16>, vector<128x128xbf16>, vector<64x128xf32> -> vector<64x128xf32>
    %28 = arith.addf %21, %27 : vector<64x128xf32>
    %c0_28 = arith.constant 0 : index
    %c1_29 = arith.constant 1 : index
    %c1_30 = arith.constant 1 : index
    %c0_31 = arith.constant 0 : index
    %29 = vector.load %arg2[%c0_28, %c1_29, %c1_30, %c0_31] : memref<1x10x10x128xbf16, #tpu.memory_space<vmem>>, vector<1x8x8x128xbf16>
    %30 = vector.shape_cast %29 : vector<1x8x8x128xbf16> to vector<8x8x128xbf16>
    %31 = vector.shape_cast %30 : vector<8x8x128xbf16> to vector<64x128xbf16>
    %c4 = arith.constant 4 : index
    %c0_32 = arith.constant 0 : index
    %c0_33 = arith.constant 0 : index
    %32 = vector.load %arg3[%c4, %c0_32, %c0_33] : memref<9x128x128xbf16, #tpu.memory_space<vmem>>, vector<1x128x128xbf16>
    %33 = vector.shape_cast %32 : vector<1x128x128xbf16> to vector<128x128xbf16>
    %cst_34 = arith.constant dense<0.000000e+00> : vector<64x128xf32>
    %34 = tpu.matmul %31, %33, %cst_34 {dimension_numbers = #tpu.dot_dimension_numbers<[1], [0], [0], [1], [0, 0, 1, 1], [], []>} : vector<64x128xbf16>, vector<128x128xbf16>, vector<64x128xf32> -> vector<64x128xf32>
    %35 = arith.addf %28, %34 : vector<64x128xf32>
    %c0_35 = arith.constant 0 : index
    %c1_36 = arith.constant 1 : index
    %c2_37 = arith.constant 2 : index
    %c0_38 = arith.constant 0 : index
    %36 = vector.load %arg2[%c0_35, %c1_36, %c2_37, %c0_38] : memref<1x10x10x128xbf16, #tpu.memory_space<vmem>>, vector<1x8x8x128xbf16>
    %37 = vector.shape_cast %36 : vector<1x8x8x128xbf16> to vector<8x8x128xbf16>
    %38 = vector.shape_cast %37 : vector<8x8x128xbf16> to vector<64x128xbf16>
    %c5 = arith.constant 5 : index
    %c0_39 = arith.constant 0 : index
    %c0_40 = arith.constant 0 : index
    %39 = vector.load %arg3[%c5, %c0_39, %c0_40] : memref<9x128x128xbf16, #tpu.memory_space<vmem>>, vector<1x128x128xbf16>
    %40 = vector.shape_cast %39 : vector<1x128x128xbf16> to vector<128x128xbf16>
    %cst_41 = arith.constant dense<0.000000e+00> : vector<64x128xf32>
    %41 = tpu.matmul %38, %40, %cst_41 {dimension_numbers = #tpu.dot_dimension_numbers<[1], [0], [0], [1], [0, 0, 1, 1], [], []>} : vector<64x128xbf16>, vector<128x128xbf16>, vector<64x128xf32> -> vector<64x128xf32>
    %42 = arith.addf %35, %41 : vector<64x128xf32>
    %c0_42 = arith.constant 0 : index
    %c2_43 = arith.constant 2 : index
    %c0_44 = arith.constant 0 : index
    %c0_45 = arith.constant 0 : index
    %43 = vector.load %arg2[%c0_42, %c2_43, %c0_44, %c0_45] : memref<1x10x10x128xbf16, #tpu.memory_space<vmem>>, vector<1x8x8x128xbf16>
    %44 = vector.shape_cast %43 : vector<1x8x8x128xbf16> to vector<8x8x128xbf16>
    %45 = vector.shape_cast %44 : vector<8x8x128xbf16> to vector<64x128xbf16>
    %c6 = arith.constant 6 : index
    %c0_46 = arith.constant 0 : index
    %c0_47 = arith.constant 0 : index
    %46 = vector.load %arg3[%c6, %c0_46, %c0_47] : memref<9x128x128xbf16, #tpu.memory_space<vmem>>, vector<1x128x128xbf16>
    %47 = vector.shape_cast %46 : vector<1x128x128xbf16> to vector<128x128xbf16>
    %cst_48 = arith.constant dense<0.000000e+00> : vector<64x128xf32>
    %48 = tpu.matmul %45, %47, %cst_48 {dimension_numbers = #tpu.dot_dimension_numbers<[1], [0], [0], [1], [0, 0, 1, 1], [], []>} : vector<64x128xbf16>, vector<128x128xbf16>, vector<64x128xf32> -> vector<64x128xf32>
    %49 = arith.addf %42, %48 : vector<64x128xf32>
    %c0_49 = arith.constant 0 : index
    %c2_50 = arith.constant 2 : index
    %c1_51 = arith.constant 1 : index
    %c0_52 = arith.constant 0 : index
    %50 = vector.load %arg2[%c0_49, %c2_50, %c1_51, %c0_52] : memref<1x10x10x128xbf16, #tpu.memory_space<vmem>>, vector<1x8x8x128xbf16>
    %51 = vector.shape_cast %50 : vector<1x8x8x128xbf16> to vector<8x8x128xbf16>
    %52 = vector.shape_cast %51 : vector<8x8x128xbf16> to vector<64x128xbf16>
    %c7 = arith.constant 7 : index
    %c0_53 = arith.constant 0 : index
    %c0_54 = arith.constant 0 : index
    %53 = vector.load %arg3[%c7, %c0_53, %c0_54] : memref<9x128x128xbf16, #tpu.memory_space<vmem>>, vector<1x128x128xbf16>
    %54 = vector.shape_cast %53 : vector<1x128x128xbf16> to vector<128x128xbf16>
    %cst_55 = arith.constant dense<0.000000e+00> : vector<64x128xf32>
    %55 = tpu.matmul %52, %54, %cst_55 {dimension_numbers = #tpu.dot_dimension_numbers<[1], [0], [0], [1], [0, 0, 1, 1], [], []>} : vector<64x128xbf16>, vector<128x128xbf16>, vector<64x128xf32> -> vector<64x128xf32>
    %56 = arith.addf %49, %55 : vector<64x128xf32>
    %c0_56 = arith.constant 0 : index
    %c2_57 = arith.constant 2 : index
    %c2_58 = arith.constant 2 : index
    %c0_59 = arith.constant 0 : index
    %57 = vector.load %arg2[%c0_56, %c2_57, %c2_58, %c0_59] : memref<1x10x10x128xbf16, #tpu.memory_space<vmem>>, vector<1x8x8x128xbf16>
    %58 = vector.shape_cast %57 : vector<1x8x8x128xbf16> to vector<8x8x128xbf16>
    %59 = vector.shape_cast %58 : vector<8x8x128xbf16> to vector<64x128xbf16>
    %c8 = arith.constant 8 : index
    %c0_60 = arith.constant 0 : index
    %c0_61 = arith.constant 0 : index
    %60 = vector.load %arg3[%c8, %c0_60, %c0_61] : memref<9x128x128xbf16, #tpu.memory_space<vmem>>, vector<1x128x128xbf16>
    %61 = vector.shape_cast %60 : vector<1x128x128xbf16> to vector<128x128xbf16>
    %cst_62 = arith.constant dense<0.000000e+00> : vector<64x128xf32>
    %62 = tpu.matmul %59, %61, %cst_62 {dimension_numbers = #tpu.dot_dimension_numbers<[1], [0], [0], [1], [0, 0, 1, 1], [], []>} : vector<64x128xbf16>, vector<128x128xbf16>, vector<64x128xf32> -> vector<64x128xf32>
    %63 = arith.addf %56, %62 : vector<64x128xf32>
    %c0_63 = arith.constant 0 : index
    %c0_64 = arith.constant 0 : index
    %64 = vector.load %arg4[%c0_63, %c0_64] : memref<1x128xf32, #tpu.memory_space<vmem>>, vector<1x128xf32>
    %65 = vector.broadcast %64 : vector<1x128xf32> to vector<64x128xf32>
    %66 = arith.addf %63, %65 : vector<64x128xf32>
    %cst_65 = arith.constant 0.000000e+00 : f32
    %67 = vector.broadcast %cst_65 : f32 to vector<64x128xf32>
    %68 = arith.maximumf %66, %67 : vector<64x128xf32>
    %69 = vector.shape_cast %68 : vector<64x128xf32> to vector<1x8x8x128xf32>
    %70 = arith.truncf %69 : vector<1x8x8x128xf32> to vector<1x8x8x128xbf16>
    %c0_66 = arith.constant 0 : index
    %c0_67 = arith.constant 0 : index
    %c0_68 = arith.constant 0 : index
    %c0_69 = arith.constant 0 : index
    %71 = vector.load %arg5[%c0_66, %c0_67, %c0_68, %c0_69] : memref<1x8x8x128xbf16, #tpu.memory_space<vmem>>, vector<1x8x8x128xbf16>
    tpu.vector_store %arg5[%c0_66, %c0_67, %c0_68, %c0_69], %70 {strides = array<i32>} : memref<1x8x8x128xbf16, #tpu.memory_space<vmem>>, vector<1x8x8x128xbf16>,
    return
  }
  func.func @transform_0(%arg0: i32, %arg1: i32) -> (i32, i32, i32, i32) {
    %c0_i32 = arith.constant 0 : i32
    %c0_i32_0 = arith.constant 0 : i32
    %c0_i32_1 = arith.constant 0 : i32
    %c0_i32_2 = arith.constant 0 : i32
    return %arg0, %c0_i32, %c0_i32_0, %c0_i32_1 : i32, i32, i32, i32
  }
  func.func @transform_1(%arg0: i32, %arg1: i32) -> (i32, i32, i32) {
    %c0_i32 = arith.constant 0 : i32
    %c0_i32_0 = arith.constant 0 : i32
    %c0_i32_1 = arith.constant 0 : i32
    return %c0_i32, %c0_i32_0, %arg1 : i32, i32, i32
  }
  func.func @transform_2(%arg0: i32, %arg1: i32) -> (i32, i32) {
    %c0_i32 = arith.constant 0 : i32
    %c0_i32_0 = arith.constant 0 : i32
    return %c0_i32, %arg1 : i32, i32
  }
  func.func @transform_3(%arg0: i32, %arg1: i32) -> (i32, i32, i32, i32) {
    %c0_i32 = arith.constant 0 : i32
    %c0_i32_0 = arith.constant 0 : i32
    %c0_i32_1 = arith.constant 0 : i32
    return %arg0, %c0_i32, %c0_i32_0, %arg1 : i32, i32, i32, i32
  }
}

</mosaic_0001>

<bundles_post_ra>
// kernel: _lambda_.5
= control target key start
LH: loop header
LB: loop body
LE: loop exit
PB: predicated region body
PF: predicated region fallthrough
CT: control target
= control target key end

     0   :  { %s695_s12 = smov 0   ;;  %s697_s13 = smov 0   ;;  %s768_s0 = inlined_call_operand.vmem [shape: bf16[2,8,8,128], index: 0, kind: input, shape index: {}]   ;;  %s769_s1 = inlined_call_operand.vmem [shape: bf16[1,128,128], index: 1, kind: input, shape index: {}]   ;;  %s770_s2 = inlined_call_operand.vmem [shape: f32[1,128], index: 2, kind: input, shape index: {}]   ;;  %s771_s3 = inlined_call_operand.vmem [shape: bf16[2,8,8,128], index: 3, kind: output, shape index: {}]  }
   0x1   :  { %s699_s14 = smov 0  }
   0x2 LB: > { %s25_s15 = sadd.s32 1, %s669_s13  ;;  %p518_p0 = scmp.ge.s32.totalorder %s673_s14, 1  ;;  %s673_s14 = sphi %s699_s14, %s13_s14   ;;  %s669_s13 = sphi %s697_s13, %s773_s13   ;;  %s665_s12 = sphi %s695_s12, %s772_s12  }
   0x3   : > { %p27_p1 = scmp.ge.s32.totalorder %s25_s15, 2  ;;  %p168_p2 = scmp.lt.s32.totalorder %s673_s14, 3 }
   0x5   : > { %s775_s15 = smov (%p27_p1, %s25_s15), 0  ;;  %p169_p3 = pnand %p518_p0, %p168_p2 }
   0x6   : > { %v639_v0 = vld [vmem:[%s769_s1] sm:$0xff] (!%p169_p3)   ;;  %p202_p4 = scmp.lt.s32.totalorder (!%p169_p3), %s665_s12, 1  ;;  %v640_v1 = vld [vmem:[%s769_s1 + $0x8] sm:$0xff] (!%p169_p3)   ;;  %v641_v2 = vld [vmem:[%s769_s1 + $0x10] sm:$0xff] (!%p169_p3)  }
   0x7   : > { %172 = sbr.rel (%p169_p3) target bundleno = 259 (0x103), region = 32  ;;  %575 = vmatprep.subr.bf16.mxu0 (!%p169_p3), %v639_v0  ;;  %599 = vmatprep.subr.bf16.mxu1 (!%p169_p3), %v639_v0  ;;  %v642_v3 = vld [vmem:[%s769_s1 + $0x18] sm:$0xff] (!%p169_p3)   ;;  %v643_v6 = vld [vmem:[%s769_s1 + $0x20] sm:$0xff] (!%p169_p3)   ;;  %v644_v7 = vld [vmem:[%s769_s1 + $0x28] sm:$0xff] (!%p169_p3)  }
   0x8   : > { %576 = vmatpush3.bf16.msra.mxu0 (!%p169_p3), %v639_v0  ;;  %607 = vmatpush3.bf16.msra.mxu1 (!%p169_p3), %v639_v0  ;;  %v645_v8 = vld [vmem:[%s769_s1 + $0x30] sm:$0xff] (!%p169_p3)   ;;  %v646_v9 = vld [vmem:[%s769_s1 + $0x38] sm:$0xff] (!%p169_p3)   ;;  %v523_v13 = vld [vmem:[%s770_s2] ss:$0 sm:$0xff] (!%p169_p3) }
   0x9   : > { %577 = vmatprep.subr.bf16.mxu0 (!%p169_p3), %v640_v1  ;;  %600 = vmatprep.subr.bf16.mxu1 (!%p169_p3), %v640_v1 }
   0xc   : > { %578 = vmatpush3.bf16.msra.mxu0 (!%p169_p3), %v640_v1  ;;  %608 = vmatpush3.bf16.msra.mxu1 (!%p169_p3), %v640_v1 }
   0xd   : > { %579 = vmatprep.subr.bf16.mxu0 (!%p169_p3), %v641_v2  ;;  %601 = vmatprep.subr.bf16.mxu1 (!%p169_p3), %v641_v2 }
   0xe   : > { %s777_s12 = smov (!%p202_p4, %s665_s12), 1 }
   0xf   : > { %s538_s22 = sshll.u32 %s777_s12, 5 }
  0x10   : > { %s730_s25 = scalar_lea.vmem %s768_s0, %s538_s22  ;;  %580 = vmatpush3.bf16.msra.mxu0 %v641_v2  ;;  %609 = vmatpush3.bf16.msra.mxu1 %v641_v2  ;;  %s221_s17 = scalar_lea.vmem %s771_s3, %s538_s22 }
  0x11   : > { %v647_v4 = vld [vmem:[%s730_s25] sm:$0xff]   ;;  %v648_v5 = vld [vmem:[%s730_s25 + $0x10] sm:$0xff]   ;;  %581 = vmatprep.subr.bf16.mxu0 %v642_v3  ;;  %602 = vmatprep.subr.bf16.mxu1 %v642_v3  ;;  %v649_v10 = vld [vmem:[%s730_s25 + $0x8] sm:$0xff]  }
  0x12   : > { %591 = vmatprep.mubr.bf16.mxu0 %v647_v4  ;;  %595 = vmatprep.mubr.bf16.mxu1 %v648_v5  ;;  %v650_v11 = vld [vmem:[%s730_s25 + $0x18] sm:$0xff]  }
  0x14   : > { %582 = vmatpush3.bf16.msra.mxu0 %v642_v3  ;;  %610 = vmatpush3.bf16.msra.mxu1 %v642_v3 }
  0x15   : > { %583 = vmatprep.subr.bf16.mxu0 %v643_v6  ;;  %603 = vmatprep.subr.bf16.mxu1 %v643_v6 }
  0x18   : > { %584 = vmatpush3.bf16.msra.mxu0 %v643_v6  ;;  %611 = vmatpush3.bf16.msra.mxu1 %v643_v6 }
  0x19   : > { %585 = vmatprep.subr.bf16.mxu0 %v644_v7  ;;  %604 = vmatprep.subr.bf16.mxu1 %v644_v7 }
  0x1c   : > { %586 = vmatpush3.bf16.msra.mxu0 %v644_v7  ;;  %612 = vmatpush3.bf16.msra.mxu1 %v644_v7 }
  0x1d   : > { %587 = vmatprep.subr.bf16.mxu0 %v645_v8  ;;  %605 = vmatprep.subr.bf16.mxu1 %v645_v8 }
  0x20   : > { %588 = vmatpush3.bf16.msra.mxu0 %v645_v8  ;;  %613 = vmatpush3.bf16.msra.mxu1 %v645_v8 }
  0x21   : > { %589 = vmatprep.subr.bf16.mxu0 %v646_v9  ;;  %606 = vmatprep.subr.bf16.mxu1 %v646_v9 }
  0x24   : > { %590 = vmatpush3.bf16.msra.mxu0 %v646_v9  ;;  %614 = vmatpush3.bf16.msra.mxu1 %v646_v9 }
  0x27   : > { %592 = vmatmul.mubr.bf16.vlgmr.msra.gmra.mrb[0].mxu0 %v649_v10  ;;  %596 = vmatmul.mubr.bf16.vlgmr.msra.gmra.mrb[0].mxu1 %v650_v11 }
  0xfa   : > { %v593_v12 = vpop.f32.mrb[0].mxu0  ;;  %v597_v14 = vpop.f32.mrb[0].mxu1 }
  0xfb   : > { %v360_v15 = vpop.f32.mrb[1].mxu0  ;;  %v376_v16 = vpop.f32.mrb[1].mxu1  ;;  %v369_v19 = vadd.f32 %v593_v12, %v523_v13  ;;  %v385_v20 = vadd.f32 %v597_v14, %v523_v13 }
  0xfc   : > { %v594_v17 = vpop.f32.mrb[2].mxu0  ;;  %v598_v18 = vpop.f32.mrb[2].mxu1  ;;  %v361_v25 = vadd.f32 %v523_v13, %v360_v15  ;;  %v377_v26 = vadd.f32 %v523_v13, %v376_v16 }
  0xfd   : > { %v372_v21 = vadd.f32 %v594_v17, %v523_v13  ;;  %v388_v22 = vadd.f32 %v598_v18, %v523_v13  ;;  %v363_v23 = vpop.f32.mrb[3].mxu0  ;;  %v379_v24 = vpop.f32.mrb[3].mxu1 }
  0xfe   : > { %v364_v27 = vadd.f32 %v523_v13, %v363_v23  ;;  %v380_v28 = vadd.f32 %v523_v13, %v379_v24 }
  0xff   : > { %v548_v29 = vpack.c.bf16 %v372_v21, %v369_v19  ;;  %v558_v30 = vpack.c.bf16 %v388_v22, %v385_v20 }
 0x100   : > { %v543_v31 = vpack.c.bf16 %v364_v27, %v361_v25  ;;  %v553_v32 = vpack.c.bf16 %v380_v28, %v377_v26 }
 0x101   : > { %560 = vst [vmem:[%s221_s17 + $0x8] sm:$0xff] %v548_v29   ;;  %562 = vst [vmem:[%s221_s17 + $0x18] sm:$0xff] %v558_v30  }
 0x102   : > { %544 = vst [vmem:[%s221_s17] sm:$0xff] %v543_v31   ;;  %561 = vst [vmem:[%s221_s17 + $0x10] sm:$0xff] %v553_v32  }
 0x103 PF: > { %s13_s14 = sadd.s32 1, %s673_s14   ;;  %s772_s12 = smov %s669_s13 }
 0x104   : > { %p10_p5 = scmp.ge.s32.totalorder %s13_s14, 4   ;;  %s773_s13 = smov %s775_s15 }
 0x106   :  { %12 = sbr.rel (!%p10_p5) target bundleno = 2 (0x2), region = 68 }

// kernel: _lambda_.6
= control target key start
LH: loop header
LB: loop body
LE: loop exit
PB: predicated region body
PF: predicated region fallthrough
CT: control target
= control target key end

     0   :  { %s3144_s12 = smov 0   ;;  %s3146_s13 = smov 0   ;;  %s3529_s0 = inlined_call_operand.vmem [shape: bf16[8,9,9,128], index: 0, kind: input, shape index: {}]   ;;  %s3530_s1 = inlined_call_operand.vmem [shape: bf16[9,128,128], index: 1, kind: input, shape index: {}]   ;;  %s3531_s2 = inlined_call_operand.vmem [shape: f32[1,128], index: 2, kind: input, shape index: {}]   ;;  %s3532_s3 = inlined_call_operand.vmem [shape: bf16[2,8,8,128], index: 3, kind: output, shape index: {}]  }
   0x1   :  { %s3148_s14 = smov 0  }
   0x2 LB: > { %s25_s15 = sadd.s32 1, %s3118_s13  ;;  %p2235_p0 = scmp.ge.s32.totalorder %s3122_s14, 1  ;;  %s3122_s14 = sphi %s3148_s14, %s13_s14   ;;  %s3118_s13 = sphi %s3146_s13, %s3536_s13   ;;  %s3114_s12 = sphi %s3144_s12, %s3535_s12  }
   0x3   : > { %p27_p1 = scmp.ge.s32.totalorder %s25_s15, 2  ;;  %p170_p2 = scmp.lt.s32.totalorder %s3122_s14, 3 }
   0x5   : > { %s3538_s15 = smov (%p27_p1, %s25_s15), 0  ;;  %p171_p3 = pnand %p2235_p0, %p170_p2 }
   0x6   : > { %v3004_v0 = vld [vmem:[%s3530_s1 + $0x40] sm:$0xff] (!%p171_p3)   ;;  %s2236_s18 = sshll.u32 (!%p171_p3), %s3114_s12, 2  ;;  %v3006_v2 = vld [vmem:[%s3530_s1 + $0x48] sm:$0xff] (!%p171_p3)   ;;  %v3008_v4 = vld [vmem:[%s3530_s1 + $0x50] sm:$0xff] (!%p171_p3)   ;;  %vm568_vm0 = vsmask.f32 (!%p171_p3), 3328 }
   0x7   : > { %174 = sbr.rel (%p171_p3) target bundleno = 392 (0x188), region = 32  ;;  %v3005_v1 = vld [vmem:[%s3530_s1 + $0x100] sm:$0xff] (!%p171_p3)   ;;  %p206_p4 = scmp.lt.s32.totalorder (!%p171_p3), %s2236_s18, 7  ;;  %2683 = vmatprep.subr.bf16.mxu1 (!%p171_p3), %v3004_v0  ;;  %v3007_v3 = vld [vmem:[%s3530_s1 + $0x108] sm:$0xff] (!%p171_p3)   ;;  %v3009_v5 = vld [vmem:[%s3530_s1 + $0x110] sm:$0xff] (!%p171_p3)  }
   0x8   : > { %2779 = vmatprep.subr.bf16.mxu0 (!%p171_p3), %v3005_v1  ;;  %2684 = vmatpush3.bf16.msra.mxu1 (!%p171_p3), %v3004_v0  ;;  %v3010_v6 = vld [vmem:[%s3530_s1 + $0x58] sm:$0xff] (!%p171_p3)   ;;  %v3012_v8 = vld [vmem:[%s3530_s1 + $0x60] sm:$0xff] (!%p171_p3)   ;;  %v3014_v10 = vld [vmem:[%s3530_s1 + $0x68] sm:$0xff] (!%p171_p3)   ;;  %vm569_vm1 = vsmask.f32 (!%p171_p3), 7440  ;;  %p219_p5 = scmp.lt.s32.totalorder (!%p171_p3), %s3114_s12, 1 }
   0x9   : > { %2780 = vmatpush3.bf16.msra.mxu0 (!%p171_p3), %v3005_v1  ;;  %2685 = vmatprep.subr.bf16.mxu1 (!%p171_p3), %v3006_v2  ;;  %v3011_v7 = vld [vmem:[%s3530_s1 + $0x118] sm:$0xff] (!%p171_p3)   ;;  %v3013_v9 = vld [vmem:[%s3530_s1 + $0x120] sm:$0xff] (!%p171_p3)   ;;  %v3015_v12 = vld [vmem:[%s3530_s1 + $0x128] sm:$0xff] (!%p171_p3)  }
   0xa   : > { %2781 = vmatprep.subr.bf16.mxu0 (!%p171_p3), %v3007_v3  ;;  %v3016_v14 = vld [vmem:[%s3530_s1 + $0x70] sm:$0xff] (!%p171_p3)   ;;  %v3018_v16 = vld [vmem:[%s3530_s1 + $0x78] sm:$0xff] (!%p171_p3)   ;;  %v3021_v18 = vld [vmem:[%s3530_s1] sm:$0xff] (!%p171_p3)  }
   0xb   : > { %v3017_v15 = vld [vmem:[%s3530_s1 + $0x130] sm:$0xff] (!%p171_p3)   ;;  %v3019_v17 = vld [vmem:[%s3530_s1 + $0x138] sm:$0xff] (!%p171_p3)   ;;  %v3023_v19 = vld [vmem:[%s3530_s1 + $0x140] sm:$0xff] (!%p171_p3)  }
   0xc   : > { %2686 = vmatpush3.bf16.msra.mxu1 (!%p171_p3), %v3006_v2  ;;  %v3026_v22 = vld [vmem:[%s3530_s1 + $0x8] sm:$0xff] (!%p171_p3)   ;;  %v3028_v26 = vld [vmem:[%s3530_s1 + $0x10] sm:$0xff] (!%p171_p3)   ;;  %v3030_v28 = vld [vmem:[%s3530_s1 + $0x18] sm:$0xff] (!%p171_p3)  }
   0xd   : > { %2782 = vmatpush3.bf16.msra.mxu0 (!%p171_p3), %v3007_v3  ;;  %2687 = vmatprep.subr.bf16.mxu1 (!%p171_p3), %v3008_v4  ;;  %v3027_v23 = vld [vmem:[%s3530_s1 + $0x148] sm:$0xff] (!%p171_p3)   ;;  %v3029_v27 = vld [vmem:[%s3530_s1 + $0x150] sm:$0xff] (!%p171_p3)   ;;  %v3031_v31 = vld [vmem:[%s3530_s1 + $0x158] sm:$0xff] (!%p171_p3)  }
   0xe   : > { %s3540_s18 = smov (!%p206_p4, %s2236_s18), 7  ;;  %2783 = vmatprep.subr.bf16.mxu0 %v3009_v5  ;;  %v3032_v38 = vld [vmem:[%s3530_s1 + $0x20] sm:$0xff]   ;;  %v3034_v47 = vld [vmem:[%s3530_s1 + $0x28] sm:$0xff]   ;;  %vm3269_vm2 = vmor %vm568_vm0, %vm569_vm1  ;;  %s3542_s12 = smov (!%p219_p5, %s3114_s12), 1 }
   0xf   : > { %s2979_s6 = smul.u32 72, %s3540_s18  ;;  %v3033_v43 = vld [vmem:[%s3530_s1 + $0x160] sm:$0xff]   ;;  %v3035_v50 = vld [vmem:[%s3530_s1 + $0x168] sm:$0xff]   ;;  %v3037_v2 = vld [vmem:[%s3530_s1 + $0x30] sm:$0xff]  }
  0x10   : > { %2688 = vmatpush3.bf16.msra.mxu1 %v3008_v4 }
  0x11   : > { %2784 = vmatpush3.bf16.msra.mxu0 %v3009_v5  ;;  %2689 = vmatprep.subr.bf16.mxu1 %v3010_v6  ;;  %s3198_s17 = scalar_lea.vmem %s3529_s0, %s2979_s6  ;;  %s2551_s6 = sshll.u32 %s3542_s12, 5 }
  0x12   : > { %2785 = vmatprep.subr.bf16.mxu0 %v3011_v7  ;;  %v3020_v11 = vld [vmem:[%s3198_s17 + $0x48] ss:$8 sps:$4 sm:$0xff]   ;;  %v3022_v13 = vld [vmem:[%s3198_s17 + $0xd8] ss:$8 sps:$4 sm:$0xff]   ;;  %v2389_v34 = vld [vmem:[%s3198_s17 + $0x94] sm:$0x1]  ;;  %s226_s9 = scalar_lea.vmem %s3532_s3, %s2551_s6 }
  0x13   : > { %2699 = vmatprep.mubr.bf16.mxu1 %v3020_v11  ;;  %2795 = vmatprep.mubr.bf16.mxu0 %v3022_v13  ;;  %v3024_v20 = vld [vmem:[%s3198_s17 + $0x58] ss:$8 sps:$4 sm:$0xff]   ;;  %v3025_v21 = vld [vmem:[%s3198_s17 + $0xe8] ss:$8 sps:$4 sm:$0xff]   ;;  %v2391_v39 = vld [vmem:[%s3198_s17 + $0x9c] sm:$0x1] }
  0x14   : > { %2690 = vmatpush3.bf16.msra.mxu1 %v3010_v6  ;;  %v3036_v24 = vld [vmem:[%s3198_s17 + $0x68] ss:$8 sps:$4 sm:$0xff]   ;;  %v3038_v25 = vld [vmem:[%s3198_s17 + $0xf8] ss:$8 sps:$4 sm:$0xff]   ;;  %v1205_v40 = vshll.u32 %v2389_v34, 16  ;;  %v1219_v46 = vshll.u32 %v2391_v39, 16 }
  0x15   : > { %2786 = vmatpush3.bf16.msra.mxu0 %v3011_v7  ;;  %2691 = vmatprep.subr.bf16.mxu1 %v3012_v8  ;;  %v3040_v29 = vld [vmem:[%s3198_s17 + $0x78] ss:$8 sps:$4 sm:$0xff]   ;;  %v3041_v30 = vld [vmem:[%s3198_s17 + $0x108] ss:$8 sps:$4 sm:$0xff]   ;;  %v2393_v57 = vld [vmem:[%s3198_s17 + $0xa4] sm:$0x1] }
  0x16   : > { %2787 = vmatprep.subr.bf16.mxu0 %v3013_v9  ;;  %v3044_v32 = vld [vmem:[%s3198_s17] ss:$8 sps:$4 sm:$0xff]   ;;  %v2388_v33 = vld [vmem:[%s3198_s17 + $0x90] sm:$0xf]  ;;  %v2390_v35 = vld [vmem:[%s3198_s17 + $0x98] sm:$0xf] }
  0x17   : > { %v1196_v36 = vshrl.u32 %v2388_v33, 16  ;;  %v1199_v37 = vshll.u32 %v2388_v33, 16  ;;  %v1210_v41 = vshrl.u32 %v2390_v35, 16  ;;  %v1213_v42 = vshll.u32 %v2390_v35, 16  ;;  %v2392_v56 = vld [vmem:[%s3198_s17 + $0xa0] sm:$0xf] }
  0x18   : > { %2692 = vmatpush3.bf16.msra.mxu1 %v3012_v8  ;;  %v1207_v52 = vrot.slane %v1205_v40, 5  ;;  %v1221_v55 = vrot.slane %v1219_v46, 5  ;;  %v2394_v59 = vld [vmem:[%s3198_s17 + $0xa8] sm:$0xf]  ;;  %v2395_v60 = vld [vmem:[%s3198_s17 + $0xac] sm:$0x1] }
  0x19   : > { %2788 = vmatpush3.bf16.msra.mxu0 %v3013_v9  ;;  %2693 = vmatprep.subr.bf16.mxu1 %v3014_v10  ;;  %v1198_v44 = vrot.slane %v1196_v36, 4  ;;  %v1201_v45 = vrot.slane %v1199_v37, 5  ;;  %v1212_v48 = vrot.slane %v1210_v41, 4  ;;  %v1215_v49 = vrot.slane %v1213_v42, 5  ;;  %v3039_v6 = vld [vmem:[%s3530_s1 + $0x170] sm:$0xff]  }
  0x1a   : > { %2789 = vmatprep.subr.bf16.mxu0 %v3015_v12  ;;  %v1224_v61 = vshrl.u32 %v2392_v56, 16  ;;  %v1227_v63 = vshll.u32 %v2392_v56, 16  ;;  %v1233_v0 = vshll.u32 %v2393_v57, 16  ;;  %v1238_v1 = vshrl.u32 %v2394_v59, 16  ;;  %v3058_v37 = vld [vmem:[%s3198_s17 + $0x20] ss:$8 sps:$4 sm:$0xff]  }
  0x1b   : > { %v1202_v51 = vor.u32 %v1201_v45, %v1198_v44  ;;  %v1216_v54 = vor.u32 %v1215_v49, %v1212_v48  ;;  %v1241_v5 = vshll.u32 %v2394_v59, 16  ;;  %v3061_v48 = vld [vmem:[%s3198_s17 + $0x30] ss:$8 sps:$4 sm:$0xff]   ;;  %v2400_v49 = vld [vmem:[%s3198_s17 + $0xc0] sm:$0xf] }
  0x1c   : > { %2694 = vmatpush3.bf16.msra.mxu1 %v3014_v10  ;;  %v1226_v4 = vrot.slane %v1224_v61, 4  ;;  %v1229_v8 = vrot.slane %v1227_v63, 5  ;;  %v1240_v9 = vrot.slane %v1238_v1, 4  ;;  %v1247_v10 = vshll.u32 %v2395_v60, 16  ;;  %v3052_v59 = vld [vmem:[%s3530_s1 + $0x98] sm:$0xff]  }
  0x1d   : > { %2790 = vmatpush3.bf16.msra.mxu0 %v3015_v12  ;;  %2695 = vmatprep.subr.bf16.mxu1 %v3016_v14  ;;  %v1203_v58 = vrot.slane %v1202_v51, 4  ;;  %v1217_v62 = vrot.slane %v1216_v54, 4  ;;  %v1235_v12 = vrot.slane %v1233_v0, 5  ;;  %v1243_v13 = vrot.slane %v1241_v5, 5  ;;  %v2402_v51 = vld [vmem:[%s3198_s17 + $0xc8] sm:$0xf] }
  0x1e   : > { %2791 = vmatprep.subr.bf16.mxu0 %v3017_v15  ;;  %v1280_v56 = vshrl.u32 %v2400_v49, 16  ;;  %v1283_v57 = vshll.u32 %v2400_v49, 16  ;;  %v1294_v61 = vshrl.u32 %v2402_v51, 16 }
  0x1f   : > { %v1208_v3 = vsel %vm3269_vm2, %v1203_v58, %v1207_v52  ;;  %v1222_v7 = vsel %vm3269_vm2, %v1217_v62, %v1221_v55  ;;  %v3051_v52 = vld [vmem:[%s3530_s1 + $0x190] sm:$0xff]   ;;  %v2403_v55 = vld [vmem:[%s3198_s17 + $0xcc] sm:$0x1]  ;;  %v1297_v62 = vshll.u32 %v2402_v51, 16 }
  0x20   : > { %2696 = vmatpush3.bf16.msra.mxu1 %v3016_v14  ;;  %v2420_v11 = vcombine.low %v1208_v3, %v1222_v7  ;;  %v3042_v14 = vld [vmem:[%s3530_s1 + $0x38] sm:$0xff]   ;;  %v1303_v63 = vshll.u32 %v2403_v55, 16  ;;  %v1282_v1 = vrot.slane %v1280_v56, 4 }
  0x21   : > { %2792 = vmatpush3.bf16.msra.mxu0 %v3017_v15  ;;  %2697 = vmatprep.subr.bf16.mxu1 %v3018_v16  ;;  %v1230_v15 = vor.u32 %v1229_v8, %v1226_v4  ;;  %v3053_v4 = vld [vmem:[%s3530_s1 + $0x198] sm:$0xff]   ;;  %v1299_v7 = vrot.slane %v1297_v62, 5 }
  0x22   : > { %2793 = vmatprep.subr.bf16.mxu0 %v3019_v17  ;;  %v1305_v8 = vrot.slane %v1303_v63, 5 }
  0x24   : > { %2698 = vmatpush3.bf16.msra.mxu1 %v3018_v16  ;;  %v1244_v16 = vor.u32 %v1243_v13, %v1240_v9  ;;  %v3054_v13 = vld [vmem:[%s3530_s1 + $0xa0] sm:$0xff]  }
  0x25   : > { %2794 = vmatpush3.bf16.msra.mxu0 %v3019_v17  ;;  %2707 = vmatprep.subr.bf16.mxu1 %v3021_v18  ;;  %v1231_v17 = vrot.slane %v1230_v15, 4 }
  0x26   : > { %2803 = vmatprep.subr.bf16.mxu0 %v3023_v19 }
  0x27   : > { %2700 = vmatmul.mubr.bf16.vlgmr.msra.gmra.mrb[0].mxu1 %v3024_v20  ;;  %v1245_v20 = vrot.slane %v1244_v16, 4  ;;  %v554_v16 = vld [vmem:[%s3198_s17 + $0x8] sm:$0xf] }
  0x28   : > { %2708 = vmatpush3.bf16.msra.mxu1 %v3021_v18  ;;  %2796 = vmatmul.mubr.bf16.vlgmr.msra.gmra.mrb[0].mxu0 %v3025_v21  ;;  %v1249_v18 = vrot.slane %v1247_v10, 5  ;;  %v3045_v21 = vld [vmem:[%s3530_s1 + $0x80] sm:$0xff]  }
  0x29   : > { %2804 = vmatpush3.bf16.msra.mxu0 %v3023_v19  ;;  %2709 = vmatprep.subr.bf16.mxu1 %v3026_v22  ;;  %v3043_v19 = vld [vmem:[%s3530_s1 + $0x178] sm:$0xff]  }
  0x2a   : > { %2805 = vmatprep.subr.bf16.mxu0 %v3027_v23  ;;  %2703 = vmatprep.mubr.bf16.mxu1 %v3036_v24  ;;  %v3046_v24 = vld [vmem:[%s3530_s1 + $0x180] sm:$0xff]  }
  0x2b   : > { %2799 = vmatprep.mubr.bf16.mxu0 %v3038_v25  ;;  %v3047_v25 = vld [vmem:[%s3198_s17 + $0x10] ss:$8 sps:$4 sm:$0xff]  }
  0x2c   : > { %2710 = vmatpush3.bf16.msra.mxu1 %v3026_v22  ;;  %v1236_v22 = vsel %vm3269_vm2, %v1231_v17, %v1235_v12  ;;  %v553_v12 = vld [vmem:[%s3198_s17 + $0x4] sm:$0x1]  ;;  %v555_v17 = vld [vmem:[%s3198_s17 + $0xc] sm:$0x1] }
  0x2d   : > { %2806 = vmatpush3.bf16.msra.mxu0 %v3027_v23  ;;  %2711 = vmatprep.subr.bf16.mxu1 %v3028_v26  ;;  %v1250_v23 = vsel %vm3269_vm2, %v1245_v20, %v1249_v18 }
  0x2e   : > { %2807 = vmatprep.subr.bf16.mxu0 %v3029_v27 }
  0x2f   : > { %2704 = vmatmul.mubr.bf16.gmra.mrb[4].mxu1 %v3040_v29  ;;  %v3049_v29 = vld [vmem:[%s3530_s1 + $0x188] sm:$0xff]  }
  0x30   : > { %2712 = vmatpush3.bf16.msra.mxu1 %v3028_v26  ;;  %2800 = vmatmul.mubr.bf16.gmra.mrb[4].mxu0 %v3041_v30  ;;  %v3048_v26 = vld [vmem:[%s3530_s1 + $0x88] sm:$0xff]   ;;  %v2397_v30 = vld [vmem:[%s3198_s17 + $0xb4] sm:$0x1] }
  0x31   : > { %2808 = vmatpush3.bf16.msra.mxu0 %v3029_v27  ;;  %2713 = vmatprep.subr.bf16.mxu1 %v3030_v28  ;;  %v2396_v27 = vld [vmem:[%s3198_s17 + $0xb0] sm:$0xf]  ;;  %v1261_v35 = vshll.u32 %v2397_v30, 16 }
  0x32   : > { %2809 = vmatprep.subr.bf16.mxu0 %v3031_v31  ;;  %2723 = vmatprep.mubr.bf16.mxu1 %v3044_v32  ;;  %v2399_v32 = vld [vmem:[%s3198_s17 + $0xbc] sm:$0x1]  ;;  %v1252_v33 = vshrl.u32 %v2396_v27, 16  ;;  %v1255_v34 = vshll.u32 %v2396_v27, 16  ;;  %v595_v27 = vshll.u32 %v555_v17, 16 }
  0x33   : > { %2819 = vmatprep.mubr.bf16.mxu0 %v2420_v11  ;;  %v1275_v39 = vshll.u32 %v2399_v32, 16  ;;  %v1263_v44 = vrot.slane %v1261_v35, 5  ;;  %v552_v11 = vld [vmem:[%s3198_s17] sm:$0xf]  ;;  %v3056_v32 = vld [vmem:[%s3530_s1 + $0xa8] sm:$0xff]  }
  0x34   : > { %2714 = vmatpush3.bf16.msra.mxu1 %v3030_v28  ;;  %v2421_v28 = vcombine.low %v1236_v22, %v1250_v23  ;;  %v1254_v40 = vrot.slane %v1252_v33, 4  ;;  %v1257_v41 = vrot.slane %v1255_v34, 5  ;;  %v572_v18 = vshrl.u32 %v552_v11, 16  ;;  %v563_v17 = vld [vmem:[%s3198_s17 + $0x2c] sm:$0x1] }
  0x35   : > { %2810 = vmatpush3.bf16.msra.mxu0 %v3031_v31  ;;  %2715 = vmatprep.subr.bf16.mxu1 %v3032_v38  ;;  %v2398_v31 = vld [vmem:[%s3198_s17 + $0xb8] sm:$0xf]  ;;  %v1277_v46 = vrot.slane %v1275_v39, 5  ;;  %v586_v22 = vshrl.u32 %v554_v16, 16  ;;  %v589_v23 = vshll.u32 %v554_v16, 16 }
  0x36   : > { %2811 = vmatprep.subr.bf16.mxu0 %v3033_v43  ;;  %v1266_v36 = vshrl.u32 %v2398_v31, 16  ;;  %v562_v16 = vld [vmem:[%s3198_s17 + $0x28] sm:$0xf] }
  0x37   : > { %v588_v30 = vrot.slane %v586_v22, 4  ;;  %v642_v22 = vshrl.u32 %v562_v16, 16 }
  0x38   : > { %2716 = vmatpush3.bf16.msra.mxu1 %v3032_v38  ;;  %v1269_v38 = vshll.u32 %v2398_v31, 16  ;;  %v1268_v42 = vrot.slane %v1266_v36, 4  ;;  %v591_v31 = vrot.slane %v589_v23, 5  ;;  %v597_v36 = vrot.slane %v595_v27, 5 }
  0x39   : > { %2812 = vmatpush3.bf16.msra.mxu0 %v3033_v43  ;;  %2717 = vmatprep.subr.bf16.mxu1 %v3034_v47  ;;  %v3050_v43 = vld [vmem:[%s3530_s1 + $0x90] sm:$0xff]   ;;  %v645_v23 = vshll.u32 %v562_v16, 16  ;;  %v2505_v16 = vld [vmem:[%s3198_s17 + $0xc] sm:$0x1] }
  0x3a   : > { %2813 = vmatprep.subr.bf16.mxu0 %v3035_v50  ;;  %v1271_v45 = vrot.slane %v1269_v38, 5  ;;  %v3057_v38 = vld [vmem:[%s3530_s1 + $0x1a8] sm:$0xff]  }
  0x3c   : > { %2718 = vmatpush3.bf16.msra.mxu1 %v3034_v47  ;;  %v1258_v47 = vor.u32 %v1257_v41, %v1254_v40  ;;  %v1272_v54 = vor.u32 %v1271_v45, %v1268_v42  ;;  %v592_v40 = vor.u32 %v591_v31, %v588_v30  ;;  %v556_v41 = vld [vmem:[%s3198_s17 + $0x10] sm:$0xf]  ;;  %v647_v31 = vrot.slane %v645_v23, 5 }
  0x3d   : > { %2814 = vmatpush3.bf16.msra.mxu0 %v3035_v50  ;;  %2719 = vmatprep.subr.bf16.mxu1 %v3037_v2  ;;  %v2401_v50 = vld [vmem:[%s3198_s17 + $0xc4] sm:$0x1]  ;;  %v600_v45 = vshrl.u32 %v556_v41, 16  ;;  %v564_v30 = vld [vmem:[%s3198_s17 + $0x30] sm:$0xf] }
  0x3e   : > { %2815 = vmatprep.subr.bf16.mxu0 %v3039_v6  ;;  %v1289_v58 = vshll.u32 %v2401_v50, 16  ;;  %v1259_v60 = vrot.slane %v1258_v47, 4  ;;  %v1273_v0 = vrot.slane %v1272_v54, 4  ;;  %v559_v47 = vld [vmem:[%s3198_s17 + $0x1c] sm:$0x1] }
  0x40   : > { %2720 = vmatpush3.bf16.msra.mxu1 %v3037_v2  ;;  %v1285_v2 = vrot.slane %v1283_v57, 5  ;;  %v1291_v3 = vrot.slane %v1289_v58, 5  ;;  %v1264_v5 = vsel %vm3269_vm2, %v1259_v60, %v1263_v44  ;;  %v1278_v9 = vsel %vm3269_vm2, %v1273_v0, %v1277_v46  ;;  %v558_v44 = vld [vmem:[%s3198_s17 + $0x18] sm:$0xf]  ;;  %v3060_v60 = vld [vmem:[%s3530_s1 + $0x1b0] sm:$0xff]  }
  0x41   : > { %2816 = vmatpush3.bf16.msra.mxu0 %v3039_v6  ;;  %2721 = vmatprep.subr.bf16.mxu1 %v3042_v14  ;;  %v1296_v6 = vrot.slane %v1294_v61, 4  ;;  %v593_v46 = vrot.slane %v592_v40, 4  ;;  %v614_v50 = vshrl.u32 %v558_v44, 16  ;;  %v617_v54 = vshll.u32 %v558_v44, 16 }
  0x42   : > { %2817 = vmatprep.subr.bf16.mxu0 %v3043_v19  ;;  %v1286_v10 = vor.u32 %v1285_v2, %v1282_v1  ;;  %v623_v58 = vshll.u32 %v559_v47, 16 }
  0x43   : > { %v1300_v15 = vor.u32 %v1299_v7, %v1296_v6  ;;  %v598_v55 = vsel %vm3269_vm2, %v593_v46, %v597_v36  ;;  %v616_v57 = vrot.slane %v614_v50, 4  ;;  %v619_v63 = vrot.slane %v617_v54, 5  ;;  %v3063_v6 = vld [vmem:[%s3530_s1 + $0x1b8] sm:$0xff]   ;;  %v3064_v7 = vld [vmem:[%s3530_s1 + $0xc0] sm:$0xff]  }
  0x44   : > { %2722 = vmatpush3.bf16.msra.mxu1 %v3042_v14  ;;  %v2422_v14 = vcombine.low %v1264_v5, %v1278_v9  ;;  %v1287_v20 = vrot.slane %v1286_v10, 4  ;;  %v3066_v10 = vld [vmem:[%s3530_s1 + $0x1c0] sm:$0xff]   ;;  %v3072_v50 = vld [vmem:[%s3530_s1 + $0xd8] sm:$0xff]  }
  0x45   : > { %2818 = vmatpush3.bf16.msra.mxu0 %v3043_v19  ;;  %2731 = vmatprep.subr.bf16.mxu1 %v3045_v21  ;;  %v575_v19 = vshll.u32 %v552_v11, 16  ;;  %v620_v1 = vor.u32 %v619_v63, %v616_v57  ;;  %v3067_v11 = vld [vmem:[%s3198_s17 + $0x18] ss:$8 sps:$4 sm:$0xff]  }
  0x46   : > { %2827 = vmatprep.subr.bf16.mxu0 %v3046_v24 }
  0x47   : > { %2724 = vmatmul.mubr.bf16.vlgmr.msra.gmra.mrb[0].mxu1 %v3047_v25  ;;  %v574_v25 = vrot.slane %v572_v18, 4  ;;  %v621_v5 = vrot.slane %v620_v1, 4  ;;  %v3069_v18 = vld [vmem:[%s3530_s1 + $0x1c8] sm:$0xff]   ;;  %v3074_v1 = vld [vmem:[%s3530_s1 + $0xe0] sm:$0xff]  }
  0x48   : > { %2732 = vmatpush3.bf16.msra.mxu1 %v3045_v21  ;;  %2820 = vmatmul.mubr.bf16.vlgmr.msra.gmra.mrb[0].mxu0 %v2421_v28  ;;  %v581_v21 = vshll.u32 %v553_v12, 16  ;;  %v3055_v28 = vld [vmem:[%s3530_s1 + $0x1a0] sm:$0xff]  }
  0x49   : > { %2828 = vmatpush3.bf16.msra.mxu0 %v3046_v24  ;;  %2733 = vmatprep.subr.bf16.mxu1 %v3048_v26  ;;  %v1301_v24 = vrot.slane %v1300_v15, 4  ;;  %v560_v12 = vld [vmem:[%s3198_s17 + $0x20] sm:$0xf]  ;;  %v561_v15 = vld [vmem:[%s3198_s17 + $0x24] sm:$0x1] }
  0x4a   : > { %2829 = vmatprep.subr.bf16.mxu0 %v3049_v29  ;;  %2727 = vmatprep.mubr.bf16.mxu1 %v3058_v37  ;;  %v583_v35 = vrot.slane %v581_v21, 5  ;;  %v3065_v37 = vld [vmem:[%s3198_s17 + $0x8] ss:$8 sps:$4 sm:$0xff]   ;;  %v637_v21 = vshll.u32 %v561_v15, 16 }
  0x4b   : > { %2823 = vmatprep.mubr.bf16.mxu0 %v2422_v14  ;;  %v1306_v33 = vsel %vm3269_vm2, %v1301_v24, %v1305_v8  ;;  %v3068_v14 = vld [vmem:[%s3530_s1 + $0xc8] sm:$0xff]   ;;  %v651_v24 = vshll.u32 %v563_v17, 16  ;;  %v2506_v17 = vld [vmem:[%s3198_s17 + $0x10] sm:$0xf] }
  0x4c   : > { %2734 = vmatpush3.bf16.msra.mxu1 %v3048_v26  ;;  %v577_v26 = vrot.slane %v575_v19, 5  ;;  %v628_v19 = vshrl.u32 %v560_v12, 16  ;;  %v2504_v15 = vld [vmem:[%s3198_s17 + $0x8] sm:$0xf]  ;;  %v1837_v23 = vshll.u32 %v2506_v17, 16 }
  0x4d   : > { %2830 = vmatpush3.bf16.msra.mxu0 %v3049_v29  ;;  %2735 = vmatprep.subr.bf16.mxu1 %v3050_v43  ;;  %v1292_v29 = vsel %vm3269_vm2, %v1287_v20, %v1291_v3  ;;  %v625_v3 = vrot.slane %v623_v58, 5  ;;  %v631_v20 = vshll.u32 %v560_v12, 16  ;;  %v3080_v58 = vld [vmem:[%s3198_s17 + $0x38] ss:$8 sps:$4 sm:$0xff]  }
  0x4e   : > { %2831 = vmatprep.subr.bf16.mxu0 %v3051_v52  ;;  %v578_v34 = vor.u32 %v577_v26, %v574_v25  ;;  %v2423_v39 = vcombine.low %v1292_v29, %v1306_v33  ;;  %v3078_v25 = vld [vmem:[%s3198_s17 + $0x28] ss:$8 sps:$4 sm:$0xff]   ;;  %v630_v26 = vrot.slane %v628_v19, 4  ;;  %v644_v29 = vrot.slane %v642_v22, 4  ;;  %v565_v33 = vld [vmem:[%s3198_s17 + $0x34] sm:$0x1] }
  0x4f   : > { %2728 = vmatmul.mubr.bf16.gmra.mrb[4].mxu1 %v3061_v48  ;;  %v603_v48 = vshll.u32 %v556_v41, 16  ;;  %v626_v9 = vsel %vm3269_vm2, %v621_v5, %v625_v3  ;;  %v633_v27 = vrot.slane %v631_v20, 5  ;;  %v665_v40 = vshll.u32 %v565_v33, 16  ;;  %v3071_v41 = vld [vmem:[%s3530_s1 + $0x1d0] sm:$0xff]   ;;  %v3075_v5 = vld [vmem:[%s3530_s1 + $0x1e0] sm:$0xff]   ;;  %v3082_v12 = vld [vmem:[%s3530_s1 + $0xf8] sm:$0xff]  }
  0x50   : > { %2736 = vmatpush3.bf16.msra.mxu1 %v3050_v43  ;;  %v579_v42 = vrot.slane %v578_v34, 4  ;;  %v557_v43 = vld [vmem:[%s3198_s17 + $0x14] sm:$0x1]  ;;  %2824 = vmatmul.mubr.bf16.gmra.mrb[4].mxu0 %v2423_v39  ;;  %v566_v34 = vld [vmem:[%s3198_s17 + $0x38] sm:$0xf]  ;;  %v659_v39 = vshll.u32 %v564_v30, 16 }
  0x51   : > { %2832 = vmatpush3.bf16.msra.mxu0 %v3051_v52  ;;  %2737 = vmatprep.subr.bf16.mxu1 %v3052_v59  ;;  %v609_v49 = vshll.u32 %v557_v43, 16  ;;  %v602_v52 = vrot.slane %v600_v45, 4  ;;  %v605_v56 = vrot.slane %v603_v48, 5  ;;  %v634_v36 = vor.u32 %v633_v27, %v630_v26  ;;  %v2515_v33 = vld [vmem:[%s3198_s17 + $0x34] sm:$0x1] }
  0x52   : > { %2833 = vmatprep.subr.bf16.mxu0 %v3053_v4  ;;  %v584_v51 = vsel %vm3269_vm2, %v579_v42, %v583_v35  ;;  %2843 = vmatprep.mubr.bf16.mxu0 %v3065_v37  ;;  %v3070_v35 = vld [vmem:[%s3530_s1 + $0xd0] sm:$0xff]   ;;  %v567_v37 = vld [vmem:[%s3198_s17 + $0x3c] sm:$0x1]  ;;  %v648_v42 = vor.u32 %v647_v31, %v644_v29  ;;  %v670_v43 = vshrl.u32 %v566_v34, 16  ;;  %v673_v44 = vshll.u32 %v566_v34, 16 }
  0x53   : > { %v2304_v61 = vcombine.low %v584_v51, %v598_v55  ;;  %v611_v62 = vrot.slane %v609_v49, 5  ;;  %v606_v0 = vor.u32 %v605_v56, %v602_v52  ;;  %v679_v45 = vshll.u32 %v567_v37, 16  ;;  %v2514_v29 = vld [vmem:[%s3198_s17 + $0x30] sm:$0xf]  ;;  %v3087_v34 = vld [vmem:[%s3198_s17 + $0x60] ss:$8 sps:$4 sm:$0xff]  }
  0x54   : > { %2738 = vmatpush3.bf16.msra.mxu1 %v3052_v59  ;;  %v3059_v59 = vld [vmem:[%s3530_s1 + $0xb0] sm:$0xff]   ;;  %v635_v46 = vrot.slane %v634_v36, 4  ;;  %v661_v48 = vrot.slane %v659_v39, 5  ;;  %v667_v49 = vrot.slane %v665_v40, 5  ;;  %v649_v51 = vrot.slane %v648_v42, 4  ;;  %v3089_v39 = vld [vmem:[%s3530_s1 + $0x208] sm:$0xff]  }
  0x55   : > { %2834 = vmatpush3.bf16.msra.mxu0 %v3053_v4  ;;  %2739 = vmatprep.subr.bf16.mxu1 %v3054_v13  ;;  %v607_v2 = vrot.slane %v606_v0, 4  ;;  %v3062_v4 = vld [vmem:[%s3530_s1 + $0xb8] sm:$0xff]   ;;  %v672_v52 = vrot.slane %v670_v43, 4  ;;  %v675_v54 = vrot.slane %v673_v44, 5  ;;  %v681_v55 = vrot.slane %v679_v45, 5 }
  0x56   : > { %2835 = vmatprep.subr.bf16.mxu0 %v3055_v28  ;;  %2747 = vmatprep.mubr.bf16.mxu1 %v2304_v61  ;;  %v3073_v61 = vld [vmem:[%s3530_s1 + $0x1d8] sm:$0xff]   ;;  %v1820_v19 = vshrl.u32 %v2504_v15, 16  ;;  %v1823_v20 = vshll.u32 %v2504_v15, 16  ;;  %v1834_v22 = vshrl.u32 %v2506_v17, 16  ;;  %v1893_v42 = vshll.u32 %v2514_v29, 16  ;;  %v3096_v15 = vld [vmem:[%s3530_s1 + $0x220] sm:$0xff]  }
  0x57   : > { %v612_v8 = vsel %vm3269_vm2, %v607_v2, %v611_v62  ;;  %v1899_v43 = vshll.u32 %v2515_v33, 16  ;;  %v3090_v44 = vld [vmem:[%s3198_s17 + $0xb0] ss:$8 sps:$4 sm:$0xff]  }
  0x58   : > { %2740 = vmatpush3.bf16.msra.mxu1 %v3054_v13  ;;  %v2305_v13 = vcombine.low %v612_v8, %v626_v9  ;;  %v3076_v8 = vld [vmem:[%s3530_s1 + $0xe8] sm:$0xff]   ;;  %v1822_v26 = vrot.slane %v1820_v19, 4  ;;  %v1825_v27 = vrot.slane %v1823_v20, 5  ;;  %v1836_v31 = vrot.slane %v1834_v22, 4 }
  0x59   : > { %2836 = vmatpush3.bf16.msra.mxu0 %v3055_v28  ;;  %2741 = vmatprep.subr.bf16.mxu1 %v3056_v32  ;;  %v639_v28 = vrot.slane %v637_v21, 5  ;;  %v3077_v9 = vld [vmem:[%s3530_s1 + $0x1e8] sm:$0xff]   ;;  %v1829_v21 = vshll.u32 %v2505_v16, 16 }
  0x5a   : > { %2837 = vmatprep.subr.bf16.mxu0 %v3057_v38  ;;  %v3097_v20 = vld [vmem:[%s3530_s1 + $0x228] sm:$0xff]  }
  0x5b   : > { %v640_v56 = vsel %vm3269_vm2, %v635_v46, %v639_v28  ;;  %v2513_v28 = vld [vmem:[%s3198_s17 + $0x2c] sm:$0x1]  ;;  %v1831_v45 = vrot.slane %v1829_v21, 5  ;;  %v2517_v21 = vld [vmem:[%s3198_s17 + $0x3c] sm:$0x1] }
  0x5c   : > { %2742 = vmatpush3.bf16.msra.mxu1 %v3056_v32  ;;  %v653_v32 = vrot.slane %v651_v24, 5 }
  0x5d   : > { %2838 = vmatpush3.bf16.msra.mxu0 %v3057_v38  ;;  %2743 = vmatprep.subr.bf16.mxu1 %v3059_v59  ;;  %v656_v38 = vshrl.u32 %v564_v30, 16  ;;  %v3086_v30 = vld [vmem:[%s3198_s17 + $0xa0] ss:$8 sps:$4 sm:$0xff]  }
  0x5e   : > { %2839 = vmatprep.subr.bf16.mxu0 %v3060_v60 }
  0x5f   : > { %v658_v47 = vrot.slane %v656_v38, 4  ;;  %v1885_v38 = vshll.u32 %v2513_v28, 16 }
  0x60   : > { %2744 = vmatpush3.bf16.msra.mxu1 %v3059_v59  ;;  %v654_v59 = vsel %vm3269_vm2, %v649_v51, %v653_v32  ;;  %v1839_v32 = vrot.slane %v1837_v23, 5 }
  0x61   : > { %2840 = vmatpush3.bf16.msra.mxu0 %v3060_v60  ;;  %2745 = vmatprep.subr.bf16.mxu1 %v3062_v4  ;;  %v662_v57 = vor.u32 %v661_v48, %v658_v47  ;;  %v676_v60 = vor.u32 %v675_v54, %v672_v52  ;;  %v2306_v62 = vcombine.low %v640_v56, %v654_v59  ;;  %v1895_v54 = vrot.slane %v1893_v42, 5 }
  0x62   : > { %2841 = vmatprep.subr.bf16.mxu0 %v3063_v6  ;;  %v1840_v40 = vor.u32 %v1839_v32, %v1836_v31  ;;  %v1887_v56 = vrot.slane %v1885_v38, 5  ;;  %v1901_v59 = vrot.slane %v1899_v43, 5  ;;  %v2509_v31 = vld [vmem:[%s3198_s17 + $0x1c] sm:$0x1]  ;;  %v2511_v32 = vld [vmem:[%s3198_s17 + $0x24] sm:$0x1] }
  0x63   : > { %v663_v63 = vrot.slane %v662_v57, 4  ;;  %v677_v0 = vrot.slane %v676_v60, 4  ;;  %v3094_v57 = vld [vmem:[%s3530_s1 + $0x210] sm:$0xff]  }
  0x64   : > { %2746 = vmatpush3.bf16.msra.mxu1 %v3062_v4  ;;  %v3085_v4 = vld [vmem:[%s3198_s17 + $0x50] ss:$8 sps:$4 sm:$0xff]   ;;  %v1841_v51 = vrot.slane %v1840_v40, 4 }
  0x65   : > { %2842 = vmatpush3.bf16.msra.mxu0 %v3063_v6  ;;  %2755 = vmatprep.subr.bf16.mxu1 %v3064_v7  ;;  %v668_v2 = vsel %vm3269_vm2, %v663_v63, %v667_v49  ;;  %v682_v3 = vsel %vm3269_vm2, %v677_v0, %v681_v55  ;;  %v3091_v49 = vld [vmem:[%s3198_s17 + $0x70] ss:$8 sps:$4 sm:$0xff]  }
  0x66   : > { %2851 = vmatprep.subr.bf16.mxu0 %v3066_v10  ;;  %v2307_v6 = vcombine.low %v668_v2, %v682_v3  ;;  %v3095_v3 = vld [vmem:[%s3530_s1 + $0x218] sm:$0xff]  }
  0x67   : > { %2748 = vmatmul.mubr.bf16.vlgmr.msra.gmra.mrb[0].mxu1 %v2305_v13  ;;  %v3083_v13 = vld [vmem:[%s3530_s1 + $0x1f8] sm:$0xff]  }
  0x68   : > { %2756 = vmatpush3.bf16.msra.mxu1 %v3064_v7  ;;  %2844 = vmatmul.mubr.bf16.vlgmr.msra.gmra.mrb[0].mxu0 %v3067_v11  ;;  %v3084_v7 = vld [vmem:[%s3198_s17 + $0x90] ss:$8 sps:$4 sm:$0xff]  }
  0x69   : > { %2852 = vmatpush3.bf16.msra.mxu0 %v3066_v10  ;;  %2757 = vmatprep.subr.bf16.mxu1 %v3068_v14  ;;  %v3079_v10 = vld [vmem:[%s3530_s1 + $0xf0] sm:$0xff]  }
  0x6a   : > { %2853 = vmatprep.subr.bf16.mxu0 %v3069_v18  ;;  %2847 = vmatprep.mubr.bf16.mxu0 %v3078_v25  ;;  %v3081_v11 = vld [vmem:[%s3530_s1 + $0x1f0] sm:$0xff]   ;;  %v2512_v25 = vld [vmem:[%s3198_s17 + $0x28] sm:$0xf] }
  0x6b   : > { %2751 = vmatprep.mubr.bf16.mxu1 %v2306_v62  ;;  %v1876_v36 = vshrl.u32 %v2512_v25, 16  ;;  %v1879_v37 = vshll.u32 %v2512_v25, 16 }
  0x6c   : > { %2758 = vmatpush3.bf16.msra.mxu1 %v3068_v14  ;;  %v3088_v14 = vld [vmem:[%s3530_s1 + $0x200] sm:$0xff]  }
  0x6d   : > { %2854 = vmatpush3.bf16.msra.mxu0 %v3069_v18  ;;  %2759 = vmatprep.subr.bf16.mxu1 %v3070_v35  ;;  %v2507_v18 = vld [vmem:[%s3198_s17 + $0x14] sm:$0x1]  ;;  %v1878_v47 = vrot.slane %v1876_v36, 4  ;;  %v1881_v48 = vrot.slane %v1879_v37, 5 }
  0x6e   : > { %2855 = vmatprep.subr.bf16.mxu0 %v3071_v41  ;;  %v1843_v24 = vshll.u32 %v2507_v18, 16  ;;  %v3098_v37 = vld [vmem:[%s3530_s1 + $0x230] sm:$0xff]  }
  0x6f   : > { %2752 = vmatmul.mubr.bf16.gmra.mrb[4].mxu1 %v2307_v6  ;;  %v1882_v55 = vor.u32 %v1881_v48, %v1878_v47  ;;  %v2518_v6 = vld [vmem:[%s3198_s17 + $0x40] sm:$0xf] }
  0x70   : > { %2760 = vmatpush3.bf16.msra.mxu1 %v3070_v35  ;;  %2848 = vmatmul.mubr.bf16.gmra.mrb[4].mxu0 %v3080_v58  ;;  %v1826_v35 = vor.u32 %v1825_v27, %v1822_v26  ;;  %v1845_v46 = vrot.slane %v1843_v24, 5 }
  0x71   : > { %2856 = vmatpush3.bf16.msra.mxu0 %v3071_v41  ;;  %2761 = vmatprep.subr.bf16.mxu1 %v3072_v50  ;;  %v1890_v41 = vshrl.u32 %v2514_v29, 16  ;;  %v1883_v60 = vrot.slane %v1882_v55, 4 }
  0x72   : > { %2857 = vmatprep.subr.bf16.mxu0 %v3073_v61  ;;  %2867 = vmatprep.mubr.bf16.mxu0 %v3085_v4  ;;  %v1846_v63 = vsel %vm3269_vm2, %v1841_v51, %v1845_v46  ;;  %v3099_v46 = vld [vmem:[%s3530_s1 + $0x238] sm:$0xff]  }
  0x73   : > { %2771 = vmatprep.mubr.bf16.mxu1 %v3084_v7  ;;  %v1892_v52 = vrot.slane %v1890_v41, 4  ;;  %v1888_v2 = vsel %vm3269_vm2, %v1883_v60, %v1887_v56  ;;  %v1871_v41 = vshll.u32 %v2511_v32, 16 }
  0x74   : > { %2762 = vmatpush3.bf16.msra.mxu1 %v3072_v50  ;;  %v1827_v50 = vrot.slane %v1826_v35, 4 }
  0x75   : > { %2858 = vmatpush3.bf16.msra.mxu0 %v3073_v61  ;;  %2763 = vmatprep.subr.bf16.mxu1 %v3074_v1  ;;  %v1896_v58 = vor.u32 %v1895_v54, %v1892_v52  ;;  %v3092_v61 = vld [vmem:[%s3198_s17 + $0xc0] ss:$8 sps:$4 sm:$0xff]  }
  0x76   : > { %2859 = vmatprep.subr.bf16.mxu0 %v3075_v5  ;;  %v1832_v62 = vsel %vm3269_vm2, %v1827_v50, %v1831_v45  ;;  %v1873_v50 = vrot.slane %v1871_v41, 5 }
  0x77   : > { %v1897_v0 = vrot.slane %v1896_v58, 4  ;;  %v2536_v7 = vcombine.low %v1832_v62, %v1846_v63 }
  0x78   : > { %2764 = vmatpush3.bf16.msra.mxu1 %v3074_v1  ;;  %v3093_v1 = vld [vmem:[%s3198_s17 + $0x80] ss:$8 sps:$4 sm:$0xff]  }
  0x79   : > { %2860 = vmatpush3.bf16.msra.mxu0 %v3075_v5  ;;  %2765 = vmatprep.subr.bf16.mxu1 %v3076_v8  ;;  %v1902_v4 = vsel %vm3269_vm2, %v1897_v0, %v1901_v59  ;;  %v2516_v5 = vld [vmem:[%s3198_s17 + $0x38] sm:$0xf] }
  0x7a   : > { %2861 = vmatprep.subr.bf16.mxu0 %v3077_v9 }
  0x7c   : > { %2766 = vmatpush3.bf16.msra.mxu1 %v3076_v8  ;;  %v2508_v8 = vld [vmem:[%s3198_s17 + $0x18] sm:$0xf] }
  0x7d   : > { %2862 = vmatpush3.bf16.msra.mxu0 %v3077_v9  ;;  %2767 = vmatprep.subr.bf16.mxu1 %v3079_v10  ;;  %v2510_v9 = vld [vmem:[%s3198_s17 + $0x20] sm:$0xf]  ;;  %v1848_v16 = vshrl.u32 %v2508_v8, 16  ;;  %v1851_v17 = vshll.u32 %v2508_v8, 16 }
  0x7e   : > { %2863 = vmatprep.subr.bf16.mxu0 %v3081_v11  ;;  %v1862_v18 = vshrl.u32 %v2510_v9, 16  ;;  %v1865_v19 = vshll.u32 %v2510_v9, 16  ;;  %v2548_v9 = vld [vmem:[%s3531_s2] ss:$0 sm:$0xff] }
  0x7f   : > { %v1850_v26 = vrot.slane %v1848_v16, 4  ;;  %v1853_v27 = vrot.slane %v1851_v17, 5 }
  0x80   : > { %2768 = vmatpush3.bf16.msra.mxu1 %v3079_v10  ;;  %v2538_v10 = vcombine.low %v1888_v2, %v1902_v4  ;;  %v1864_v28 = vrot.slane %v1862_v18, 4  ;;  %v1867_v29 = vrot.slane %v1865_v19, 5 }
  0x81   : > { %2864 = vmatpush3.bf16.msra.mxu0 %v3081_v11  ;;  %2769 = vmatprep.subr.bf16.mxu1 %v3082_v12  ;;  %v1904_v11 = vshrl.u32 %v2516_v5, 16  ;;  %v1854_v38 = vor.u32 %v1853_v27, %v1850_v26 }
  0x82   : > { %2865 = vmatprep.subr.bf16.mxu0 %v3083_v13  ;;  %v1868_v40 = vor.u32 %v1867_v29, %v1864_v28 }
  0x83   : > { %v1906_v22 = vrot.slane %v1904_v11, 4  ;;  %v1855_v47 = vrot.slane %v1854_v38, 4 }
  0x84   : > { %2770 = vmatpush3.bf16.msra.mxu1 %v3082_v12  ;;  %v1907_v12 = vshll.u32 %v2516_v5, 16 }
  0x85   : > { %2866 = vmatpush3.bf16.msra.mxu0 %v3083_v13  ;;  %2899 = vmatprep.subr.bf16.mxu1 %v3088_v14  ;;  %v1918_v13 = vshrl.u32 %v2518_v6, 16 }
  0x86   : > { %2875 = vmatprep.subr.bf16.mxu0 %v3088_v14  ;;  %v1909_v23 = vrot.slane %v1907_v12, 5 }
  0x87   : > { %2772 = vmatmul.mubr.bf16.vlgmr.msra.gmra.mrb[0].mxu1 %v3086_v30  ;;  %v1920_v24 = vrot.slane %v1918_v13, 4  ;;  %v2519_v30 = vld [vmem:[%s3198_s17 + $0x44] sm:$0x1] }
  0x88   : > { %2868 = vmatmul.mubr.bf16.vlgmr.msra.gmra.mrb[0].mxu0 %v3087_v34  ;;  %2907 = vmatpush3.bf16.msra.mxu1 %v3088_v14  ;;  %v1910_v33 = vor.u32 %v1909_v23, %v1906_v22  ;;  %v1913_v34 = vshll.u32 %v2517_v21, 16  ;;  %v1927_v36 = vshll.u32 %v2519_v30, 16 }
  0x89   : > { %2876 = vmatpush3.bf16.msra.mxu0 %v3088_v14  ;;  %2900 = vmatprep.subr.bf16.mxu1 %v3089_v39  ;;  %v1921_v14 = vshll.u32 %v2518_v6, 16 }
  0x8a   : > { %2877 = vmatprep.subr.bf16.mxu0 %v3089_v39  ;;  %2775 = vmatprep.mubr.bf16.mxu1 %v3090_v44  ;;  %v1911_v42 = vrot.slane %v1910_v33, 4  ;;  %v1915_v43 = vrot.slane %v1913_v34, 5  ;;  %v1929_v45 = vrot.slane %v1927_v36, 5 }
  0x8b   : > { %2871 = vmatprep.mubr.bf16.mxu0 %v3091_v49  ;;  %v1923_v25 = vrot.slane %v1921_v14, 5  ;;  %v1869_v49 = vrot.slane %v1868_v40, 4 }
  0x8c   : > { %2908 = vmatpush3.bf16.msra.mxu1 %v3089_v39  ;;  %v1916_v51 = vsel %vm3269_vm2, %v1911_v42, %v1915_v43 }
  0x8d   : > { %2878 = vmatpush3.bf16.msra.mxu0 %v3089_v39  ;;  %2901 = vmatprep.subr.bf16.mxu1 %v3094_v57  ;;  %v1924_v35 = vor.u32 %v1923_v25, %v1920_v24  ;;  %v1857_v39 = vshll.u32 %v2509_v31, 16  ;;  %v1874_v55 = vsel %vm3269_vm2, %v1869_v49, %v1873_v50 }
  0x8e   : > { %2879 = vmatprep.subr.bf16.mxu0 %v3094_v57 }
  0x8f   : > { %2776 = vmatmul.mubr.bf16.gmra.mrb[4].mxu1 %v3092_v61  ;;  %v1925_v44 = vrot.slane %v1924_v35, 4  ;;  %v1859_v48 = vrot.slane %v1857_v39, 5 }
  0x90   : > { %2872 = vmatmul.mubr.bf16.gmra.mrb[4].mxu0 %v3093_v1  ;;  %2909 = vmatpush3.bf16.msra.mxu1 %v3094_v57 }
  0x91   : > { %2880 = vmatpush3.bf16.msra.mxu0 %v3094_v57  ;;  %2902 = vmatprep.subr.bf16.mxu1 %v3095_v3  ;;  %v1930_v52 = vsel %vm3269_vm2, %v1925_v44, %v1929_v45  ;;  %v1860_v54 = vsel %vm3269_vm2, %v1855_v47, %v1859_v48 }
  0x92   : > { %2881 = vmatprep.subr.bf16.mxu0 %v3095_v3  ;;  %2891 = vmatprep.mubr.bf16.mxu0 %v2536_v7  ;;  %v2539_v56 = vcombine.low %v1916_v51, %v1930_v52  ;;  %v2537_v57 = vcombine.low %v1860_v54, %v1874_v55 }
  0x93   : > { %2895 = vmatprep.mubr.bf16.mxu1 %v2538_v10 }
  0x94   : > { %2910 = vmatpush3.bf16.msra.mxu1 %v3095_v3 }
  0x95   : > { %2882 = vmatpush3.bf16.msra.mxu0 %v3095_v3  ;;  %2903 = vmatprep.subr.bf16.mxu1 %v3096_v15 }
  0x96   : > { %2883 = vmatprep.subr.bf16.mxu0 %v3096_v15 }
  0x98   : > { %2911 = vmatpush3.bf16.msra.mxu1 %v3096_v15 }
  0x99   : > { %2884 = vmatpush3.bf16.msra.mxu0 %v3096_v15  ;;  %2904 = vmatprep.subr.bf16.mxu1 %v3097_v20 }
  0x9a   : > { %2885 = vmatprep.subr.bf16.mxu0 %v3097_v20 }
  0x9c   : > { %2912 = vmatpush3.bf16.msra.mxu1 %v3097_v20 }
  0x9d   : > { %2886 = vmatpush3.bf16.msra.mxu0 %v3097_v20  ;;  %2905 = vmatprep.subr.bf16.mxu1 %v3098_v37 }
  0x9e   : > { %2887 = vmatprep.subr.bf16.mxu0 %v3098_v37 }
  0xa0   : > { %2913 = vmatpush3.bf16.msra.mxu1 %v3098_v37 }
  0xa1   : > { %2888 = vmatpush3.bf16.msra.mxu0 %v3098_v37  ;;  %2906 = vmatprep.subr.bf16.mxu1 %v3099_v46 }
  0xa2   : > { %2889 = vmatprep.subr.bf16.mxu0 %v3099_v46 }
  0xa4   : > { %2914 = vmatpush3.bf16.msra.mxu1 %v3099_v46 }
  0xa5   : > { %2890 = vmatpush3.bf16.msra.mxu0 %v3099_v46 }
  0xa7   : > { %2896 = vmatmul.mubr.bf16.vlgmr.msra.gmra.mrb[8].mxu1 %v2539_v56 }
  0xa8   : > { %2892 = vmatmul.mubr.bf16.vlgmr.msra.gmra.mrb[0].mxu0 %v2537_v57 }
 0x15a   : > { %v2773_v58 = vpop.f32.mrb[0].mxu1 }
 0x15b   : > { %v969_v59 = vpop.f32.mrb[1].mxu1 }
 0x15c   : > { %v2774_v60 = vpop.f32.mrb[2].mxu1 }
 0x15d   : > { %v972_v61 = vpop.f32.mrb[3].mxu1 }
 0x162   : > { %v2777_v62 = vpop.f32.mrb[4].mxu1 }
 0x163   : > { %v2873_v63 = vpop.f32.mrb[4].mxu0  ;;  %v985_v0 = vpop.f32.mrb[5].mxu1 }
 0x164   : > { %v2919_v1 = vadd.f32 %v2873_v63, %v2777_v62  ;;  %v1780_v2 = vpop.f32.mrb[5].mxu0  ;;  %v2778_v53 = vpop.f32.mrb[6].mxu1 }
 0x165   : > { %v2921_v3 = vadd.f32 %v1780_v2, %v985_v0  ;;  %v2874_v4 = vpop.f32.mrb[6].mxu0  ;;  %v988_v5 = vpop.f32.mrb[7].mxu1 }
 0x166   : > { %v2923_v6 = vadd.f32 %v2874_v4, %v2778_v53  ;;  %v1783_v7 = vpop.f32.mrb[7].mxu0 }
 0x167   : > { %v2925_v8 = vadd.f32 %v1783_v7, %v988_v5 }
 0x17a   : > { %v2897_v10 = vpop.f32.mrb[8].mxu1 }
 0x17b   : > { %v2893_v11 = vpop.f32.mrb[0].mxu0  ;;  %v2920_v12 = vadd.f32 %v2919_v1, %v2897_v10  ;;  %v2062_v13 = vpop.f32.mrb[9].mxu1 }
 0x17c   : > { %v2915_v14 = vadd.f32 %v2893_v11, %v2773_v58  ;;  %v2046_v15 = vpop.f32.mrb[1].mxu0  ;;  %v2922_v16 = vadd.f32 %v2921_v3, %v2062_v13  ;;  %v2898_v17 = vpop.f32.mrb[10].mxu1 }
 0x17d   : > { %v2098_v18 = vadd.f32 %v2920_v12, %v2548_v9  ;;  %v2916_v19 = vadd.f32 %v2046_v15, %v969_v59  ;;  %v2894_v20 = vpop.f32.mrb[2].mxu0  ;;  %v2924_v21 = vadd.f32 %v2923_v6, %v2898_v17  ;;  %v2065_v22 = vpop.f32.mrb[11].mxu1 }
 0x17e   : > { %v2094_v23 = vadd.f32 %v2915_v14, %v2548_v9  ;;  %v2096_v24 = vadd.f32 %v2922_v16, %v2548_v9  ;;  %v2917_v25 = vadd.f32 %v2894_v20, %v2774_v60  ;;  %v2049_v26 = vpop.f32.mrb[3].mxu0  ;;  %v2926_v27 = vadd.f32 %v2925_v8, %v2065_v22 }
 0x17f   : > { %v2092_v28 = vadd.f32 %v2916_v19, %v2548_v9  ;;  %v2099_v29 = vadd.f32 %v2924_v21, %v2548_v9  ;;  %v2918_v30 = vadd.f32 %v2049_v26, %v972_v61  ;;  %v2106_v33 = vmax.f32 %v2098_v18, 0.0 }
 0x180   : > { %v2095_v31 = vadd.f32 %v2917_v25, %v2548_v9  ;;  %v2097_v32 = vadd.f32 %v2926_v27, %v2548_v9  ;;  %v2102_v36 = vmax.f32 %v2094_v23, 0.0  ;;  %v2104_v37 = vmax.f32 %v2096_v24, 0.0 }
 0x181   : > { %v2107_v34 = vmax.f32 %v2099_v29, 0.0  ;;  %v2093_v35 = vadd.f32 %v2918_v30, %v2548_v9  ;;  %v2100_v40 = vmax.f32 %v2092_v28, 0.0 }
 0x182   : > { %v2103_v38 = vmax.f32 %v2095_v31, 0.0  ;;  %v2105_v39 = vmax.f32 %v2097_v32, 0.0 }
 0x183   : > { %v2570_v41 = vpack.c.bf16 %v2107_v34, %v2106_v33  ;;  %v2101_v42 = vmax.f32 %v2093_v35, 0.0 }
 0x184   : > { %v2560_v43 = vpack.c.bf16 %v2103_v38, %v2102_v36  ;;  %v2565_v44 = vpack.c.bf16 %v2105_v39, %v2104_v37 }
 0x185   : > { %2574 = vst [vmem:[%s226_s9 + $0x18] sm:$0xff] %v2570_v41   ;;  %v2555_v45 = vpack.c.bf16 %v2101_v42, %v2100_v40 }
 0x186   : > { %2572 = vst [vmem:[%s226_s9 + $0x8] sm:$0xff] %v2560_v43   ;;  %2573 = vst [vmem:[%s226_s9 + $0x10] sm:$0xff] %v2565_v44  }
 0x187   : > { %2556 = vst [vmem:[%s226_s9] sm:$0xff] %v2555_v45  }
 0x188 PF: > { %s13_s14 = sadd.s32 1, %s3122_s14   ;;  %s3535_s12 = smov %s3118_s13 }
 0x189   : > { %p10_p6 = scmp.ge.s32.totalorder %s13_s14, 4   ;;  %s3536_s13 = smov %s3538_s15 }
 0x18b   :  { %12 = sbr.rel (!%p10_p6) target bundleno = 2 (0x2), region = 81 }

// kernel: _lambda_.7
= control target key start
LH: loop header
LB: loop body
LE: loop exit
PB: predicated region body
PF: predicated region fallthrough
CT: control target
= control target key end

     0   :  { %s3373_s15 = smov 0   ;;  %s3375_s16 = smov 0   ;;  %s3968_s0 = inlined_call_operand.vmem [shape: bf16[2,10,10,128], index: 0, kind: input, shape index: {}]   ;;  %s3969_s1 = inlined_call_operand.vmem [shape: bf16[9,128,128], index: 1, kind: input, shape index: {}]   ;;  %s3970_s2 = inlined_call_operand.vmem [shape: f32[1,128], index: 2, kind: input, shape index: {}]   ;;  %s3971_s3 = inlined_call_operand.vmem [shape: bf16[2,8,8,128], index: 3, kind: input, shape index: {}]   ;;  %s3972_s4 = inlined_call_operand.vmem [shape: bf16[2,8,8,128], index: 4, kind: output, shape index: {}]  }
   0x1   :  { %s3377_s17 = smov 0  }
   0x2 LB: > { %s26_s18 = sadd.s32 1, %s3342_s16  ;;  %p2434_p0 = scmp.ge.s32.totalorder %s3346_s17, 1  ;;  %s3346_s17 = sphi %s3377_s17, %s14_s17   ;;  %s3342_s16 = sphi %s3375_s16, %s3978_s16   ;;  %s3338_s15 = sphi %s3373_s15, %s3977_s15  }
   0x3   : > { %p28_p1 = scmp.ge.s32.totalorder %s26_s18, 2  ;;  %p208_p2 = scmp.lt.s32.totalorder %s3346_s17, 3 }
   0x5   : > { %s3980_s18 = smov (%p28_p1, %s26_s18), 0  ;;  %p209_p3 = pnand %p2434_p0, %p208_p2 }
   0x6   : > { %v3240_v0 = vld [vmem:[%s3969_s1 + $0x40] sm:$0xff] (!%p209_p3)   ;;  %p252_p4 = scmp.lt.s32.totalorder (!%p209_p3), %s3338_s15, 1  ;;  %v3242_v2 = vld [vmem:[%s3969_s1 + $0x48] sm:$0xff] (!%p209_p3)   ;;  %v3244_v4 = vld [vmem:[%s3969_s1 + $0x50] sm:$0xff] (!%p209_p3)   ;;  %vm313_vm0 = vsmask.f32 (!%p209_p3), 3328 }
   0x7   : > { %212 = sbr.rel (%p209_p3) target bundleno = 397 (0x18d), region = 36  ;;  %v3241_v1 = vld [vmem:[%s3969_s1 + $0x100] sm:$0xff] (!%p209_p3)   ;;  %2919 = vmatprep.subr.bf16.mxu1 (!%p209_p3), %v3240_v0  ;;  %v3243_v3 = vld [vmem:[%s3969_s1 + $0x108] sm:$0xff] (!%p209_p3)   ;;  %v3245_v5 = vld [vmem:[%s3969_s1 + $0x110] sm:$0xff] (!%p209_p3)   ;;  %vm314_vm1 = vsmask.f32 (!%p209_p3), 7440 }
   0x8   : > { %3015 = vmatprep.subr.bf16.mxu0 (!%p209_p3), %v3241_v1  ;;  %2920 = vmatpush3.bf16.msra.mxu1 (!%p209_p3), %v3240_v0  ;;  %v3246_v6 = vld [vmem:[%s3969_s1 + $0x58] sm:$0xff] (!%p209_p3)   ;;  %v3248_v8 = vld [vmem:[%s3969_s1 + $0x60] sm:$0xff] (!%p209_p3)   ;;  %v3250_v10 = vld [vmem:[%s3969_s1 + $0x68] sm:$0xff] (!%p209_p3)   ;;  %vm735_vm3 = vcmask (!%p209_p3), 1042432   ;;  %vm736_vm4 = vcmask (!%p209_p3), 1046532  }
   0x9   : > { %3016 = vmatpush3.bf16.msra.mxu0 (!%p209_p3), %v3241_v1  ;;  %2921 = vmatprep.subr.bf16.mxu1 (!%p209_p3), %v3242_v2  ;;  %v3247_v7 = vld [vmem:[%s3969_s1 + $0x118] sm:$0xff] (!%p209_p3)   ;;  %v3249_v9 = vld [vmem:[%s3969_s1 + $0x120] sm:$0xff] (!%p209_p3)   ;;  %v3251_v14 = vld [vmem:[%s3969_s1 + $0x128] sm:$0xff] (!%p209_p3)  }
   0xa   : > { %3017 = vmatprep.subr.bf16.mxu0 (!%p209_p3), %v3243_v3  ;;  %v3252_v22 = vld [vmem:[%s3969_s1 + $0x70] sm:$0xff] (!%p209_p3)   ;;  %v3254_v37 = vld [vmem:[%s3969_s1 + $0x78] sm:$0xff] (!%p209_p3)   ;;  %vm3472_vm2 = vmor (!%p209_p3), %vm313_vm0, %vm314_vm1 }
   0xb   : > { %v3253_v23 = vld [vmem:[%s3969_s1 + $0x130] sm:$0xff] (!%p209_p3)   ;;  %v3255_v47 = vld [vmem:[%s3969_s1 + $0x138] sm:$0xff] (!%p209_p3)   ;;  %v3256_v63 = vld [vmem:[%s3969_s1] sm:$0xff] (!%p209_p3)  }
   0xc   : > { %2922 = vmatpush3.bf16.msra.mxu1 (!%p209_p3), %v3242_v2  ;;  %v3504_v1 = vld [vmem:[%s3969_s1 + $0x140] sm:$0xff] (!%p209_p3)   ;;  %vm3646_vm5 = vmor (!%p209_p3), %vm735_vm3, %vm736_vm4 }
   0xd   : > { %3018 = vmatpush3.bf16.msra.mxu0 (!%p209_p3), %v3243_v3  ;;  %2923 = vmatprep.subr.bf16.mxu1 (!%p209_p3), %v3244_v4  ;;  %v3320_v38 = vld [vmem:[%s3969_s1 + $0x220] sm:$0xff] (!%p209_p3)  }
   0xe   : > { %s3982_s15 = smov (!%p252_p4, %s3338_s15), 1  ;;  %3019 = vmatprep.subr.bf16.mxu0 %v3245_v5 }
   0xf   : > { %s3215_s9 = smul.u32 80, %s3982_s15 }
  0x10   : > { %2924 = vmatpush3.bf16.msra.mxu1 %v3244_v4 }
  0x11   : > { %3020 = vmatpush3.bf16.msra.mxu0 %v3245_v5  ;;  %2925 = vmatprep.subr.bf16.mxu1 %v3246_v6  ;;  %s3427_s20 = scalar_lea.vmem %s3968_s0, %s3215_s9 }
  0x12   : > { %3021 = vmatprep.subr.bf16.mxu0 %v3247_v7  ;;  %v3433_v11 = vld [vmem:[%s3427_s20] sm:$0xf]  ;;  %v3436_v12 = vld [vmem:[%s3427_s20 + $0x8] sm:$0xf]  ;;  %v3439_v13 = vld [vmem:[%s3427_s20 + $0x4] sm:$0x1] }
  0x13   : > { %v3445_v15 = vld [vmem:[%s3427_s20 + $0xc] sm:$0x1]  ;;  %v317_v16 = vshrl.u32 %v3433_v11, 16  ;;  %v320_v17 = vshll.u32 %v3433_v11, 16  ;;  %v326_v18 = vshll.u32 %v3439_v13, 16  ;;  %v331_v19 = vshrl.u32 %v3436_v12, 16 }
  0x14   : > { %2926 = vmatpush3.bf16.msra.mxu1 %v3246_v6  ;;  %v334_v20 = vshll.u32 %v3436_v12, 16  ;;  %v340_v21 = vshll.u32 %v3445_v15, 16  ;;  %v2552_v30 = vld [vmem:[%s3427_s20 + $0x8] sm:$0xf]  ;;  %v3461_v31 = vld [vmem:[%s3427_s20 + $0xc] sm:$0x1] }
  0x15   : > { %3022 = vmatpush3.bf16.msra.mxu0 %v3247_v7  ;;  %2927 = vmatprep.subr.bf16.mxu1 %v3248_v8  ;;  %v319_v24 = vrot.slane %v317_v16, 4  ;;  %v322_v25 = vrot.slane %v320_v17, 5  ;;  %v328_v26 = vrot.slane %v326_v18, 5  ;;  %v333_v27 = vrot.slane %v331_v19, 4  ;;  %v2554_v33 = vld [vmem:[%s3427_s20 + $0x10] sm:$0xf] }
  0x16   : > { %3023 = vmatprep.subr.bf16.mxu0 %v3249_v9  ;;  %v336_v28 = vrot.slane %v334_v20, 5  ;;  %v342_v29 = vrot.slane %v340_v21, 5  ;;  %v3465_v34 = vld [vmem:[%s3427_s20 + $0x14] sm:$0x1]  ;;  %v1112_v35 = vshrl.u32 %v2552_v30, 16  ;;  %v1115_v36 = vshll.u32 %v2552_v30, 16 }
  0x17   : > { %v323_v32 = vor.u32 %v322_v25, %v319_v24  ;;  %v1121_v40 = vshll.u32 %v3461_v31, 16  ;;  %v1126_v41 = vshrl.u32 %v2554_v33, 16  ;;  %v1129_v42 = vshll.u32 %v2554_v33, 16  ;;  %v3482_v51 = vld [vmem:[%s3427_s20 + $0x10] sm:$0xf] }
  0x18   : > { %2928 = vmatpush3.bf16.msra.mxu1 %v3248_v8  ;;  %v337_v39 = vor.u32 %v336_v28, %v333_v27  ;;  %v1114_v44 = vrot.slane %v1112_v35, 4  ;;  %v1117_v45 = vrot.slane %v1115_v36, 5  ;;  %v1135_v46 = vshll.u32 %v3465_v34, 16  ;;  %v3487_v55 = vld [vmem:[%s3427_s20 + $0x18] sm:$0xf] }
  0x19   : > { %3024 = vmatpush3.bf16.msra.mxu0 %v3249_v9  ;;  %2929 = vmatprep.subr.bf16.mxu1 %v3250_v10  ;;  %v324_v43 = vrot.slane %v323_v32, 4  ;;  %v1128_v49 = vrot.slane %v1126_v41, 4  ;;  %v1131_v50 = vrot.slane %v1129_v42, 5  ;;  %v1123_v54 = vrot.slane %v1121_v40, 5  ;;  %v3490_v56 = vld [vmem:[%s3427_s20 + $0x14] sm:$0x1] }
  0x1a   : > { %3025 = vmatprep.subr.bf16.mxu0 %v3251_v14  ;;  %v338_v48 = vrot.slane %v337_v39, 4  ;;  %v1118_v53 = vor.u32 %v1117_v45, %v1114_v44  ;;  %v1137_v59 = vrot.slane %v1135_v46, 5  ;;  %v3495_v60 = vld [vmem:[%s3427_s20 + $0x1c] sm:$0x1]  ;;  %v345_v61 = vshrl.u32 %v3482_v51, 16 }
  0x1b   : > { %v329_v52 = vsel %vm3472_vm2, %v324_v43, %v328_v26  ;;  %v1132_v58 = vor.u32 %v1131_v50, %v1128_v49  ;;  %v348_v2 = vshll.u32 %v3482_v51, 16  ;;  %v354_v3 = vshll.u32 %v3490_v56, 16  ;;  %v2556_v8 = vld [vmem:[%s3427_s20 + $0x18] sm:$0xf]  ;;  %v3515_v16 = vld [vmem:[%s3427_s20 + $0x1c] sm:$0x1] }
  0x1c   : > { %2930 = vmatpush3.bf16.msra.mxu1 %v3250_v10  ;;  %v343_v57 = vsel %vm3472_vm2, %v338_v48, %v342_v29  ;;  %v1119_v0 = vrot.slane %v1118_v53, 4  ;;  %v347_v5 = vrot.slane %v345_v61, 4  ;;  %v359_v6 = vshrl.u32 %v3487_v55, 16  ;;  %v2558_v17 = vld [vmem:[%s3427_s20 + $0x20] sm:$0xf]  ;;  %v3258_v43 = vld [vmem:[%s3969_s1 + $0x8] sm:$0xff]  }
  0x1d   : > { %3026 = vmatpush3.bf16.msra.mxu0 %v3251_v14  ;;  %2931 = vmatprep.subr.bf16.mxu1 %v3252_v22  ;;  %v2456_v62 = vcombine.low %v329_v52, %v343_v57  ;;  %v1133_v4 = vrot.slane %v1132_v58, 4  ;;  %v362_v7 = vshll.u32 %v3487_v55, 16  ;;  %v350_v10 = vrot.slane %v348_v2, 5  ;;  %v3521_v21 = vld [vmem:[%s3427_s20 + $0x24] sm:$0x1] }
  0x1e   : > { %3027 = vmatprep.subr.bf16.mxu0 %v3253_v23  ;;  %v1124_v9 = vsel %vm3472_vm2, %v1119_v0, %v1123_v54  ;;  %v368_v14 = vshll.u32 %v3495_v60, 16  ;;  %v361_v19 = vrot.slane %v359_v6, 4  ;;  %v356_v24 = vrot.slane %v354_v3, 5  ;;  %v3259_v54 = vld [vmem:[%s3969_s1 + $0x148] sm:$0xff]   ;;  %v3551_v0 = vld [vmem:[%s3427_s20 + $0x24] sm:$0x1] }
  0x1f   : > { %2935 = vmatprep.mubr.bf16.mxu1 %v2456_v62  ;;  %v1138_v18 = vsel %vm3472_vm2, %v1133_v4, %v1137_v59  ;;  %v364_v20 = vrot.slane %v362_v7, 5  ;;  %v1140_v27 = vshrl.u32 %v2556_v8, 16  ;;  %v1143_v28 = vshll.u32 %v2556_v8, 16  ;;  %v3260_v59 = vld [vmem:[%s3969_s1 + $0x10] sm:$0xff]   ;;  %v3545_v62 = vld [vmem:[%s3427_s20 + $0x20] sm:$0xf] }
  0x20   : > { %2932 = vmatpush3.bf16.msra.mxu1 %v3252_v22  ;;  %v2584_v22 = vcombine.low %v1124_v9, %v1138_v18  ;;  %v370_v25 = vrot.slane %v368_v14, 5  ;;  %v1149_v29 = vshll.u32 %v3515_v16, 16  ;;  %v1154_v32 = vshrl.u32 %v2558_v17, 16  ;;  %v3554_v2 = vld [vmem:[%s3427_s20 + $0x2c] sm:$0x1]  ;;  %v3261_v9 = vld [vmem:[%s3969_s1 + $0x150] sm:$0xff]  }
  0x21   : > { %3028 = vmatpush3.bf16.msra.mxu0 %v3253_v23  ;;  %2933 = vmatprep.subr.bf16.mxu1 %v3254_v37  ;;  %v351_v23 = vor.u32 %v350_v10, %v347_v5  ;;  %v365_v26 = vor.u32 %v364_v20, %v361_v19  ;;  %v1157_v33 = vshll.u32 %v2558_v17, 16  ;;  %v1163_v35 = vshll.u32 %v3521_v21, 16  ;;  %v3262_v10 = vld [vmem:[%s3969_s1 + $0x18] sm:$0xff]  }
  0x22   : > { %3029 = vmatprep.subr.bf16.mxu0 %v3255_v47  ;;  %3031 = vmatprep.mubr.bf16.mxu0 %v2584_v22  ;;  %v1145_v39 = vrot.slane %v1143_v28, 5  ;;  %v1156_v41 = vrot.slane %v1154_v32, 4  ;;  %v1151_v46 = vrot.slane %v1149_v29, 5  ;;  %v1403_v57 = vrot.slane %v3461_v31, 5  ;;  %v3263_v29 = vld [vmem:[%s3969_s1 + $0x158] sm:$0xff]  }
  0x23   : > { %v352_v30 = vrot.slane %v351_v23, 4  ;;  %v366_v36 = vrot.slane %v365_v26, 4  ;;  %v1159_v42 = vrot.slane %v1157_v33, 5  ;;  %v373_v3 = vshrl.u32 %v3545_v62, 16  ;;  %v2560_v23 = vld [vmem:[%s3427_s20 + $0x28] sm:$0xf] }
  0x24   : > { %2934 = vmatpush3.bf16.msra.mxu1 %v3254_v37  ;;  %v1142_v37 = vrot.slane %v1140_v27, 4  ;;  %v376_v4 = vshll.u32 %v3545_v62, 16  ;;  %v382_v5 = vshll.u32 %v3551_v0, 16  ;;  %v396_v8 = vshll.u32 %v3554_v2, 16  ;;  %v3575_v26 = vld [vmem:[%s3427_s20 + $0x34] sm:$0x1] }
  0x25   : > { %3030 = vmatpush3.bf16.msra.mxu0 %v3255_v47  ;;  %2943 = vmatprep.subr.bf16.mxu1 %v3256_v63  ;;  %v357_v40 = vsel %vm3472_vm2, %v352_v30, %v356_v24  ;;  %v371_v44 = vsel %vm3472_vm2, %v366_v36, %v370_v25  ;;  %v1165_v47 = vrot.slane %v1163_v35, 5  ;;  %v1160_v49 = vor.u32 %v1159_v42, %v1156_v41  ;;  %v3571_v24 = vld [vmem:[%s3427_s20 + $0x2c] sm:$0x1]  ;;  %v2562_v25 = vld [vmem:[%s3427_s20 + $0x30] sm:$0xf]  ;;  %v3264_v30 = vld [vmem:[%s3969_s1 + $0x20] sm:$0xff]  }
  0x26   : > { %3039 = vmatprep.subr.bf16.mxu0 %v3504_v1  ;;  %v1146_v45 = vor.u32 %v1145_v39, %v1142_v37  ;;  %v2457_v48 = vcombine.low %v357_v40, %v371_v44  ;;  %v375_v14 = vrot.slane %v373_v3, 4  ;;  %v378_v17 = vrot.slane %v376_v4, 5 }
  0x27   : > { %v1161_v52 = vrot.slane %v1160_v49, 4  ;;  %v384_v18 = vrot.slane %v382_v5, 5  ;;  %v398_v22 = vrot.slane %v396_v8, 5  ;;  %v1168_v27 = vshrl.u32 %v2560_v23, 16  ;;  %v2564_v5 = vld [vmem:[%s3427_s20 + $0x38] sm:$0xf] }
  0x28   : > { %v1147_v50 = vrot.slane %v1146_v45, 4  ;;  %2936 = vmatmul.mubr.bf16.vlgmr.msra.gmra.mrb[0].mxu1 %v2457_v48  ;;  %v1171_v28 = vshll.u32 %v2560_v23, 16  ;;  %v1177_v33 = vshll.u32 %v3571_v24, 16  ;;  %v1182_v35 = vshrl.u32 %v2562_v25, 16 }
  0x29   : > { %2944 = vmatpush3.bf16.msra.mxu1 %v3256_v63  ;;  %v1166_v58 = vsel %vm3472_vm2, %v1161_v52, %v1165_v47  ;;  %v3548_v63 = vld [vmem:[%s3427_s20 + $0x28] sm:$0xf]  ;;  %v1185_v36 = vshll.u32 %v2562_v25, 16  ;;  %v1170_v39 = vrot.slane %v1168_v27, 4  ;;  %v1191_v41 = vshll.u32 %v3575_v26, 16 }
  0x2a   : > { %v1152_v53 = vsel %vm3472_vm2, %v1147_v50, %v1151_v46  ;;  %2945 = vmatprep.subr.bf16.mxu1 %v3258_v43  ;;  %v387_v6 = vshrl.u32 %v3548_v63, 16  ;;  %v390_v7 = vshll.u32 %v3548_v63, 16  ;;  %v1173_v40 = vrot.slane %v1171_v28, 5  ;;  %v3586_v46 = vld [vmem:[%s3427_s20 + $0x30] sm:$0xf] }
  0x2b   : > { %v2585_v61 = vcombine.low %v1152_v53, %v1166_v58  ;;  %v1184_v44 = vrot.slane %v1182_v35, 4  ;;  %v1187_v45 = vrot.slane %v1185_v36, 5  ;;  %v1193_v49 = vrot.slane %v1191_v41, 5  ;;  %v3591_v50 = vld [vmem:[%s3427_s20 + $0x38] sm:$0xf] }
  0x2c   : > { %v389_v19 = vrot.slane %v387_v6, 4  ;;  %v392_v20 = vrot.slane %v390_v7, 5  ;;  %v1174_v48 = vor.u32 %v1173_v40, %v1170_v39  ;;  %v3594_v52 = vld [vmem:[%s3427_s20 + $0x34] sm:$0x1]  ;;  %v401_v53 = vshrl.u32 %v3586_v46, 16  ;;  %v3266_v6 = vld [vmem:[%s3969_s1 + $0x28] sm:$0xff]  }
  0x2d   : > { %3032 = vmatmul.mubr.bf16.vlgmr.msra.gmra.mrb[0].mxu0 %v2585_v61  ;;  %2946 = vmatpush3.bf16.msra.mxu1 %v3258_v43  ;;  %v1179_v43 = vrot.slane %v1177_v33, 5  ;;  %v3603_v61 = vld [vmem:[%s3427_s20 + $0x3c] sm:$0x1]  ;;  %v404_v3 = vshll.u32 %v3586_v46, 16  ;;  %v410_v4 = vshll.u32 %v3594_v52, 16  ;;  %v1196_v28 = vshrl.u32 %v2564_v5, 16 }
  0x2e   : > { %3040 = vmatpush3.bf16.msra.mxu0 %v3504_v1  ;;  %2947 = vmatprep.subr.bf16.mxu1 %v3260_v59  ;;  %v379_v1 = vor.u32 %v378_v17, %v375_v14  ;;  %v393_v32 = vor.u32 %v392_v20, %v389_v19  ;;  %v1175_v8 = vrot.slane %v1174_v48, 4  ;;  %v415_v14 = vshrl.u32 %v3591_v50, 16  ;;  %v3613_v17 = vld [vmem:[%s3427_s20 + $0x3c] sm:$0x1]  ;;  %v3621_v27 = vld [vmem:[%s3427_s20 + $0x44] sm:$0x1] }
  0x2f   : > { %3041 = vmatprep.subr.bf16.mxu0 %v3259_v54  ;;  %v406_v19 = vrot.slane %v404_v3, 5  ;;  %v412_v20 = vrot.slane %v410_v4, 5  ;;  %v424_v25 = vshll.u32 %v3603_v61, 16  ;;  %v1199_v36 = vshll.u32 %v2564_v5, 16 }
  0x30   : > { %v380_v37 = vrot.slane %v379_v1, 4  ;;  %v394_v42 = vrot.slane %v393_v32, 4  ;;  %v1180_v23 = vsel %vm3472_vm2, %v1175_v8, %v1179_v43  ;;  %v417_v1 = vrot.slane %v415_v14, 4 }
  0x31   : > { %2948 = vmatpush3.bf16.msra.mxu1 %v3260_v59  ;;  %v1188_v59 = vor.u32 %v1187_v45, %v1184_v44  ;;  %v426_v40 = vrot.slane %v424_v25, 5  ;;  %v1198_v41 = vrot.slane %v1196_v28, 4  ;;  %v1201_v45 = vrot.slane %v1199_v36, 5  ;;  %v2598_v25 = vld [vmem:[%s3427_s20 + $0x18] sm:$0xe] }
  0x32   : > { %3042 = vmatpush3.bf16.msra.mxu0 %v3259_v54  ;;  %2949 = vmatprep.subr.bf16.mxu1 %v3262_v10  ;;  %v385_v47 = vsel %vm3472_vm2, %v380_v37, %v384_v18  ;;  %v3265_v54 = vld [vmem:[%s3969_s1 + $0x160] sm:$0xff]   ;;  %v399_v58 = vsel %vm3472_vm2, %v394_v42, %v398_v22  ;;  %v418_v22 = vshll.u32 %v3591_v50, 16  ;;  %v3268_v37 = vld [vmem:[%s3969_s1 + $0x30] sm:$0xff]   ;;  %v1205_v42 = vshll.u32 %v3613_v17, 16  ;;  %v3271_v28 = vld [vmem:[%s3969_s1 + $0x178] sm:$0xff]  }
  0x33   : > { %3043 = vmatprep.subr.bf16.mxu0 %v3261_v9  ;;  %v2458_v7 = vcombine.low %v385_v47, %v399_v58  ;;  %v1189_v18 = vrot.slane %v1188_v59, 4  ;;  %v1407_v47 = vrot.slane %v3465_v34, 5  ;;  %v1411_v48 = vrot.slane %v3515_v16, 5  ;;  %v3269_v58 = vld [vmem:[%s3969_s1 + $0x170] sm:$0xff]  }
  0x34   : > { %v420_v35 = vrot.slane %v418_v22, 5  ;;  %v1202_v4 = vor.u32 %v1201_v45, %v1198_v41  ;;  %v1207_v34 = vrot.slane %v1205_v42, 5  ;;  %v1415_v22 = vrot.slane %v3521_v21, 5  ;;  %v3274_v41 = vld [vmem:[%s3969_s1 + $0x180] sm:$0xff]  }
  0x35   : > { %2950 = vmatpush3.bf16.msra.mxu1 %v3262_v10  ;;  %v403_v10 = vrot.slane %v401_v53, 4  ;;  %2939 = vmatprep.mubr.bf16.mxu1 %v2458_v7  ;;  %v1194_v32 = vsel %vm3472_vm2, %v1189_v18, %v1193_v49  ;;  %v1219_v53 = vshll.u32 %v3621_v27, 16  ;;  %v2596_v7 = vld [vmem:[%s3427_s20 + $0x8] sm:$0xe]  ;;  %v2606_v36 = vrot.slane %v2598_v25, 9 }
  0x36   : > { %3044 = vmatpush3.bf16.msra.mxu0 %v3261_v9  ;;  %2951 = vmatprep.subr.bf16.mxu1 %v3264_v30  ;;  %v2566_v9 = vld [vmem:[%s3427_s20 + $0x40] sm:$0xf]  ;;  %v2586_v39 = vcombine.low %v1180_v23, %v1194_v32  ;;  %v421_v44 = vor.u32 %v420_v35, %v417_v1  ;;  %v2604_v14 = vrot.slane %v2596_v7, 9  ;;  %v1203_v18 = vrot.slane %v1202_v4, 4 }
  0x37   : > { %3045 = vmatprep.subr.bf16.mxu0 %v3263_v29  ;;  %v407_v33 = vor.u32 %v406_v19, %v403_v10  ;;  %v1213_v49 = vshll.u32 %v2566_v9, 16  ;;  %v2597_v10 = vld [vmem:[%s3427_s20 + $0x10] sm:$0xe]  ;;  %v2468_v19 = vcombine.low %v3433_v11, %v3436_v12  ;;  %v1221_v1 = vrot.slane %v1219_v53, 5  ;;  %v2599_v12 = vld [vmem:[%s3427_s20 + $0x20] sm:$0xe] }
  0x38   : > { %3035 = vmatprep.mubr.bf16.mxu0 %v2586_v39  ;;  %v422_v3 = vrot.slane %v421_v44, 4  ;;  %v1404_v32 = vsel %vm3646_vm5, %v2604_v14, %v1403_v57  ;;  %v1208_v21 = vsel %vm3472_vm2, %v1203_v18, %v1207_v34  ;;  %v3273_v35 = vld [vmem:[%s3969_s1 + $0x80] sm:$0xff]   ;;  %v1412_v42 = vsel %vm3646_vm5, %v2606_v36, %v1411_v48  ;;  %v3278_v44 = vld [vmem:[%s3969_s1 + $0x90] sm:$0xff]  }
  0x39   : > { %2952 = vmatpush3.bf16.msra.mxu1 %v3264_v30  ;;  %v3267_v30 = vld [vmem:[%s3969_s1 + $0x168] sm:$0xff]   ;;  %v408_v43 = vrot.slane %v407_v33, 4  ;;  %v1215_v16 = vrot.slane %v1213_v49, 5  ;;  %v1419_v45 = vrot.slane %v3571_v24, 5  ;;  %v1427_v53 = vrot.slane %v3613_v17, 5  ;;  %v3282_v18 = vld [vmem:[%s3969_s1 + $0xa0] sm:$0xff]  }
  0x3a   : > { %3046 = vmatpush3.bf16.msra.mxu0 %v3263_v29  ;;  %2953 = vmatprep.subr.bf16.mxu1 %v3266_v6  ;;  %v1210_v29 = vshrl.u32 %v2566_v9, 16  ;;  %v1431_v24 = vrot.slane %v3621_v27, 5  ;;  %v744_v34 = vrot.slane %v3445_v15, 5  ;;  %v748_v17 = vrot.slane %v3490_v56, 5  ;;  %v712_v15 = vld [vmem:[%s3427_s20 + $0x8] sm:$0xe] }
  0x3b   : > { %3047 = vmatprep.subr.bf16.mxu0 %v3265_v54  ;;  %v413_v59 = vsel %vm3472_vm2, %v408_v43, %v412_v20  ;;  %v2605_v20 = vrot.slane %v2597_v10, 9  ;;  %v3276_v43 = vld [vmem:[%s3969_s1 + $0x88] sm:$0xff]   ;;  %v3279_v10 = vld [vmem:[%s3969_s1 + $0x190] sm:$0xff]   ;;  %v2481_v14 = vrot.slane %v712_v15, 9  ;;  %v756_v36 = vrot.slane %v3551_v0, 5  ;;  %v3292_v0 = vld [vmem:[%s3969_s1 + $0xc0] sm:$0xff]  }
  0x3c   : > { %v1212_v5 = vrot.slane %v1210_v29, 4  ;;  %v1423_v29 = vrot.slane %v3575_v26, 5  ;;  %v2471_v26 = vcombine.low %v3586_v46, %v3591_v50  ;;  %v3280_v46 = vld [vmem:[%s3969_s1 + $0x98] sm:$0xff]   ;;  %v3297_v15 = vld [vmem:[%s3969_s1 + $0x1c8] sm:$0xff]  }
  0x3d   : > { %2954 = vmatpush3.bf16.msra.mxu1 %v3266_v6  ;;  %v3270_v6 = vld [vmem:[%s3969_s1 + $0x38] sm:$0xff]   ;;  %v1408_v11 = vsel %vm3646_vm5, %v2605_v20, %v1407_v47 }
  0x3e   : > { %3048 = vmatpush3.bf16.msra.mxu0 %v3265_v54  ;;  %2955 = vmatprep.subr.bf16.mxu1 %v3268_v37  ;;  %v427_v54 = vsel %vm3472_vm2, %v422_v3, %v426_v40  ;;  %v1216_v23 = vor.u32 %v1215_v16, %v1212_v5  ;;  %v2628_v57 = vcombine.low %v1404_v32, %v1408_v11  ;;  %v711_v16 = vld [vmem:[%s3427_s20] sm:$0xe]  ;;  %v3281_v20 = vld [vmem:[%s3969_s1 + $0x198] sm:$0xff]  }
  0x3f   : > { %3049 = vmatprep.subr.bf16.mxu0 %v3267_v30  ;;  %v2459_v9 = vcombine.low %v413_v59, %v427_v54  ;;  %v2469_v40 = vcombine.low %v3482_v51, %v3487_v55  ;;  %v2470_v51 = vcombine.low %v3545_v62, %v3548_v63  ;;  %v740_v55 = vrot.slane %v3439_v13, 5  ;;  %v3277_v62 = vld [vmem:[%s3969_s1 + $0x188] sm:$0xff]   ;;  %v2601_v63 = vld [vmem:[%s3427_s20 + $0x30] sm:$0xe]  ;;  %v2603_v59 = vld [vmem:[%s3427_s20 + $0x40] sm:$0xe] }
  0x40   : > { %v1217_v33 = vrot.slane %v1216_v23, 4  ;;  %v2600_v13 = vld [vmem:[%s3427_s20 + $0x28] sm:$0xe]  ;;  %v2609_v49 = vrot.slane %v2601_v63, 9  ;;  %v2611_v7 = vrot.slane %v2603_v59, 9  ;;  %v2480_v56 = vrot.slane %v711_v16, 9 }
  0x41   : > { %2956 = vmatpush3.bf16.msra.mxu1 %v3268_v37  ;;  %v2607_v37 = vrot.slane %v2599_v12, 9  ;;  %v2608_v48 = vrot.slane %v2600_v13, 9  ;;  %v752_v54 = vrot.slane %v3495_v60, 5  ;;  %v713_v23 = vld [vmem:[%s3427_s20 + $0x10] sm:$0xe] }
  0x42   : > { %3050 = vmatpush3.bf16.msra.mxu0 %v3267_v30  ;;  %2940 = vmatmul.mubr.bf16.gmra.mrb[4].mxu1 %v2459_v9  ;;  %v1222_v31 = vsel %vm3472_vm2, %v1217_v33, %v1221_v1  ;;  %v1424_v4 = vsel %vm3646_vm5, %v2609_v49, %v1423_v29  ;;  %v745_v9 = vsel %vm3646_vm5, %v2481_v14, %v744_v34  ;;  %v714_v60 = vld [vmem:[%s3427_s20 + $0x18] sm:$0xe]  ;;  %v2482_v25 = vrot.slane %v713_v23, 9  ;;  %v3284_v33 = vld [vmem:[%s3969_s1 + $0xa8] sm:$0xff]  }
  0x43   : > { %3051 = vmatprep.subr.bf16.mxu0 %v3269_v58  ;;  %2957 = vmatprep.subr.bf16.mxu1 %v3270_v6  ;;  %v2587_v39 = vcombine.low %v1208_v21, %v1222_v31  ;;  %v1416_v30 = vsel %vm3646_vm5, %v2607_v37, %v1415_v22  ;;  %v1420_v3 = vsel %vm3646_vm5, %v2608_v48, %v1419_v45  ;;  %v3293_v32 = vld [vmem:[%s3427_s20 + $0x10] ss:$8 sps:$4 sm:$0xff]   ;;  %v764_v29 = vrot.slane %v3594_v52, 5  ;;  %v3296_v49 = vld [vmem:[%s3969_s1 + $0xc8] sm:$0xff]  }
  0x44   : > { %2959 = vmatprep.mubr.bf16.mxu1 %v2468_v19  ;;  %v2629_v47 = vcombine.low %v1412_v42, %v1416_v30  ;;  %v2630_v27 = vcombine.low %v1420_v3, %v1424_v4  ;;  %v741_v19 = vsel %vm3646_vm5, %v2480_v56, %v740_v55  ;;  %v749_v11 = vsel %vm3646_vm5, %v2482_v25, %v748_v17  ;;  %v3287_v31 = vld [vmem:[%s3969_s1 + $0xb0] sm:$0xff]   ;;  %v3290_v37 = vld [vmem:[%s3969_s1 + $0xb8] sm:$0xff]   ;;  %v2682_v25 = vld [vmem:[%s3427_s20 + $0x28] sm:$0xf] }
  0x45   : > { %2958 = vmatpush3.bf16.msra.mxu1 %v3270_v6  ;;  %3036 = vmatmul.mubr.bf16.gmra.mrb[4].mxu0 %v2587_v39  ;;  %v1432_v6 = vsel %vm3646_vm5, %v2611_v7, %v1431_v24  ;;  %v2504_v1 = vcombine.low %v741_v19, %v745_v9  ;;  %v715_v39 = vld [vmem:[%s3427_s20 + $0x20] sm:$0xe]  ;;  %v3291_v45 = vld [vmem:[%s3969_s1 + $0x1b8] sm:$0xff]   ;;  %v3785_v24 = vld [vmem:[%s3427_s20 + $0x14] sm:$0x1] }
  0x46   : > { %3052 = vmatpush3.bf16.msra.mxu0 %v3269_v58  ;;  %2967 = vmatprep.subr.bf16.mxu1 %v3273_v35  ;;  %v2602_v58 = vld [vmem:[%s3427_s20 + $0x38] sm:$0xe]  ;;  %v2484_v42 = vrot.slane %v715_v39, 9  ;;  %v1784_v59 = vshll.u32 %v3785_v24, 16  ;;  %v3295_v7 = vld [vmem:[%s3427_s20 + $0x20] ss:$8 sps:$4 sm:$0xff]  }
  0x47   : > { %3053 = vmatprep.subr.bf16.mxu0 %v3271_v28  ;;  %3055 = vmatprep.mubr.bf16.mxu0 %v2628_v57  ;;  %v2610_v5 = vrot.slane %v2602_v58, 9  ;;  %v3285_v57 = vld [vmem:[%s3969_s1 + $0x1a8] sm:$0xff]   ;;  %v2678_v52 = vld [vmem:[%s3427_s20 + $0x18] sm:$0xf]  ;;  %v3299_v9 = vld [vmem:[%s3969_s1 + $0x1d0] sm:$0xff]  }
  0x48   : > { %v1789_v3 = vshrl.u32 %v2678_v52, 16  ;;  %v1792_v4 = vshll.u32 %v2678_v52, 16  ;;  %v3306_v56 = vld [vmem:[%s3427_s20 + $0x30] ss:$8 sps:$4 sm:$0xff]   ;;  %v3305_v52 = vld [vmem:[%s3969_s1 + $0x1e8] sm:$0xff]  }
  0x49   : > { %v1428_v50 = vsel %vm3646_vm5, %v2610_v5, %v1427_v53  ;;  %v2676_v53 = vld [vmem:[%s3427_s20 + $0x10] sm:$0xf]  ;;  %v3300_v23 = vld [vmem:[%s3969_s1 + $0xd8] sm:$0xff]  }
  0x4a   : > { %3054 = vmatpush3.bf16.msra.mxu0 %v3271_v28  ;;  %2960 = vmatmul.mubr.bf16.vlgmr.msra.gmra.mrb[0].mxu1 %v2469_v40  ;;  %v2631_v22 = vcombine.low %v1428_v50, %v1432_v6  ;;  %v2483_v28 = vrot.slane %v714_v60, 9  ;;  %v716_v40 = vld [vmem:[%s3427_s20 + $0x28] sm:$0xe]  ;;  %v1778_v58 = vshll.u32 %v2676_v53, 16  ;;  %v1791_v50 = vrot.slane %v1789_v3, 4 }
  0x4b   : > { %3063 = vmatprep.subr.bf16.mxu0 %v3274_v41  ;;  %2968 = vmatpush3.bf16.msra.mxu1 %v3273_v35  ;;  %v3283_v35 = vld [vmem:[%s3969_s1 + $0x1a0] sm:$0xff]   ;;  %v2485_v30 = vrot.slane %v716_v40, 9  ;;  %v1794_v6 = vrot.slane %v1792_v4, 5 }
  0x4c   : > { %2969 = vmatprep.subr.bf16.mxu1 %v3276_v43  ;;  %2963 = vmatprep.mubr.bf16.mxu1 %v2470_v51  ;;  %v753_v12 = vsel %vm3646_vm5, %v2483_v28, %v752_v54  ;;  %v717_v51 = vld [vmem:[%s3427_s20 + $0x30] sm:$0xe]  ;;  %v1780_v16 = vrot.slane %v1778_v58, 5  ;;  %v1786_v54 = vrot.slane %v1784_v59, 5 }
  0x4d   : > { %3056 = vmatmul.mubr.bf16.vlgmr.msra.gmra.mrb[0].mxu0 %v2629_v47  ;;  %v2505_v21 = vcombine.low %v749_v11, %v753_v12  ;;  %v768_v47 = vrot.slane %v3603_v61, 5  ;;  %v2486_v63 = vrot.slane %v717_v51, 9  ;;  %v3789_v61 = vld [vmem:[%s3427_s20 + $0x1c] sm:$0x1]  ;;  %v3308_v11 = vld [vmem:[%s3427_s20 + $0x40] ss:$8 sps:$4 sm:$0xff]  }
  0x4e   : > { %3064 = vmatpush3.bf16.msra.mxu0 %v3274_v41  ;;  %3059 = vmatprep.mubr.bf16.mxu0 %v2630_v27  ;;  %v760_v41 = vrot.slane %v3554_v2, 5  ;;  %v757_v2 = vsel %vm3646_vm5, %v2484_v42, %v756_v36  ;;  %v1798_v5 = vshll.u32 %v3789_v61, 16  ;;  %v2684_v12 = vld [vmem:[%s3427_s20 + $0x30] sm:$0xf]  ;;  %v1820_v36 = vshll.u32 %v2682_v25, 16 }
  0x4f   : > { %2970 = vmatpush3.bf16.msra.mxu1 %v3276_v43  ;;  %3065 = vmatprep.subr.bf16.mxu0 %v3277_v62  ;;  %v3288_v43 = vld [vmem:[%s3969_s1 + $0x1b0] sm:$0xff]   ;;  %v765_v34 = vsel %vm3646_vm5, %v2486_v63, %v764_v29  ;;  %v1831_v40 = vshrl.u32 %v2684_v12, 16  ;;  %v3834_v51 = vld [vmem:[%s3427_s20 + $0x24] sm:$0x1] }
  0x50   : > { %2971 = vmatprep.subr.bf16.mxu1 %v3278_v44  ;;  %v761_v55 = vsel %vm3646_vm5, %v2485_v30, %v760_v41  ;;  %v1800_v19 = vrot.slane %v1798_v5, 5  ;;  %v1834_v41 = vshll.u32 %v2684_v12, 16  ;;  %v1822_v29 = vrot.slane %v1820_v36, 5  ;;  %v2690_v5 = vld [vmem:[%s3427_s20 + $0x48] sm:$0xf]  ;;  %v3311_v12 = vld [vmem:[%s3969_s1 + $0x1f8] sm:$0xff]  }
  0x51   : > { %v2506_v13 = vcombine.low %v757_v2, %v761_v55  ;;  %v3837_v2 = vld [vmem:[%s3427_s20 + $0x2c] sm:$0x1]  ;;  %v1812_v58 = vshll.u32 %v3834_v51, 16 }
  0x52   : > { %2964 = vmatmul.mubr.bf16.gmra.mrb[4].mxu1 %v2471_v26  ;;  %3066 = vmatpush3.bf16.msra.mxu0 %v3277_v62  ;;  %v3294_v62 = vld [vmem:[%s3969_s1 + $0x1c0] sm:$0xff]   ;;  %v1775_v26 = vshrl.u32 %v2676_v53, 16  ;;  %v1836_v63 = vrot.slane %v1834_v41, 5  ;;  %v1826_v59 = vshll.u32 %v3837_v2, 16 }
  0x53   : > { %2972 = vmatpush3.bf16.msra.mxu1 %v3278_v44  ;;  %3067 = vmatprep.subr.bf16.mxu0 %v3279_v10  ;;  %v718_v44 = vld [vmem:[%s3427_s20 + $0x38] sm:$0xe]  ;;  %v2688_v53 = vld [vmem:[%s3427_s20 + $0x40] sm:$0xf] }
  0x54   : > { %2973 = vmatprep.subr.bf16.mxu1 %v3280_v46  ;;  %2983 = vmatprep.mubr.bf16.mxu1 %v2504_v1  ;;  %v2487_v48 = vrot.slane %v718_v44, 9  ;;  %v1777_v27 = vrot.slane %v1775_v26, 4  ;;  %v2680_v1 = vld [vmem:[%s3427_s20 + $0x20] sm:$0xf]  ;;  %v3307_v26 = vld [vmem:[%s3969_s1 + $0xf0] sm:$0xff]  }
  0x55   : > { %3060 = vmatmul.mubr.bf16.gmra.mrb[4].mxu0 %v2631_v22 }
  0x56   : > { %3068 = vmatpush3.bf16.msra.mxu0 %v3279_v10  ;;  %3079 = vmatprep.mubr.bf16.mxu0 %v3293_v32  ;;  %v769_v17 = vsel %vm3646_vm5, %v2487_v48, %v768_v47  ;;  %v1781_v10 = vor.u32 %v1780_v16, %v1777_v27  ;;  %v3840_v47 = vld [vmem:[%s3427_s20 + $0x34] sm:$0x1]  ;;  %v1862_v27 = vshll.u32 %v2688_v53, 16 }
  0x57   : > { %2974 = vmatpush3.bf16.msra.mxu1 %v3280_v46  ;;  %3069 = vmatprep.subr.bf16.mxu0 %v3281_v20  ;;  %v3298_v46 = vld [vmem:[%s3969_s1 + $0xd0] sm:$0xff]   ;;  %v2507_v14 = vcombine.low %v765_v34, %v769_v17  ;;  %v1840_v3 = vshll.u32 %v3840_v47, 16  ;;  %v1859_v17 = vshrl.u32 %v2688_v53, 16  ;;  %v2721_v53 = vld [vmem:[%s3427_s20 + $0x18] sm:$0xe] }
  0x58   : > { %2975 = vmatprep.subr.bf16.mxu1 %v3282_v18  ;;  %v1782_v22 = vrot.slane %v1781_v10, 4 }
  0x5a   : > { %3070 = vmatpush3.bf16.msra.mxu0 %v3281_v20  ;;  %v3312_v20 = vld [vmem:[%s3427_s20 + $0x8] ss:$8 sps:$4 sm:$0xff]   ;;  %v1787_v28 = vsel %vm3472_vm2, %v1782_v22, %v1786_v54 }
  0x5b   : > { %2976 = vmatpush3.bf16.msra.mxu1 %v3282_v18  ;;  %3071 = vmatprep.subr.bf16.mxu0 %v3283_v35  ;;  %v1795_v18 = vor.u32 %v1794_v6, %v1791_v50  ;;  %v1873_v50 = vshrl.u32 %v2690_v5, 16  ;;  %v1876_v6 = vshll.u32 %v2690_v5, 16  ;;  %v2729_v5 = vrot.slane %v2721_v53, 9 }
  0x5c   : > { %2977 = vmatprep.subr.bf16.mxu1 %v3284_v33 }
  0x5d   : > { %v1796_v60 = vrot.slane %v1795_v18, 4  ;;  %v1828_v18 = vrot.slane %v1826_v59, 5  ;;  %v3317_v59 = vld [vmem:[%s3427_s20 + $0x38] ss:$8 sps:$4 sm:$0xff]  }
  0x5e   : > { %3072 = vmatpush3.bf16.msra.mxu0 %v3283_v35  ;;  %v1803_v35 = vshrl.u32 %v2680_v1, 16 }
  0x5f   : > { %2978 = vmatpush3.bf16.msra.mxu1 %v3284_v33  ;;  %3073 = vmatprep.subr.bf16.mxu0 %v3285_v57  ;;  %v1801_v32 = vsel %vm3472_vm2, %v1796_v60, %v1800_v19  ;;  %v3302_v33 = vld [vmem:[%s3969_s1 + $0xe0] sm:$0xff]   ;;  %v3867_v60 = vld [vmem:[%s3427_s20 + $0x4c] sm:$0x1] }
  0x60   : > { %2979 = vmatprep.subr.bf16.mxu1 %v3287_v31  ;;  %v2708_v39 = vcombine.low %v1787_v28, %v1801_v32  ;;  %v1805_v55 = vrot.slane %v1803_v35, 4  ;;  %v1875_v28 = vrot.slane %v1873_v50, 4  ;;  %v1878_v32 = vrot.slane %v1876_v6, 5  ;;  %v3313_v35 = vld [vmem:[%s3427_s20 + $0x18] ss:$8 sps:$4 sm:$0xff]   ;;  %v3321_v6 = vld [vmem:[%s3969_s1 + $0x228] sm:$0xff]  }
  0x62   : > { %3074 = vmatpush3.bf16.msra.mxu0 %v3285_v57  ;;  %v1817_v57 = vshrl.u32 %v2682_v25, 16  ;;  %v1864_v25 = vrot.slane %v1862_v27, 5 }
  0x63   : > { %2980 = vmatpush3.bf16.msra.mxu1 %v3287_v31  ;;  %3075 = vmatprep.subr.bf16.mxu0 %v3288_v43  ;;  %v1806_v31 = vshll.u32 %v2680_v1, 16  ;;  %v1861_v1 = vrot.slane %v1859_v17, 4 }
  0x64   : > { %2981 = vmatprep.subr.bf16.mxu1 %v3290_v37 }
  0x65   : > { %v1808_v44 = vrot.slane %v1806_v31, 5 }
  0x66   : > { %3076 = vmatpush3.bf16.msra.mxu0 %v3288_v43  ;;  %v3303_v43 = vld [vmem:[%s3969_s1 + $0x1e0] sm:$0xff]  }
  0x67   : > { %2982 = vmatpush3.bf16.msra.mxu1 %v3290_v37  ;;  %3077 = vmatprep.subr.bf16.mxu0 %v3291_v45  ;;  %v3301_v37 = vld [vmem:[%s3969_s1 + $0x1d8] sm:$0xff]  }
  0x68   : > { %2991 = vmatprep.subr.bf16.mxu1 %v3292_v0 }
  0x6a   : > { %2984 = vmatmul.mubr.bf16.vlgmr.msra.gmra.mrb[0].mxu1 %v2505_v21  ;;  %3078 = vmatpush3.bf16.msra.mxu0 %v3291_v45  ;;  %v2686_v21 = vld [vmem:[%s3427_s20 + $0x38] sm:$0xf]  ;;  %v1819_v45 = vrot.slane %v1817_v57, 4 }
  0x6b   : > { %2992 = vmatpush3.bf16.msra.mxu1 %v3292_v0  ;;  %2987 = vmatprep.mubr.bf16.mxu1 %v2506_v13  ;;  %v1845_v42 = vshrl.u32 %v2686_v21, 16  ;;  %v1848_v30 = vshll.u32 %v2686_v21, 16  ;;  %v3304_v0 = vld [vmem:[%s3969_s1 + $0xe8] sm:$0xff]   ;;  %v1833_v13 = vrot.slane %v1831_v40, 4  ;;  %v2724_v21 = vld [vmem:[%s3427_s20 + $0x30] sm:$0xe] }
  0x6c   : > { %2993 = vmatprep.subr.bf16.mxu1 %v3296_v49  ;;  %3087 = vmatprep.subr.bf16.mxu0 %v3294_v62  ;;  %v1823_v34 = vor.u32 %v1822_v29, %v1819_v45 }
  0x6d   : > { %3080 = vmatmul.mubr.bf16.vlgmr.msra.gmra.mrb[0].mxu0 %v3295_v7  ;;  %v1847_v48 = vrot.slane %v1845_v42, 4  ;;  %v1809_v7 = vor.u32 %v1808_v44, %v1805_v55  ;;  %v1837_v16 = vor.u32 %v1836_v63, %v1833_v13  ;;  %v1865_v42 = vor.u32 %v1864_v25, %v1861_v1 }
  0x6e   : > { %3088 = vmatpush3.bf16.msra.mxu0 %v3294_v62  ;;  %3083 = vmatprep.mubr.bf16.mxu0 %v3306_v56  ;;  %v3843_v62 = vld [vmem:[%s3427_s20 + $0x3c] sm:$0x1]  ;;  %v3309_v56 = vld [vmem:[%s3969_s1 + $0x1f0] sm:$0xff]   ;;  %v1824_v54 = vrot.slane %v1823_v34, 4  ;;  %v2082_v55 = vrot.slane %v3840_v47, 5  ;;  %v2074_v25 = vrot.slane %v3834_v51, 5 }
  0x6f   : > { %2994 = vmatpush3.bf16.msra.mxu1 %v3296_v49  ;;  %3089 = vmatprep.subr.bf16.mxu0 %v3297_v15  ;;  %v1850_v49 = vrot.slane %v1848_v30, 5  ;;  %v1854_v4 = vshll.u32 %v3843_v62, 16  ;;  %v1810_v10 = vrot.slane %v1809_v7, 4  ;;  %v1838_v19 = vrot.slane %v1837_v16, 4  ;;  %v3319_v16 = vld [vmem:[%s3969_s1 + $0x218] sm:$0xff]  }
  0x70   : > { %2995 = vmatprep.subr.bf16.mxu1 %v3298_v46  ;;  %v1829_v57 = vsel %vm3472_vm2, %v1824_v54, %v1828_v18  ;;  %v1879_v30 = vor.u32 %v1878_v32, %v1875_v28  ;;  %v2086_v45 = vrot.slane %v3843_v62, 5  ;;  %v2070_v7 = vrot.slane %v3789_v61, 5 }
  0x71   : > { %v2094_v54 = vrot.slane %v3867_v60, 5  ;;  %v2078_v32 = vrot.slane %v3837_v2, 5 }
  0x72   : > { %2988 = vmatmul.mubr.bf16.gmra.mrb[4].mxu1 %v2507_v14  ;;  %3090 = vmatpush3.bf16.msra.mxu0 %v3297_v15  ;;  %v3310_v15 = vld [vmem:[%s3969_s1 + $0xf8] sm:$0xff]   ;;  %v1814_v14 = vrot.slane %v1812_v58, 5  ;;  %v3318_v58 = vld [vmem:[%s3969_s1 + $0x210] sm:$0xff]   ;;  %v2071_v61 = vsel %vm3646_vm5, %v2729_v5, %v2070_v7 }
  0x73   : > { %2996 = vmatpush3.bf16.msra.mxu1 %v3298_v46  ;;  %3007 = vmatprep.mubr.bf16.mxu1 %v3312_v20  ;;  %v1851_v46 = vor.u32 %v1850_v49, %v1847_v48  ;;  %v1842_v20 = vrot.slane %v1840_v3, 5  ;;  %v2720_v49 = vld [vmem:[%s3427_s20 + $0x10] sm:$0xe] }
  0x74   : > { %2997 = vmatprep.subr.bf16.mxu1 %v3300_v23  ;;  %3091 = vmatprep.subr.bf16.mxu0 %v3299_v9  ;;  %v1815_v31 = vsel %vm3472_vm2, %v1810_v10, %v1814_v14  ;;  %v2728_v3 = vrot.slane %v2720_v49, 9  ;;  %v2727_v10 = vld [vmem:[%s3427_s20 + $0x48] sm:$0xe] }
  0x75   : > { %3084 = vmatmul.mubr.bf16.gmra.mrb[4].mxu0 %v3308_v11  ;;  %v1852_v22 = vrot.slane %v1851_v46, 4  ;;  %v3314_v11 = vld [vmem:[%s3969_s1 + $0x200] sm:$0xff]   ;;  %v1843_v40 = vsel %vm3472_vm2, %v1838_v19, %v1842_v20  ;;  %v2709_v29 = vcombine.low %v1815_v31, %v1829_v57  ;;  %v2735_v19 = vrot.slane %v2727_v10, 9  ;;  %v3323_v20 = vld [vmem:[%s3969_s1 + $0x238] sm:$0xff]  }
  0x76   : > { %3092 = vmatpush3.bf16.msra.mxu0 %v3299_v9  ;;  %3103 = vmatprep.mubr.bf16.mxu0 %v2708_v39  ;;  %v1856_v9 = vrot.slane %v1854_v4, 5  ;;  %v3316_v39 = vld [vmem:[%s3427_s20 + $0x28] ss:$8 sps:$4 sm:$0xff]   ;;  %v2066_v4 = vrot.slane %v3785_v24, 5 }
  0x77   : > { %2998 = vmatpush3.bf16.msra.mxu1 %v3300_v23  ;;  %3093 = vmatprep.subr.bf16.mxu0 %v3301_v37  ;;  %v3864_v23 = vld [vmem:[%s3427_s20 + $0x44] sm:$0x1] }
  0x78   : > { %2999 = vmatprep.subr.bf16.mxu1 %v3302_v33  ;;  %v1868_v36 = vshll.u32 %v3864_v23, 16  ;;  %v1857_v41 = vsel %vm3472_vm2, %v1852_v22, %v1856_v9  ;;  %v2067_v24 = vsel %vm3646_vm5, %v2728_v3, %v2066_v4  ;;  %v2090_v14 = vrot.slane %v3864_v23, 5  ;;  %v2722_v22 = vld [vmem:[%s3427_s20 + $0x20] sm:$0xe]  ;;  %v2723_v9 = vld [vmem:[%s3427_s20 + $0x28] sm:$0xe] }
  0x79   : > { %v2710_v13 = vcombine.low %v1843_v40, %v1857_v41  ;;  %v2752_v50 = vcombine.low %v2067_v24, %v2071_v61  ;;  %v2095_v23 = vsel %vm3646_vm5, %v2735_v19, %v2094_v54  ;;  %v2731_v28 = vrot.slane %v2723_v9, 9 }
  0x7a   : > { %3094 = vmatpush3.bf16.msra.mxu0 %v3301_v37  ;;  %v1882_v37 = vshll.u32 %v3867_v60, 16  ;;  %v1870_v63 = vrot.slane %v1868_v36, 5  ;;  %v2730_v60 = vrot.slane %v2722_v22, 9 }
  0x7b   : > { %3000 = vmatpush3.bf16.msra.mxu1 %v3302_v33  ;;  %3095 = vmatprep.subr.bf16.mxu0 %v3303_v43  ;;  %v2725_v33 = vld [vmem:[%s3427_s20 + $0x38] sm:$0xe] }
  0x7c   : > { %3001 = vmatprep.subr.bf16.mxu1 %v3304_v0  ;;  %v2733_v44 = vrot.slane %v2725_v33, 9  ;;  %v1884_v48 = vrot.slane %v1882_v37, 5 }
  0x7e   : > { %3096 = vmatpush3.bf16.msra.mxu0 %v3303_v43  ;;  %v3315_v43 = vld [vmem:[%s3969_s1 + $0x208] sm:$0xff]   ;;  %v2087_v62 = vsel %vm3646_vm5, %v2733_v44, %v2086_v45  ;;  %v2764_v44 = vld [vmem:[%s3970_s2] ss:$0 sm:$0xff] }
  0x7f   : > { %3002 = vmatpush3.bf16.msra.mxu1 %v3304_v0  ;;  %3097 = vmatprep.subr.bf16.mxu0 %v3305_v52  ;;  %v2732_v0 = vrot.slane %v2724_v21, 9  ;;  %v2079_v21 = vsel %vm3646_vm5, %v2731_v28, %v2078_v32 }
  0x80   : > { %3003 = vmatprep.subr.bf16.mxu1 %v3307_v26 }
  0x81   : > { %v2083_v47 = vsel %vm3646_vm5, %v2732_v0, %v2082_v55 }
  0x82   : > { %3098 = vmatpush3.bf16.msra.mxu0 %v3305_v52  ;;  %v1866_v52 = vrot.slane %v1865_v42, 4  ;;  %v2754_v34 = vcombine.low %v2083_v47, %v2087_v62 }
  0x83   : > { %3004 = vmatpush3.bf16.msra.mxu1 %v3307_v26  ;;  %3099 = vmatprep.subr.bf16.mxu0 %v3309_v56  ;;  %v1880_v26 = vrot.slane %v1879_v30, 4 }
  0x84   : > { %3005 = vmatprep.subr.bf16.mxu1 %v3310_v15  ;;  %v1871_v17 = vsel %vm3472_vm2, %v1866_v52, %v1870_v63 }
  0x85   : > { %v1885_v27 = vsel %vm3472_vm2, %v1880_v26, %v1884_v48 }
  0x86   : > { %3100 = vmatpush3.bf16.msra.mxu0 %v3309_v56  ;;  %v2711_v46 = vcombine.low %v1871_v17, %v1885_v27  ;;  %v2726_v56 = vld [vmem:[%s3427_s20 + $0x40] sm:$0xe]  ;;  %s2767_s20 = sshll.u32 %s3982_s15, 5 }
  0x87   : > { %3006 = vmatpush3.bf16.msra.mxu1 %v3310_v15  ;;  %3101 = vmatprep.subr.bf16.mxu0 %v3311_v12  ;;  %v3322_v15 = vld [vmem:[%s3969_s1 + $0x230] sm:$0xff]   ;;  %v2734_v18 = vrot.slane %v2726_v56, 9  ;;  %s271_s21 = scalar_lea.vmem %s3971_s3, %s2767_s20  ;;  %s279_s26 = scalar_lea.vmem %s3972_s4, %s2767_s20 }
  0x88   : > { %3135 = vmatprep.subr.bf16.mxu1 %v3314_v11  ;;  %v2806_v48 = vld [vmem:[%s271_s21 + $0x10] sm:$0xff]   ;;  %v2805_v52 = vld [vmem:[%s271_s21 + $0x8] sm:$0xff]   ;;  %v2770_v62 = vld [vmem:[%s271_s21] sm:$0xff]  }
  0x89   : > { %v2091_v1 = vsel %vm3646_vm5, %v2734_v18, %v2090_v14  ;;  %v2779_v5 = vunpack.c.l.bf16 %v2806_v48  ;;  %v2775_v24 = vunpack.c.l.bf16 %v2805_v52  ;;  %v2776_v56 = vunpack.c.h.bf16 %v2805_v52 }
  0x8a   : > { %3008 = vmatmul.mubr.bf16.vlgmr.msra.gmra.mrb[0].mxu1 %v3313_v35  ;;  %3102 = vmatpush3.bf16.msra.mxu0 %v3311_v12  ;;  %v2075_v12 = vsel %vm3646_vm5, %v2730_v60, %v2074_v25 }
  0x8b   : > { %3143 = vmatpush3.bf16.msra.mxu1 %v3314_v11  ;;  %3011 = vmatprep.mubr.bf16.mxu1 %v3316_v39  ;;  %v2753_v33 = vcombine.low %v2075_v12, %v2079_v21 }
  0x8c   : > { %3136 = vmatprep.subr.bf16.mxu1 %v3315_v43  ;;  %3111 = vmatprep.subr.bf16.mxu0 %v3314_v11 }
  0x8d   : > { %3104 = vmatmul.mubr.bf16.vlgmr.msra.gmra.mrb[0].mxu0 %v2709_v29  ;;  %v2807_v29 = vld [vmem:[%s271_s21 + $0x18] sm:$0xff]  }
  0x8e   : > { %3112 = vmatpush3.bf16.msra.mxu0 %v3314_v11  ;;  %3107 = vmatprep.mubr.bf16.mxu0 %v2710_v13  ;;  %v2755_v11 = vcombine.low %v2091_v1, %v2095_v23  ;;  %v2783_v47 = vunpack.c.l.bf16 %v2807_v29  ;;  %v2772_v23 = vunpack.c.h.bf16 %v2770_v62 }
  0x8f   : > { %3144 = vmatpush3.bf16.msra.mxu1 %v3315_v43  ;;  %3113 = vmatprep.subr.bf16.mxu0 %v3315_v43 }
  0x90   : > { %3137 = vmatprep.subr.bf16.mxu1 %v3318_v58 }
  0x92   : > { %3012 = vmatmul.mubr.bf16.gmra.mrb[4].mxu1 %v3317_v59  ;;  %3114 = vmatpush3.bf16.msra.mxu0 %v3315_v43  ;;  %v2784_v59 = vunpack.c.h.bf16 %v2807_v29 }
  0x93   : > { %3145 = vmatpush3.bf16.msra.mxu1 %v3318_v58  ;;  %3131 = vmatprep.mubr.bf16.mxu1 %v2754_v34  ;;  %v2780_v34 = vunpack.c.h.bf16 %v2806_v48 }
  0x94   : > { %3138 = vmatprep.subr.bf16.mxu1 %v3319_v16  ;;  %3115 = vmatprep.subr.bf16.mxu0 %v3318_v58 }
  0x95   : > { %3108 = vmatmul.mubr.bf16.gmra.mrb[4].mxu0 %v2711_v46  ;;  %v2771_v46 = vunpack.c.l.bf16 %v2770_v62 }
  0x96   : > { %3116 = vmatpush3.bf16.msra.mxu0 %v3318_v58  ;;  %3127 = vmatprep.mubr.bf16.mxu0 %v2752_v50 }
  0x97   : > { %3146 = vmatpush3.bf16.msra.mxu1 %v3319_v16  ;;  %3117 = vmatprep.subr.bf16.mxu0 %v3319_v16 }
  0x98   : > { %3139 = vmatprep.subr.bf16.mxu1 %v3320_v38 }
  0x9a   : > { %3118 = vmatpush3.bf16.msra.mxu0 %v3319_v16 }
  0x9b   : > { %3147 = vmatpush3.bf16.msra.mxu1 %v3320_v38  ;;  %3119 = vmatprep.subr.bf16.mxu0 %v3320_v38 }
  0x9c   : > { %3140 = vmatprep.subr.bf16.mxu1 %v3321_v6 }
  0x9e   : > { %3120 = vmatpush3.bf16.msra.mxu0 %v3320_v38 }
  0x9f   : > { %3148 = vmatpush3.bf16.msra.mxu1 %v3321_v6  ;;  %3121 = vmatprep.subr.bf16.mxu0 %v3321_v6 }
  0xa0   : > { %3141 = vmatprep.subr.bf16.mxu1 %v3322_v15 }
  0xa2   : > { %3122 = vmatpush3.bf16.msra.mxu0 %v3321_v6 }
  0xa3   : > { %3149 = vmatpush3.bf16.msra.mxu1 %v3322_v15  ;;  %3123 = vmatprep.subr.bf16.mxu0 %v3322_v15 }
  0xa4   : > { %3142 = vmatprep.subr.bf16.mxu1 %v3323_v20 }
  0xa6   : > { %3124 = vmatpush3.bf16.msra.mxu0 %v3322_v15 }
  0xa7   : > { %3150 = vmatpush3.bf16.msra.mxu1 %v3323_v20  ;;  %3125 = vmatprep.subr.bf16.mxu0 %v3323_v20 }
  0xaa   : > { %3132 = vmatmul.mubr.bf16.vlgmr.msra.gmra.mrb[8].mxu1 %v2755_v11  ;;  %3126 = vmatpush3.bf16.msra.mxu0 %v3323_v20 }
  0xad   : > { %3128 = vmatmul.mubr.bf16.vlgmr.msra.gmra.mrb[0].mxu0 %v2753_v33 }
 0x15d   : > { %v3009_v35 = vpop.f32.mrb[0].mxu1 }
 0x15e   : > { %v1056_v51 = vpop.f32.mrb[1].mxu1 }
 0x15f   : > { %v3010_v2 = vpop.f32.mrb[2].mxu1 }
 0x160   : > { %v1059_v31 = vpop.f32.mrb[3].mxu1 }
 0x165   : > { %v3013_v57 = vpop.f32.mrb[4].mxu1 }
 0x166   : > { %v1072_v36 = vpop.f32.mrb[5].mxu1 }
 0x167   : > { %v3014_v37 = vpop.f32.mrb[6].mxu1 }
 0x168   : > { %v1075_v39 = vpop.f32.mrb[7].mxu1  ;;  %v3109_v40 = vpop.f32.mrb[4].mxu0 }
 0x169   : > { %v3155_v41 = vadd.f32 %v3109_v40, %v3013_v57  ;;  %v2017_v42 = vpop.f32.mrb[5].mxu0 }
 0x16a   : > { %v3157_v8 = vadd.f32 %v2017_v42, %v1072_v36  ;;  %v3110_v30 = vpop.f32.mrb[6].mxu0 }
 0x16b   : > { %v3159_v43 = vadd.f32 %v3110_v30, %v3014_v37  ;;  %v2020_v0 = vpop.f32.mrb[7].mxu0 }
 0x16c   : > { %v3161_v55 = vadd.f32 %v2020_v0, %v1075_v39 }
 0x17d   : > { %v3133_v45 = vpop.f32.mrb[8].mxu1 }
 0x17e   : > { %v3156_v13 = vadd.f32 %v3155_v41, %v3133_v45  ;;  %v2227_v63 = vpop.f32.mrb[9].mxu1 }
 0x17f   : > { %v3158_v49 = vadd.f32 %v3157_v8, %v2227_v63  ;;  %v3134_v53 = vpop.f32.mrb[10].mxu1 }
 0x180   : > { %v2263_v26 = vadd.f32 %v3156_v13, %v2764_v44  ;;  %v3160_v58 = vadd.f32 %v3159_v43, %v3134_v53  ;;  %v2230_v3 = vpop.f32.mrb[11].mxu1  ;;  %v3129_v17 = vpop.f32.mrb[0].mxu0 }
 0x181   : > { %v2261_v4 = vadd.f32 %v3158_v49, %v2764_v44  ;;  %v3162_v7 = vadd.f32 %v3161_v55, %v2230_v3  ;;  %v3151_v16 = vadd.f32 %v3129_v17, %v3009_v35  ;;  %v2211_v61 = vpop.f32.mrb[1].mxu0 }
 0x182   : > { %v2264_v27 = vadd.f32 %v3160_v58, %v2764_v44  ;;  %v2287_v50 = vadd.f32 %v2783_v47, %v2263_v26  ;;  %v3152_v6 = vadd.f32 %v2211_v61, %v1056_v51  ;;  %v3130_v15 = vpop.f32.mrb[2].mxu0 }
 0x183   : > { %v2262_v38 = vadd.f32 %v3162_v7, %v2764_v44  ;;  %v2259_v14 = vadd.f32 %v3151_v16, %v2764_v44  ;;  %v2285_v54 = vadd.f32 %v2779_v5, %v2261_v4  ;;  %v3153_v18 = vadd.f32 %v3130_v15, %v3010_v2  ;;  %v2214_v19 = vpop.f32.mrb[3].mxu0 }
 0x184   : > { %v2288_v10 = vadd.f32 %v2784_v59, %v2264_v27  ;;  %v2257_v22 = vadd.f32 %v3152_v6, %v2764_v44  ;;  %v3154_v1 = vadd.f32 %v2214_v19, %v1059_v31 }
 0x185   : > { %v2286_v20 = vadd.f32 %v2780_v34, %v2262_v38  ;;  %v2260_v60 = vadd.f32 %v3153_v18, %v2764_v44  ;;  %v2283_v32 = vadd.f32 %v2775_v24, %v2259_v14 }
 0x186   : > { %v2803_v9 = vpack.c.bf16 %v2288_v10, %v2287_v50  ;;  %v2258_v28 = vadd.f32 %v3154_v1, %v2764_v44  ;;  %v2281_v12 = vadd.f32 %v2771_v46, %v2257_v22 }
 0x187   : > { %v2798_v25 = vpack.c.bf16 %v2286_v20, %v2285_v54  ;;  %v2284_v11 = vadd.f32 %v2776_v56, %v2260_v60 }
 0x188   : > { %2810 = vst [vmem:[%s279_s26 + $0x18] sm:$0xff] %v2803_v9   ;;  %v2282_v21 = vadd.f32 %v2772_v23, %v2258_v28 }
 0x189   : > { %2809 = vst [vmem:[%s279_s26 + $0x10] sm:$0xff] %v2798_v25   ;;  %v2793_v33 = vpack.c.bf16 %v2284_v11, %v2283_v32 }
 0x18a   : > { %v2788_v35 = vpack.c.bf16 %v2282_v21, %v2281_v12 }
 0x18b   : > { %2808 = vst [vmem:[%s279_s26 + $0x8] sm:$0xff] %v2793_v33  }
 0x18c   : > { %2789 = vst [vmem:[%s279_s26] sm:$0xff] %v2788_v35  }
 0x18d PF: > { %s14_s17 = sadd.s32 1, %s3346_s17   ;;  %s3977_s15 = smov %s3342_s16 }
 0x18e   : > { %p11_p5 = scmp.ge.s32.totalorder %s14_s17, 4   ;;  %s3978_s16 = smov %s3980_s18 }
 0x190   :  { %13 = sbr.rel (!%p11_p5) target bundleno = 2 (0x2), region = 85 }

// kernel: _lambda_.8
= control target key start
LH: loop header
LB: loop body
LE: loop exit
PB: predicated region body
PF: predicated region fallthrough
CT: control target
= control target key end

     0   :  { %s3254_s12 = smov 0   ;;  %s3256_s13 = smov 0   ;;  %s3842_s0 = inlined_call_operand.vmem [shape: bf16[2,10,10,128], index: 0, kind: input, shape index: {}]   ;;  %s3843_s1 = inlined_call_operand.vmem [shape: bf16[9,128,128], index: 1, kind: input, shape index: {}]   ;;  %s3844_s2 = inlined_call_operand.vmem [shape: f32[1,128], index: 2, kind: input, shape index: {}]   ;;  %s3845_s3 = inlined_call_operand.vmem [shape: bf16[2,8,8,128], index: 3, kind: output, shape index: {}]  }
   0x1   :  { %s3258_s14 = smov 0  }
   0x2 LB: > { %s25_s15 = sadd.s32 1, %s3228_s13  ;;  %p2342_p0 = scmp.ge.s32.totalorder %s3232_s14, 1  ;;  %s3232_s14 = sphi %s3258_s14, %s13_s14   ;;  %s3228_s13 = sphi %s3256_s13, %s3851_s13   ;;  %s3224_s12 = sphi %s3254_s12, %s3850_s12  }
   0x3   : > { %p27_p1 = scmp.ge.s32.totalorder %s25_s15, 2  ;;  %p168_p2 = scmp.lt.s32.totalorder %s3232_s14, 3 }
   0x5   : > { %s3853_s15 = smov (%p27_p1, %s25_s15), 0  ;;  %p169_p3 = pnand %p2342_p0, %p168_p2 }
   0x6   : > { %v3126_v0 = vld [vmem:[%s3843_s1 + $0x40] sm:$0xff] (!%p169_p3)   ;;  %p202_p4 = scmp.lt.s32.totalorder (!%p169_p3), %s3224_s12, 1  ;;  %v3128_v2 = vld [vmem:[%s3843_s1 + $0x48] sm:$0xff] (!%p169_p3)   ;;  %v3130_v4 = vld [vmem:[%s3843_s1 + $0x50] sm:$0xff] (!%p169_p3)   ;;  %vm255_vm0 = vsmask.f32 (!%p169_p3), 3328 }
   0x7   : > { %172 = sbr.rel (%p169_p3) target bundleno = 397 (0x18d), region = 32  ;;  %v3127_v1 = vld [vmem:[%s3843_s1 + $0x100] sm:$0xff] (!%p169_p3)   ;;  %2805 = vmatprep.subr.bf16.mxu1 (!%p169_p3), %v3126_v0  ;;  %v3129_v3 = vld [vmem:[%s3843_s1 + $0x108] sm:$0xff] (!%p169_p3)   ;;  %v3131_v5 = vld [vmem:[%s3843_s1 + $0x110] sm:$0xff] (!%p169_p3)   ;;  %vm256_vm1 = vsmask.f32 (!%p169_p3), 7440 }
   0x8   : > { %2901 = vmatprep.subr.bf16.mxu0 (!%p169_p3), %v3127_v1  ;;  %2806 = vmatpush3.bf16.msra.mxu1 (!%p169_p3), %v3126_v0  ;;  %v3132_v6 = vld [vmem:[%s3843_s1 + $0x58] sm:$0xff] (!%p169_p3)   ;;  %v3134_v8 = vld [vmem:[%s3843_s1 + $0x60] sm:$0xff] (!%p169_p3)   ;;  %v3136_v10 = vld [vmem:[%s3843_s1 + $0x68] sm:$0xff] (!%p169_p3)   ;;  %vm677_vm3 = vcmask (!%p169_p3), 1042432   ;;  %vm678_vm4 = vcmask (!%p169_p3), 1046532  }
   0x9   : > { %2902 = vmatpush3.bf16.msra.mxu0 (!%p169_p3), %v3127_v1  ;;  %2807 = vmatprep.subr.bf16.mxu1 (!%p169_p3), %v3128_v2  ;;  %v3133_v7 = vld [vmem:[%s3843_s1 + $0x118] sm:$0xff] (!%p169_p3)   ;;  %v3135_v9 = vld [vmem:[%s3843_s1 + $0x120] sm:$0xff] (!%p169_p3)   ;;  %v3137_v14 = vld [vmem:[%s3843_s1 + $0x128] sm:$0xff] (!%p169_p3)  }
   0xa   : > { %2903 = vmatprep.subr.bf16.mxu0 (!%p169_p3), %v3129_v3  ;;  %v3138_v22 = vld [vmem:[%s3843_s1 + $0x70] sm:$0xff] (!%p169_p3)   ;;  %v3140_v37 = vld [vmem:[%s3843_s1 + $0x78] sm:$0xff] (!%p169_p3)   ;;  %vm3353_vm2 = vmor (!%p169_p3), %vm255_vm0, %vm256_vm1 }
   0xb   : > { %v3139_v23 = vld [vmem:[%s3843_s1 + $0x130] sm:$0xff] (!%p169_p3)   ;;  %v3141_v47 = vld [vmem:[%s3843_s1 + $0x138] sm:$0xff] (!%p169_p3)   ;;  %v3142_v63 = vld [vmem:[%s3843_s1] sm:$0xff] (!%p169_p3)  }
   0xc   : > { %2808 = vmatpush3.bf16.msra.mxu1 (!%p169_p3), %v3128_v2  ;;  %v3385_v1 = vld [vmem:[%s3843_s1 + $0x140] sm:$0xff] (!%p169_p3)   ;;  %vm3527_vm5 = vmor (!%p169_p3), %vm677_vm3, %vm678_vm4 }
   0xd   : > { %2904 = vmatpush3.bf16.msra.mxu0 (!%p169_p3), %v3129_v3  ;;  %2809 = vmatprep.subr.bf16.mxu1 (!%p169_p3), %v3130_v4  ;;  %v3206_v38 = vld [vmem:[%s3843_s1 + $0x220] sm:$0xff] (!%p169_p3)  }
   0xe   : > { %s3855_s12 = smov (!%p202_p4, %s3224_s12), 1  ;;  %2905 = vmatprep.subr.bf16.mxu0 %v3131_v5 }
   0xf   : > { %s3101_s5 = smul.u32 80, %s3855_s12 }
  0x10   : > { %2810 = vmatpush3.bf16.msra.mxu1 %v3130_v4 }
  0x11   : > { %2906 = vmatpush3.bf16.msra.mxu0 %v3131_v5  ;;  %2811 = vmatprep.subr.bf16.mxu1 %v3132_v6  ;;  %s3308_s16 = scalar_lea.vmem %s3842_s0, %s3101_s5  ;;  %s2673_s5 = sshll.u32 %s3855_s12, 5 }
  0x12   : > { %2907 = vmatprep.subr.bf16.mxu0 %v3133_v7  ;;  %v3314_v11 = vld [vmem:[%s3308_s16] sm:$0xf]  ;;  %v3317_v12 = vld [vmem:[%s3308_s16 + $0x8] sm:$0xf]  ;;  %v3320_v13 = vld [vmem:[%s3308_s16 + $0x4] sm:$0x1]  ;;  %s221_s8 = scalar_lea.vmem %s3845_s3, %s2673_s5 }
  0x13   : > { %v3326_v15 = vld [vmem:[%s3308_s16 + $0xc] sm:$0x1]  ;;  %v259_v16 = vshrl.u32 %v3314_v11, 16  ;;  %v262_v17 = vshll.u32 %v3314_v11, 16  ;;  %v268_v18 = vshll.u32 %v3320_v13, 16  ;;  %v273_v19 = vshrl.u32 %v3317_v12, 16 }
  0x14   : > { %2812 = vmatpush3.bf16.msra.mxu1 %v3132_v6  ;;  %v276_v20 = vshll.u32 %v3317_v12, 16  ;;  %v282_v21 = vshll.u32 %v3326_v15, 16  ;;  %v2458_v30 = vld [vmem:[%s3308_s16 + $0x8] sm:$0xf]  ;;  %v3342_v31 = vld [vmem:[%s3308_s16 + $0xc] sm:$0x1] }
  0x15   : > { %2908 = vmatpush3.bf16.msra.mxu0 %v3133_v7  ;;  %2813 = vmatprep.subr.bf16.mxu1 %v3134_v8  ;;  %v261_v24 = vrot.slane %v259_v16, 4  ;;  %v264_v25 = vrot.slane %v262_v17, 5  ;;  %v270_v26 = vrot.slane %v268_v18, 5  ;;  %v275_v27 = vrot.slane %v273_v19, 4  ;;  %v2460_v33 = vld [vmem:[%s3308_s16 + $0x10] sm:$0xf] }
  0x16   : > { %2909 = vmatprep.subr.bf16.mxu0 %v3135_v9  ;;  %v278_v28 = vrot.slane %v276_v20, 5  ;;  %v284_v29 = vrot.slane %v282_v21, 5  ;;  %v3346_v34 = vld [vmem:[%s3308_s16 + $0x14] sm:$0x1]  ;;  %v1054_v35 = vshrl.u32 %v2458_v30, 16  ;;  %v1057_v36 = vshll.u32 %v2458_v30, 16 }
  0x17   : > { %v265_v32 = vor.u32 %v264_v25, %v261_v24  ;;  %v1063_v40 = vshll.u32 %v3342_v31, 16  ;;  %v1068_v41 = vshrl.u32 %v2460_v33, 16  ;;  %v1071_v42 = vshll.u32 %v2460_v33, 16  ;;  %v3363_v51 = vld [vmem:[%s3308_s16 + $0x10] sm:$0xf] }
  0x18   : > { %2814 = vmatpush3.bf16.msra.mxu1 %v3134_v8  ;;  %v279_v39 = vor.u32 %v278_v28, %v275_v27  ;;  %v1056_v44 = vrot.slane %v1054_v35, 4  ;;  %v1059_v45 = vrot.slane %v1057_v36, 5  ;;  %v1077_v46 = vshll.u32 %v3346_v34, 16  ;;  %v3368_v55 = vld [vmem:[%s3308_s16 + $0x18] sm:$0xf] }
  0x19   : > { %2910 = vmatpush3.bf16.msra.mxu0 %v3135_v9  ;;  %2815 = vmatprep.subr.bf16.mxu1 %v3136_v10  ;;  %v266_v43 = vrot.slane %v265_v32, 4  ;;  %v1070_v49 = vrot.slane %v1068_v41, 4  ;;  %v1073_v50 = vrot.slane %v1071_v42, 5  ;;  %v1065_v54 = vrot.slane %v1063_v40, 5  ;;  %v3371_v56 = vld [vmem:[%s3308_s16 + $0x14] sm:$0x1] }
  0x1a   : > { %2911 = vmatprep.subr.bf16.mxu0 %v3137_v14  ;;  %v280_v48 = vrot.slane %v279_v39, 4  ;;  %v1060_v53 = vor.u32 %v1059_v45, %v1056_v44  ;;  %v1079_v59 = vrot.slane %v1077_v46, 5  ;;  %v3376_v60 = vld [vmem:[%s3308_s16 + $0x1c] sm:$0x1]  ;;  %v287_v61 = vshrl.u32 %v3363_v51, 16 }
  0x1b   : > { %v271_v52 = vsel %vm3353_vm2, %v266_v43, %v270_v26  ;;  %v1074_v58 = vor.u32 %v1073_v50, %v1070_v49  ;;  %v290_v2 = vshll.u32 %v3363_v51, 16  ;;  %v296_v3 = vshll.u32 %v3371_v56, 16  ;;  %v2462_v8 = vld [vmem:[%s3308_s16 + $0x18] sm:$0xf]  ;;  %v3396_v16 = vld [vmem:[%s3308_s16 + $0x1c] sm:$0x1] }
  0x1c   : > { %2816 = vmatpush3.bf16.msra.mxu1 %v3136_v10  ;;  %v285_v57 = vsel %vm3353_vm2, %v280_v48, %v284_v29  ;;  %v1061_v0 = vrot.slane %v1060_v53, 4  ;;  %v289_v5 = vrot.slane %v287_v61, 4  ;;  %v301_v6 = vshrl.u32 %v3368_v55, 16  ;;  %v2464_v17 = vld [vmem:[%s3308_s16 + $0x20] sm:$0xf]  ;;  %v3144_v43 = vld [vmem:[%s3843_s1 + $0x8] sm:$0xff]  }
  0x1d   : > { %2912 = vmatpush3.bf16.msra.mxu0 %v3137_v14  ;;  %2817 = vmatprep.subr.bf16.mxu1 %v3138_v22  ;;  %v2362_v62 = vcombine.low %v271_v52, %v285_v57  ;;  %v1075_v4 = vrot.slane %v1074_v58, 4  ;;  %v304_v7 = vshll.u32 %v3368_v55, 16  ;;  %v292_v10 = vrot.slane %v290_v2, 5  ;;  %v3402_v21 = vld [vmem:[%s3308_s16 + $0x24] sm:$0x1] }
  0x1e   : > { %2913 = vmatprep.subr.bf16.mxu0 %v3139_v23  ;;  %v1066_v9 = vsel %vm3353_vm2, %v1061_v0, %v1065_v54  ;;  %v310_v14 = vshll.u32 %v3376_v60, 16  ;;  %v303_v19 = vrot.slane %v301_v6, 4  ;;  %v298_v24 = vrot.slane %v296_v3, 5  ;;  %v3145_v54 = vld [vmem:[%s3843_s1 + $0x148] sm:$0xff]   ;;  %v3432_v0 = vld [vmem:[%s3308_s16 + $0x24] sm:$0x1] }
  0x1f   : > { %2821 = vmatprep.mubr.bf16.mxu1 %v2362_v62  ;;  %v1080_v18 = vsel %vm3353_vm2, %v1075_v4, %v1079_v59  ;;  %v306_v20 = vrot.slane %v304_v7, 5  ;;  %v1082_v27 = vshrl.u32 %v2462_v8, 16  ;;  %v1085_v28 = vshll.u32 %v2462_v8, 16  ;;  %v3146_v59 = vld [vmem:[%s3843_s1 + $0x10] sm:$0xff]   ;;  %v3426_v62 = vld [vmem:[%s3308_s16 + $0x20] sm:$0xf] }
  0x20   : > { %2818 = vmatpush3.bf16.msra.mxu1 %v3138_v22  ;;  %v2490_v22 = vcombine.low %v1066_v9, %v1080_v18  ;;  %v312_v25 = vrot.slane %v310_v14, 5  ;;  %v1091_v29 = vshll.u32 %v3396_v16, 16  ;;  %v1096_v32 = vshrl.u32 %v2464_v17, 16  ;;  %v3435_v2 = vld [vmem:[%s3308_s16 + $0x2c] sm:$0x1]  ;;  %v3147_v9 = vld [vmem:[%s3843_s1 + $0x150] sm:$0xff]  }
  0x21   : > { %2914 = vmatpush3.bf16.msra.mxu0 %v3139_v23  ;;  %2819 = vmatprep.subr.bf16.mxu1 %v3140_v37  ;;  %v293_v23 = vor.u32 %v292_v10, %v289_v5  ;;  %v307_v26 = vor.u32 %v306_v20, %v303_v19  ;;  %v1099_v33 = vshll.u32 %v2464_v17, 16  ;;  %v1105_v35 = vshll.u32 %v3402_v21, 16  ;;  %v3148_v10 = vld [vmem:[%s3843_s1 + $0x18] sm:$0xff]  }
  0x22   : > { %2915 = vmatprep.subr.bf16.mxu0 %v3141_v47  ;;  %2917 = vmatprep.mubr.bf16.mxu0 %v2490_v22  ;;  %v1087_v39 = vrot.slane %v1085_v28, 5  ;;  %v1098_v41 = vrot.slane %v1096_v32, 4  ;;  %v1093_v46 = vrot.slane %v1091_v29, 5  ;;  %v1345_v57 = vrot.slane %v3342_v31, 5  ;;  %v3149_v29 = vld [vmem:[%s3843_s1 + $0x158] sm:$0xff]  }
  0x23   : > { %v294_v30 = vrot.slane %v293_v23, 4  ;;  %v308_v36 = vrot.slane %v307_v26, 4  ;;  %v1101_v42 = vrot.slane %v1099_v33, 5  ;;  %v315_v3 = vshrl.u32 %v3426_v62, 16  ;;  %v2466_v23 = vld [vmem:[%s3308_s16 + $0x28] sm:$0xf] }
  0x24   : > { %2820 = vmatpush3.bf16.msra.mxu1 %v3140_v37  ;;  %v1084_v37 = vrot.slane %v1082_v27, 4  ;;  %v318_v4 = vshll.u32 %v3426_v62, 16  ;;  %v324_v5 = vshll.u32 %v3432_v0, 16  ;;  %v338_v8 = vshll.u32 %v3435_v2, 16  ;;  %v3456_v26 = vld [vmem:[%s3308_s16 + $0x34] sm:$0x1] }
  0x25   : > { %2916 = vmatpush3.bf16.msra.mxu0 %v3141_v47  ;;  %2829 = vmatprep.subr.bf16.mxu1 %v3142_v63  ;;  %v299_v40 = vsel %vm3353_vm2, %v294_v30, %v298_v24  ;;  %v313_v44 = vsel %vm3353_vm2, %v308_v36, %v312_v25  ;;  %v1107_v47 = vrot.slane %v1105_v35, 5  ;;  %v1102_v49 = vor.u32 %v1101_v42, %v1098_v41  ;;  %v3452_v24 = vld [vmem:[%s3308_s16 + $0x2c] sm:$0x1]  ;;  %v2468_v25 = vld [vmem:[%s3308_s16 + $0x30] sm:$0xf]  ;;  %v3150_v30 = vld [vmem:[%s3843_s1 + $0x20] sm:$0xff]  }
  0x26   : > { %2925 = vmatprep.subr.bf16.mxu0 %v3385_v1  ;;  %v1088_v45 = vor.u32 %v1087_v39, %v1084_v37  ;;  %v2363_v48 = vcombine.low %v299_v40, %v313_v44  ;;  %v317_v14 = vrot.slane %v315_v3, 4  ;;  %v320_v17 = vrot.slane %v318_v4, 5 }
  0x27   : > { %v1103_v52 = vrot.slane %v1102_v49, 4  ;;  %v326_v18 = vrot.slane %v324_v5, 5  ;;  %v340_v22 = vrot.slane %v338_v8, 5  ;;  %v1110_v27 = vshrl.u32 %v2466_v23, 16  ;;  %v2470_v5 = vld [vmem:[%s3308_s16 + $0x38] sm:$0xf] }
  0x28   : > { %v1089_v50 = vrot.slane %v1088_v45, 4  ;;  %2822 = vmatmul.mubr.bf16.vlgmr.msra.gmra.mrb[0].mxu1 %v2363_v48  ;;  %v1113_v28 = vshll.u32 %v2466_v23, 16  ;;  %v1119_v33 = vshll.u32 %v3452_v24, 16  ;;  %v1124_v35 = vshrl.u32 %v2468_v25, 16 }
  0x29   : > { %2830 = vmatpush3.bf16.msra.mxu1 %v3142_v63  ;;  %v1108_v58 = vsel %vm3353_vm2, %v1103_v52, %v1107_v47  ;;  %v3429_v63 = vld [vmem:[%s3308_s16 + $0x28] sm:$0xf]  ;;  %v1127_v36 = vshll.u32 %v2468_v25, 16  ;;  %v1112_v39 = vrot.slane %v1110_v27, 4  ;;  %v1133_v41 = vshll.u32 %v3456_v26, 16 }
  0x2a   : > { %v1094_v53 = vsel %vm3353_vm2, %v1089_v50, %v1093_v46  ;;  %2831 = vmatprep.subr.bf16.mxu1 %v3144_v43  ;;  %v329_v6 = vshrl.u32 %v3429_v63, 16  ;;  %v332_v7 = vshll.u32 %v3429_v63, 16  ;;  %v1115_v40 = vrot.slane %v1113_v28, 5  ;;  %v3467_v46 = vld [vmem:[%s3308_s16 + $0x30] sm:$0xf] }
  0x2b   : > { %v2491_v61 = vcombine.low %v1094_v53, %v1108_v58  ;;  %v1126_v44 = vrot.slane %v1124_v35, 4  ;;  %v1129_v45 = vrot.slane %v1127_v36, 5  ;;  %v1135_v49 = vrot.slane %v1133_v41, 5  ;;  %v3472_v50 = vld [vmem:[%s3308_s16 + $0x38] sm:$0xf] }
  0x2c   : > { %v331_v19 = vrot.slane %v329_v6, 4  ;;  %v334_v20 = vrot.slane %v332_v7, 5  ;;  %v1116_v48 = vor.u32 %v1115_v40, %v1112_v39  ;;  %v3475_v52 = vld [vmem:[%s3308_s16 + $0x34] sm:$0x1]  ;;  %v343_v53 = vshrl.u32 %v3467_v46, 16  ;;  %v3152_v6 = vld [vmem:[%s3843_s1 + $0x28] sm:$0xff]  }
  0x2d   : > { %2918 = vmatmul.mubr.bf16.vlgmr.msra.gmra.mrb[0].mxu0 %v2491_v61  ;;  %2832 = vmatpush3.bf16.msra.mxu1 %v3144_v43  ;;  %v1121_v43 = vrot.slane %v1119_v33, 5  ;;  %v3484_v61 = vld [vmem:[%s3308_s16 + $0x3c] sm:$0x1]  ;;  %v346_v3 = vshll.u32 %v3467_v46, 16  ;;  %v352_v4 = vshll.u32 %v3475_v52, 16  ;;  %v1138_v28 = vshrl.u32 %v2470_v5, 16 }
  0x2e   : > { %2926 = vmatpush3.bf16.msra.mxu0 %v3385_v1  ;;  %2833 = vmatprep.subr.bf16.mxu1 %v3146_v59  ;;  %v321_v1 = vor.u32 %v320_v17, %v317_v14  ;;  %v335_v32 = vor.u32 %v334_v20, %v331_v19  ;;  %v1117_v8 = vrot.slane %v1116_v48, 4  ;;  %v357_v14 = vshrl.u32 %v3472_v50, 16  ;;  %v3494_v17 = vld [vmem:[%s3308_s16 + $0x3c] sm:$0x1]  ;;  %v3502_v27 = vld [vmem:[%s3308_s16 + $0x44] sm:$0x1] }
  0x2f   : > { %2927 = vmatprep.subr.bf16.mxu0 %v3145_v54  ;;  %v348_v19 = vrot.slane %v346_v3, 5  ;;  %v354_v20 = vrot.slane %v352_v4, 5  ;;  %v366_v25 = vshll.u32 %v3484_v61, 16  ;;  %v1141_v36 = vshll.u32 %v2470_v5, 16 }
  0x30   : > { %v322_v37 = vrot.slane %v321_v1, 4  ;;  %v336_v42 = vrot.slane %v335_v32, 4  ;;  %v1122_v23 = vsel %vm3353_vm2, %v1117_v8, %v1121_v43  ;;  %v359_v1 = vrot.slane %v357_v14, 4 }
  0x31   : > { %2834 = vmatpush3.bf16.msra.mxu1 %v3146_v59  ;;  %v1130_v59 = vor.u32 %v1129_v45, %v1126_v44  ;;  %v368_v40 = vrot.slane %v366_v25, 5  ;;  %v1140_v41 = vrot.slane %v1138_v28, 4  ;;  %v1143_v45 = vrot.slane %v1141_v36, 5  ;;  %v2504_v25 = vld [vmem:[%s3308_s16 + $0x18] sm:$0xe] }
  0x32   : > { %2928 = vmatpush3.bf16.msra.mxu0 %v3145_v54  ;;  %2835 = vmatprep.subr.bf16.mxu1 %v3148_v10  ;;  %v327_v47 = vsel %vm3353_vm2, %v322_v37, %v326_v18  ;;  %v3151_v54 = vld [vmem:[%s3843_s1 + $0x160] sm:$0xff]   ;;  %v341_v58 = vsel %vm3353_vm2, %v336_v42, %v340_v22  ;;  %v360_v22 = vshll.u32 %v3472_v50, 16  ;;  %v3154_v37 = vld [vmem:[%s3843_s1 + $0x30] sm:$0xff]   ;;  %v1147_v42 = vshll.u32 %v3494_v17, 16  ;;  %v3157_v28 = vld [vmem:[%s3843_s1 + $0x178] sm:$0xff]  }
  0x33   : > { %2929 = vmatprep.subr.bf16.mxu0 %v3147_v9  ;;  %v2364_v7 = vcombine.low %v327_v47, %v341_v58  ;;  %v1131_v18 = vrot.slane %v1130_v59, 4  ;;  %v1349_v47 = vrot.slane %v3346_v34, 5  ;;  %v1353_v48 = vrot.slane %v3396_v16, 5  ;;  %v3155_v58 = vld [vmem:[%s3843_s1 + $0x170] sm:$0xff]  }
  0x34   : > { %v362_v35 = vrot.slane %v360_v22, 5  ;;  %v1144_v4 = vor.u32 %v1143_v45, %v1140_v41  ;;  %v1149_v34 = vrot.slane %v1147_v42, 5  ;;  %v1357_v22 = vrot.slane %v3402_v21, 5  ;;  %v3160_v41 = vld [vmem:[%s3843_s1 + $0x180] sm:$0xff]  }
  0x35   : > { %2836 = vmatpush3.bf16.msra.mxu1 %v3148_v10  ;;  %v345_v10 = vrot.slane %v343_v53, 4  ;;  %2825 = vmatprep.mubr.bf16.mxu1 %v2364_v7  ;;  %v1136_v32 = vsel %vm3353_vm2, %v1131_v18, %v1135_v49  ;;  %v1161_v53 = vshll.u32 %v3502_v27, 16  ;;  %v2502_v7 = vld [vmem:[%s3308_s16 + $0x8] sm:$0xe]  ;;  %v2512_v36 = vrot.slane %v2504_v25, 9 }
  0x36   : > { %2930 = vmatpush3.bf16.msra.mxu0 %v3147_v9  ;;  %2837 = vmatprep.subr.bf16.mxu1 %v3150_v30  ;;  %v2472_v9 = vld [vmem:[%s3308_s16 + $0x40] sm:$0xf]  ;;  %v2492_v39 = vcombine.low %v1122_v23, %v1136_v32  ;;  %v363_v44 = vor.u32 %v362_v35, %v359_v1  ;;  %v2510_v14 = vrot.slane %v2502_v7, 9  ;;  %v1145_v18 = vrot.slane %v1144_v4, 4 }
  0x37   : > { %2931 = vmatprep.subr.bf16.mxu0 %v3149_v29  ;;  %v349_v33 = vor.u32 %v348_v19, %v345_v10  ;;  %v1155_v49 = vshll.u32 %v2472_v9, 16  ;;  %v2503_v10 = vld [vmem:[%s3308_s16 + $0x10] sm:$0xe]  ;;  %v2374_v19 = vcombine.low %v3314_v11, %v3317_v12  ;;  %v1163_v1 = vrot.slane %v1161_v53, 5  ;;  %v2505_v12 = vld [vmem:[%s3308_s16 + $0x20] sm:$0xe] }
  0x38   : > { %2921 = vmatprep.mubr.bf16.mxu0 %v2492_v39  ;;  %v364_v3 = vrot.slane %v363_v44, 4  ;;  %v1346_v32 = vsel %vm3527_vm5, %v2510_v14, %v1345_v57  ;;  %v1150_v21 = vsel %vm3353_vm2, %v1145_v18, %v1149_v34  ;;  %v3159_v35 = vld [vmem:[%s3843_s1 + $0x80] sm:$0xff]   ;;  %v1354_v42 = vsel %vm3527_vm5, %v2512_v36, %v1353_v48  ;;  %v3164_v44 = vld [vmem:[%s3843_s1 + $0x90] sm:$0xff]  }
  0x39   : > { %2838 = vmatpush3.bf16.msra.mxu1 %v3150_v30  ;;  %v3153_v30 = vld [vmem:[%s3843_s1 + $0x168] sm:$0xff]   ;;  %v350_v43 = vrot.slane %v349_v33, 4  ;;  %v1157_v16 = vrot.slane %v1155_v49, 5  ;;  %v1361_v45 = vrot.slane %v3452_v24, 5  ;;  %v1369_v53 = vrot.slane %v3494_v17, 5  ;;  %v3168_v18 = vld [vmem:[%s3843_s1 + $0xa0] sm:$0xff]  }
  0x3a   : > { %2932 = vmatpush3.bf16.msra.mxu0 %v3149_v29  ;;  %2839 = vmatprep.subr.bf16.mxu1 %v3152_v6  ;;  %v1152_v29 = vshrl.u32 %v2472_v9, 16  ;;  %v1373_v24 = vrot.slane %v3502_v27, 5  ;;  %v686_v34 = vrot.slane %v3326_v15, 5  ;;  %v690_v17 = vrot.slane %v3371_v56, 5  ;;  %v654_v15 = vld [vmem:[%s3308_s16 + $0x8] sm:$0xe] }
  0x3b   : > { %2933 = vmatprep.subr.bf16.mxu0 %v3151_v54  ;;  %v355_v59 = vsel %vm3353_vm2, %v350_v43, %v354_v20  ;;  %v2511_v20 = vrot.slane %v2503_v10, 9  ;;  %v3162_v43 = vld [vmem:[%s3843_s1 + $0x88] sm:$0xff]   ;;  %v3165_v10 = vld [vmem:[%s3843_s1 + $0x190] sm:$0xff]   ;;  %v2387_v14 = vrot.slane %v654_v15, 9  ;;  %v698_v36 = vrot.slane %v3432_v0, 5  ;;  %v3178_v0 = vld [vmem:[%s3843_s1 + $0xc0] sm:$0xff]  }
  0x3c   : > { %v1154_v5 = vrot.slane %v1152_v29, 4  ;;  %v1365_v29 = vrot.slane %v3456_v26, 5  ;;  %v2377_v26 = vcombine.low %v3467_v46, %v3472_v50  ;;  %v3166_v46 = vld [vmem:[%s3843_s1 + $0x98] sm:$0xff]   ;;  %v3183_v15 = vld [vmem:[%s3843_s1 + $0x1c8] sm:$0xff]  }
  0x3d   : > { %2840 = vmatpush3.bf16.msra.mxu1 %v3152_v6  ;;  %v3156_v6 = vld [vmem:[%s3843_s1 + $0x38] sm:$0xff]   ;;  %v1350_v11 = vsel %vm3527_vm5, %v2511_v20, %v1349_v47 }
  0x3e   : > { %2934 = vmatpush3.bf16.msra.mxu0 %v3151_v54  ;;  %2841 = vmatprep.subr.bf16.mxu1 %v3154_v37  ;;  %v369_v54 = vsel %vm3353_vm2, %v364_v3, %v368_v40  ;;  %v1158_v23 = vor.u32 %v1157_v16, %v1154_v5  ;;  %v2534_v57 = vcombine.low %v1346_v32, %v1350_v11  ;;  %v653_v16 = vld [vmem:[%s3308_s16] sm:$0xe]  ;;  %v3167_v20 = vld [vmem:[%s3843_s1 + $0x198] sm:$0xff]  }
  0x3f   : > { %2935 = vmatprep.subr.bf16.mxu0 %v3153_v30  ;;  %v2365_v9 = vcombine.low %v355_v59, %v369_v54  ;;  %v2375_v40 = vcombine.low %v3363_v51, %v3368_v55  ;;  %v2376_v51 = vcombine.low %v3426_v62, %v3429_v63  ;;  %v682_v55 = vrot.slane %v3320_v13, 5  ;;  %v3163_v62 = vld [vmem:[%s3843_s1 + $0x188] sm:$0xff]   ;;  %v2507_v63 = vld [vmem:[%s3308_s16 + $0x30] sm:$0xe]  ;;  %v2509_v59 = vld [vmem:[%s3308_s16 + $0x40] sm:$0xe] }
  0x40   : > { %v1159_v33 = vrot.slane %v1158_v23, 4  ;;  %v2506_v13 = vld [vmem:[%s3308_s16 + $0x28] sm:$0xe]  ;;  %v2515_v49 = vrot.slane %v2507_v63, 9  ;;  %v2517_v7 = vrot.slane %v2509_v59, 9  ;;  %v2386_v56 = vrot.slane %v653_v16, 9 }
  0x41   : > { %2842 = vmatpush3.bf16.msra.mxu1 %v3154_v37  ;;  %v2513_v37 = vrot.slane %v2505_v12, 9  ;;  %v2514_v48 = vrot.slane %v2506_v13, 9  ;;  %v694_v54 = vrot.slane %v3376_v60, 5  ;;  %v655_v23 = vld [vmem:[%s3308_s16 + $0x10] sm:$0xe] }
  0x42   : > { %2936 = vmatpush3.bf16.msra.mxu0 %v3153_v30  ;;  %2826 = vmatmul.mubr.bf16.gmra.mrb[4].mxu1 %v2365_v9  ;;  %v1164_v31 = vsel %vm3353_vm2, %v1159_v33, %v1163_v1  ;;  %v1366_v4 = vsel %vm3527_vm5, %v2515_v49, %v1365_v29  ;;  %v687_v9 = vsel %vm3527_vm5, %v2387_v14, %v686_v34  ;;  %v656_v60 = vld [vmem:[%s3308_s16 + $0x18] sm:$0xe]  ;;  %v2388_v25 = vrot.slane %v655_v23, 9  ;;  %v3170_v33 = vld [vmem:[%s3843_s1 + $0xa8] sm:$0xff]  }
  0x43   : > { %2937 = vmatprep.subr.bf16.mxu0 %v3155_v58  ;;  %2843 = vmatprep.subr.bf16.mxu1 %v3156_v6  ;;  %v2493_v39 = vcombine.low %v1150_v21, %v1164_v31  ;;  %v1358_v30 = vsel %vm3527_vm5, %v2513_v37, %v1357_v22  ;;  %v1362_v3 = vsel %vm3527_vm5, %v2514_v48, %v1361_v45  ;;  %v3179_v32 = vld [vmem:[%s3308_s16 + $0x10] ss:$8 sps:$4 sm:$0xff]   ;;  %v706_v29 = vrot.slane %v3475_v52, 5  ;;  %v3182_v49 = vld [vmem:[%s3843_s1 + $0xc8] sm:$0xff]  }
  0x44   : > { %2845 = vmatprep.mubr.bf16.mxu1 %v2374_v19  ;;  %v2535_v47 = vcombine.low %v1354_v42, %v1358_v30  ;;  %v2536_v27 = vcombine.low %v1362_v3, %v1366_v4  ;;  %v683_v19 = vsel %vm3527_vm5, %v2386_v56, %v682_v55  ;;  %v691_v11 = vsel %vm3527_vm5, %v2388_v25, %v690_v17  ;;  %v3173_v31 = vld [vmem:[%s3843_s1 + $0xb0] sm:$0xff]   ;;  %v3176_v37 = vld [vmem:[%s3843_s1 + $0xb8] sm:$0xff]   ;;  %v2588_v25 = vld [vmem:[%s3308_s16 + $0x28] sm:$0xf] }
  0x45   : > { %2844 = vmatpush3.bf16.msra.mxu1 %v3156_v6  ;;  %2922 = vmatmul.mubr.bf16.gmra.mrb[4].mxu0 %v2493_v39  ;;  %v1374_v6 = vsel %vm3527_vm5, %v2517_v7, %v1373_v24  ;;  %v2410_v1 = vcombine.low %v683_v19, %v687_v9  ;;  %v657_v39 = vld [vmem:[%s3308_s16 + $0x20] sm:$0xe]  ;;  %v3177_v45 = vld [vmem:[%s3843_s1 + $0x1b8] sm:$0xff]   ;;  %v3666_v24 = vld [vmem:[%s3308_s16 + $0x14] sm:$0x1] }
  0x46   : > { %2938 = vmatpush3.bf16.msra.mxu0 %v3155_v58  ;;  %2853 = vmatprep.subr.bf16.mxu1 %v3159_v35  ;;  %v2508_v58 = vld [vmem:[%s3308_s16 + $0x38] sm:$0xe]  ;;  %v2390_v42 = vrot.slane %v657_v39, 9  ;;  %v1726_v59 = vshll.u32 %v3666_v24, 16  ;;  %v3181_v7 = vld [vmem:[%s3308_s16 + $0x20] ss:$8 sps:$4 sm:$0xff]  }
  0x47   : > { %2939 = vmatprep.subr.bf16.mxu0 %v3157_v28  ;;  %2941 = vmatprep.mubr.bf16.mxu0 %v2534_v57  ;;  %v2516_v5 = vrot.slane %v2508_v58, 9  ;;  %v3171_v57 = vld [vmem:[%s3843_s1 + $0x1a8] sm:$0xff]   ;;  %v2584_v52 = vld [vmem:[%s3308_s16 + $0x18] sm:$0xf]  ;;  %v3185_v9 = vld [vmem:[%s3843_s1 + $0x1d0] sm:$0xff]  }
  0x48   : > { %v1731_v3 = vshrl.u32 %v2584_v52, 16  ;;  %v1734_v4 = vshll.u32 %v2584_v52, 16  ;;  %v3192_v56 = vld [vmem:[%s3308_s16 + $0x30] ss:$8 sps:$4 sm:$0xff]   ;;  %v3191_v52 = vld [vmem:[%s3843_s1 + $0x1e8] sm:$0xff]  }
  0x49   : > { %v1370_v50 = vsel %vm3527_vm5, %v2516_v5, %v1369_v53  ;;  %v2582_v53 = vld [vmem:[%s3308_s16 + $0x10] sm:$0xf]  ;;  %v3186_v23 = vld [vmem:[%s3843_s1 + $0xd8] sm:$0xff]  }
  0x4a   : > { %2940 = vmatpush3.bf16.msra.mxu0 %v3157_v28  ;;  %2846 = vmatmul.mubr.bf16.vlgmr.msra.gmra.mrb[0].mxu1 %v2375_v40  ;;  %v2537_v22 = vcombine.low %v1370_v50, %v1374_v6  ;;  %v2389_v28 = vrot.slane %v656_v60, 9  ;;  %v658_v40 = vld [vmem:[%s3308_s16 + $0x28] sm:$0xe]  ;;  %v1720_v58 = vshll.u32 %v2582_v53, 16  ;;  %v1733_v50 = vrot.slane %v1731_v3, 4 }
  0x4b   : > { %2949 = vmatprep.subr.bf16.mxu0 %v3160_v41  ;;  %2854 = vmatpush3.bf16.msra.mxu1 %v3159_v35  ;;  %v3169_v35 = vld [vmem:[%s3843_s1 + $0x1a0] sm:$0xff]   ;;  %v2391_v30 = vrot.slane %v658_v40, 9  ;;  %v1736_v6 = vrot.slane %v1734_v4, 5 }
  0x4c   : > { %2855 = vmatprep.subr.bf16.mxu1 %v3162_v43  ;;  %2849 = vmatprep.mubr.bf16.mxu1 %v2376_v51  ;;  %v695_v12 = vsel %vm3527_vm5, %v2389_v28, %v694_v54  ;;  %v659_v51 = vld [vmem:[%s3308_s16 + $0x30] sm:$0xe]  ;;  %v1722_v16 = vrot.slane %v1720_v58, 5  ;;  %v1728_v54 = vrot.slane %v1726_v59, 5 }
  0x4d   : > { %2942 = vmatmul.mubr.bf16.vlgmr.msra.gmra.mrb[0].mxu0 %v2535_v47  ;;  %v2411_v21 = vcombine.low %v691_v11, %v695_v12  ;;  %v710_v47 = vrot.slane %v3484_v61, 5  ;;  %v2392_v63 = vrot.slane %v659_v51, 9  ;;  %v3670_v61 = vld [vmem:[%s3308_s16 + $0x1c] sm:$0x1]  ;;  %v3194_v11 = vld [vmem:[%s3308_s16 + $0x40] ss:$8 sps:$4 sm:$0xff]  }
  0x4e   : > { %2950 = vmatpush3.bf16.msra.mxu0 %v3160_v41  ;;  %2945 = vmatprep.mubr.bf16.mxu0 %v2536_v27  ;;  %v702_v41 = vrot.slane %v3435_v2, 5  ;;  %v699_v2 = vsel %vm3527_vm5, %v2390_v42, %v698_v36  ;;  %v1740_v5 = vshll.u32 %v3670_v61, 16  ;;  %v2590_v12 = vld [vmem:[%s3308_s16 + $0x30] sm:$0xf]  ;;  %v1762_v36 = vshll.u32 %v2588_v25, 16 }
  0x4f   : > { %2856 = vmatpush3.bf16.msra.mxu1 %v3162_v43  ;;  %2951 = vmatprep.subr.bf16.mxu0 %v3163_v62  ;;  %v3174_v43 = vld [vmem:[%s3843_s1 + $0x1b0] sm:$0xff]   ;;  %v707_v34 = vsel %vm3527_vm5, %v2392_v63, %v706_v29  ;;  %v1773_v40 = vshrl.u32 %v2590_v12, 16  ;;  %v3715_v51 = vld [vmem:[%s3308_s16 + $0x24] sm:$0x1] }
  0x50   : > { %2857 = vmatprep.subr.bf16.mxu1 %v3164_v44  ;;  %v703_v55 = vsel %vm3527_vm5, %v2391_v30, %v702_v41  ;;  %v1742_v19 = vrot.slane %v1740_v5, 5  ;;  %v1776_v41 = vshll.u32 %v2590_v12, 16  ;;  %v1764_v29 = vrot.slane %v1762_v36, 5  ;;  %v2596_v5 = vld [vmem:[%s3308_s16 + $0x48] sm:$0xf]  ;;  %v3197_v12 = vld [vmem:[%s3843_s1 + $0x1f8] sm:$0xff]  }
  0x51   : > { %v2412_v13 = vcombine.low %v699_v2, %v703_v55  ;;  %v3718_v2 = vld [vmem:[%s3308_s16 + $0x2c] sm:$0x1]  ;;  %v1754_v58 = vshll.u32 %v3715_v51, 16 }
  0x52   : > { %2850 = vmatmul.mubr.bf16.gmra.mrb[4].mxu1 %v2377_v26  ;;  %2952 = vmatpush3.bf16.msra.mxu0 %v3163_v62  ;;  %v3180_v62 = vld [vmem:[%s3843_s1 + $0x1c0] sm:$0xff]   ;;  %v1717_v26 = vshrl.u32 %v2582_v53, 16  ;;  %v1778_v63 = vrot.slane %v1776_v41, 5  ;;  %v1768_v59 = vshll.u32 %v3718_v2, 16 }
  0x53   : > { %2858 = vmatpush3.bf16.msra.mxu1 %v3164_v44  ;;  %2953 = vmatprep.subr.bf16.mxu0 %v3165_v10  ;;  %v660_v44 = vld [vmem:[%s3308_s16 + $0x38] sm:$0xe]  ;;  %v2594_v53 = vld [vmem:[%s3308_s16 + $0x40] sm:$0xf] }
  0x54   : > { %2859 = vmatprep.subr.bf16.mxu1 %v3166_v46  ;;  %2869 = vmatprep.mubr.bf16.mxu1 %v2410_v1  ;;  %v2393_v48 = vrot.slane %v660_v44, 9  ;;  %v1719_v27 = vrot.slane %v1717_v26, 4  ;;  %v2586_v1 = vld [vmem:[%s3308_s16 + $0x20] sm:$0xf]  ;;  %v3193_v26 = vld [vmem:[%s3843_s1 + $0xf0] sm:$0xff]  }
  0x55   : > { %2946 = vmatmul.mubr.bf16.gmra.mrb[4].mxu0 %v2537_v22 }
  0x56   : > { %2954 = vmatpush3.bf16.msra.mxu0 %v3165_v10  ;;  %2965 = vmatprep.mubr.bf16.mxu0 %v3179_v32  ;;  %v711_v17 = vsel %vm3527_vm5, %v2393_v48, %v710_v47  ;;  %v1723_v10 = vor.u32 %v1722_v16, %v1719_v27  ;;  %v3721_v47 = vld [vmem:[%s3308_s16 + $0x34] sm:$0x1]  ;;  %v1804_v27 = vshll.u32 %v2594_v53, 16 }
  0x57   : > { %2860 = vmatpush3.bf16.msra.mxu1 %v3166_v46  ;;  %2955 = vmatprep.subr.bf16.mxu0 %v3167_v20  ;;  %v3184_v46 = vld [vmem:[%s3843_s1 + $0xd0] sm:$0xff]   ;;  %v2413_v14 = vcombine.low %v707_v34, %v711_v17  ;;  %v1782_v3 = vshll.u32 %v3721_v47, 16  ;;  %v1801_v17 = vshrl.u32 %v2594_v53, 16  ;;  %v2627_v53 = vld [vmem:[%s3308_s16 + $0x18] sm:$0xe] }
  0x58   : > { %2861 = vmatprep.subr.bf16.mxu1 %v3168_v18  ;;  %v1724_v22 = vrot.slane %v1723_v10, 4 }
  0x5a   : > { %2956 = vmatpush3.bf16.msra.mxu0 %v3167_v20  ;;  %v3198_v20 = vld [vmem:[%s3308_s16 + $0x8] ss:$8 sps:$4 sm:$0xff]   ;;  %v1729_v28 = vsel %vm3353_vm2, %v1724_v22, %v1728_v54 }
  0x5b   : > { %2862 = vmatpush3.bf16.msra.mxu1 %v3168_v18  ;;  %2957 = vmatprep.subr.bf16.mxu0 %v3169_v35  ;;  %v1737_v18 = vor.u32 %v1736_v6, %v1733_v50  ;;  %v1815_v50 = vshrl.u32 %v2596_v5, 16  ;;  %v1818_v6 = vshll.u32 %v2596_v5, 16  ;;  %v2635_v5 = vrot.slane %v2627_v53, 9 }
  0x5c   : > { %2863 = vmatprep.subr.bf16.mxu1 %v3170_v33 }
  0x5d   : > { %v1738_v60 = vrot.slane %v1737_v18, 4  ;;  %v1770_v18 = vrot.slane %v1768_v59, 5  ;;  %v3203_v59 = vld [vmem:[%s3308_s16 + $0x38] ss:$8 sps:$4 sm:$0xff]  }
  0x5e   : > { %2958 = vmatpush3.bf16.msra.mxu0 %v3169_v35  ;;  %v1745_v35 = vshrl.u32 %v2586_v1, 16 }
  0x5f   : > { %2864 = vmatpush3.bf16.msra.mxu1 %v3170_v33  ;;  %2959 = vmatprep.subr.bf16.mxu0 %v3171_v57  ;;  %v1743_v32 = vsel %vm3353_vm2, %v1738_v60, %v1742_v19  ;;  %v3188_v33 = vld [vmem:[%s3843_s1 + $0xe0] sm:$0xff]   ;;  %v3748_v60 = vld [vmem:[%s3308_s16 + $0x4c] sm:$0x1] }
  0x60   : > { %2865 = vmatprep.subr.bf16.mxu1 %v3173_v31  ;;  %v2614_v39 = vcombine.low %v1729_v28, %v1743_v32  ;;  %v1747_v55 = vrot.slane %v1745_v35, 4  ;;  %v1817_v28 = vrot.slane %v1815_v50, 4  ;;  %v1820_v32 = vrot.slane %v1818_v6, 5  ;;  %v3199_v35 = vld [vmem:[%s3308_s16 + $0x18] ss:$8 sps:$4 sm:$0xff]   ;;  %v3207_v6 = vld [vmem:[%s3843_s1 + $0x228] sm:$0xff]  }
  0x62   : > { %2960 = vmatpush3.bf16.msra.mxu0 %v3171_v57  ;;  %v1759_v57 = vshrl.u32 %v2588_v25, 16  ;;  %v1806_v25 = vrot.slane %v1804_v27, 5 }
  0x63   : > { %2866 = vmatpush3.bf16.msra.mxu1 %v3173_v31  ;;  %2961 = vmatprep.subr.bf16.mxu0 %v3174_v43  ;;  %v1748_v31 = vshll.u32 %v2586_v1, 16  ;;  %v1803_v1 = vrot.slane %v1801_v17, 4 }
  0x64   : > { %2867 = vmatprep.subr.bf16.mxu1 %v3176_v37 }
  0x65   : > { %v1750_v44 = vrot.slane %v1748_v31, 5 }
  0x66   : > { %2962 = vmatpush3.bf16.msra.mxu0 %v3174_v43  ;;  %v3189_v43 = vld [vmem:[%s3843_s1 + $0x1e0] sm:$0xff]  }
  0x67   : > { %2868 = vmatpush3.bf16.msra.mxu1 %v3176_v37  ;;  %2963 = vmatprep.subr.bf16.mxu0 %v3177_v45  ;;  %v3187_v37 = vld [vmem:[%s3843_s1 + $0x1d8] sm:$0xff]  }
  0x68   : > { %2877 = vmatprep.subr.bf16.mxu1 %v3178_v0 }
  0x6a   : > { %2870 = vmatmul.mubr.bf16.vlgmr.msra.gmra.mrb[0].mxu1 %v2411_v21  ;;  %2964 = vmatpush3.bf16.msra.mxu0 %v3177_v45  ;;  %v2592_v21 = vld [vmem:[%s3308_s16 + $0x38] sm:$0xf]  ;;  %v1761_v45 = vrot.slane %v1759_v57, 4 }
  0x6b   : > { %2878 = vmatpush3.bf16.msra.mxu1 %v3178_v0  ;;  %2873 = vmatprep.mubr.bf16.mxu1 %v2412_v13  ;;  %v1787_v42 = vshrl.u32 %v2592_v21, 16  ;;  %v1790_v30 = vshll.u32 %v2592_v21, 16  ;;  %v3190_v0 = vld [vmem:[%s3843_s1 + $0xe8] sm:$0xff]   ;;  %v1775_v13 = vrot.slane %v1773_v40, 4  ;;  %v2630_v21 = vld [vmem:[%s3308_s16 + $0x30] sm:$0xe] }
  0x6c   : > { %2879 = vmatprep.subr.bf16.mxu1 %v3182_v49  ;;  %2973 = vmatprep.subr.bf16.mxu0 %v3180_v62  ;;  %v1765_v34 = vor.u32 %v1764_v29, %v1761_v45 }
  0x6d   : > { %2966 = vmatmul.mubr.bf16.vlgmr.msra.gmra.mrb[0].mxu0 %v3181_v7  ;;  %v1789_v48 = vrot.slane %v1787_v42, 4  ;;  %v1751_v7 = vor.u32 %v1750_v44, %v1747_v55  ;;  %v1779_v16 = vor.u32 %v1778_v63, %v1775_v13  ;;  %v1807_v42 = vor.u32 %v1806_v25, %v1803_v1 }
  0x6e   : > { %2974 = vmatpush3.bf16.msra.mxu0 %v3180_v62  ;;  %2969 = vmatprep.mubr.bf16.mxu0 %v3192_v56  ;;  %v3724_v62 = vld [vmem:[%s3308_s16 + $0x3c] sm:$0x1]  ;;  %v3195_v56 = vld [vmem:[%s3843_s1 + $0x1f0] sm:$0xff]   ;;  %v1766_v54 = vrot.slane %v1765_v34, 4  ;;  %v2024_v55 = vrot.slane %v3721_v47, 5  ;;  %v2016_v25 = vrot.slane %v3715_v51, 5 }
  0x6f   : > { %2880 = vmatpush3.bf16.msra.mxu1 %v3182_v49  ;;  %2975 = vmatprep.subr.bf16.mxu0 %v3183_v15  ;;  %v1792_v49 = vrot.slane %v1790_v30, 5  ;;  %v1796_v4 = vshll.u32 %v3724_v62, 16  ;;  %v1752_v10 = vrot.slane %v1751_v7, 4  ;;  %v1780_v19 = vrot.slane %v1779_v16, 4  ;;  %v3205_v16 = vld [vmem:[%s3843_s1 + $0x218] sm:$0xff]  }
  0x70   : > { %2881 = vmatprep.subr.bf16.mxu1 %v3184_v46  ;;  %v1771_v57 = vsel %vm3353_vm2, %v1766_v54, %v1770_v18  ;;  %v1821_v30 = vor.u32 %v1820_v32, %v1817_v28  ;;  %v2028_v45 = vrot.slane %v3724_v62, 5  ;;  %v2012_v7 = vrot.slane %v3670_v61, 5 }
  0x71   : > { %v2036_v54 = vrot.slane %v3748_v60, 5  ;;  %v2020_v32 = vrot.slane %v3718_v2, 5 }
  0x72   : > { %2874 = vmatmul.mubr.bf16.gmra.mrb[4].mxu1 %v2413_v14  ;;  %2976 = vmatpush3.bf16.msra.mxu0 %v3183_v15  ;;  %v3196_v15 = vld [vmem:[%s3843_s1 + $0xf8] sm:$0xff]   ;;  %v1756_v14 = vrot.slane %v1754_v58, 5  ;;  %v3204_v58 = vld [vmem:[%s3843_s1 + $0x210] sm:$0xff]   ;;  %v2013_v61 = vsel %vm3527_vm5, %v2635_v5, %v2012_v7 }
  0x73   : > { %2882 = vmatpush3.bf16.msra.mxu1 %v3184_v46  ;;  %2893 = vmatprep.mubr.bf16.mxu1 %v3198_v20  ;;  %v1793_v46 = vor.u32 %v1792_v49, %v1789_v48  ;;  %v1784_v20 = vrot.slane %v1782_v3, 5  ;;  %v2626_v49 = vld [vmem:[%s3308_s16 + $0x10] sm:$0xe] }
  0x74   : > { %2883 = vmatprep.subr.bf16.mxu1 %v3186_v23  ;;  %2977 = vmatprep.subr.bf16.mxu0 %v3185_v9  ;;  %v1757_v31 = vsel %vm3353_vm2, %v1752_v10, %v1756_v14  ;;  %v2634_v3 = vrot.slane %v2626_v49, 9  ;;  %v2633_v10 = vld [vmem:[%s3308_s16 + $0x48] sm:$0xe] }
  0x75   : > { %2970 = vmatmul.mubr.bf16.gmra.mrb[4].mxu0 %v3194_v11  ;;  %v1794_v22 = vrot.slane %v1793_v46, 4  ;;  %v3200_v11 = vld [vmem:[%s3843_s1 + $0x200] sm:$0xff]   ;;  %v1785_v40 = vsel %vm3353_vm2, %v1780_v19, %v1784_v20  ;;  %v2615_v29 = vcombine.low %v1757_v31, %v1771_v57  ;;  %v2641_v19 = vrot.slane %v2633_v10, 9  ;;  %v3209_v20 = vld [vmem:[%s3843_s1 + $0x238] sm:$0xff]  }
  0x76   : > { %2978 = vmatpush3.bf16.msra.mxu0 %v3185_v9  ;;  %2989 = vmatprep.mubr.bf16.mxu0 %v2614_v39  ;;  %v1798_v9 = vrot.slane %v1796_v4, 5  ;;  %v3202_v39 = vld [vmem:[%s3308_s16 + $0x28] ss:$8 sps:$4 sm:$0xff]   ;;  %v2008_v4 = vrot.slane %v3666_v24, 5 }
  0x77   : > { %2884 = vmatpush3.bf16.msra.mxu1 %v3186_v23  ;;  %2979 = vmatprep.subr.bf16.mxu0 %v3187_v37  ;;  %v3745_v23 = vld [vmem:[%s3308_s16 + $0x44] sm:$0x1] }
  0x78   : > { %2885 = vmatprep.subr.bf16.mxu1 %v3188_v33  ;;  %v1810_v36 = vshll.u32 %v3745_v23, 16  ;;  %v1799_v41 = vsel %vm3353_vm2, %v1794_v22, %v1798_v9  ;;  %v2009_v24 = vsel %vm3527_vm5, %v2634_v3, %v2008_v4  ;;  %v2032_v14 = vrot.slane %v3745_v23, 5  ;;  %v2628_v22 = vld [vmem:[%s3308_s16 + $0x20] sm:$0xe]  ;;  %v2629_v9 = vld [vmem:[%s3308_s16 + $0x28] sm:$0xe] }
  0x79   : > { %v2616_v13 = vcombine.low %v1785_v40, %v1799_v41  ;;  %v2658_v50 = vcombine.low %v2009_v24, %v2013_v61  ;;  %v2037_v23 = vsel %vm3527_vm5, %v2641_v19, %v2036_v54  ;;  %v2637_v28 = vrot.slane %v2629_v9, 9 }
  0x7a   : > { %2980 = vmatpush3.bf16.msra.mxu0 %v3187_v37  ;;  %v1824_v37 = vshll.u32 %v3748_v60, 16  ;;  %v1812_v63 = vrot.slane %v1810_v36, 5  ;;  %v2636_v60 = vrot.slane %v2628_v22, 9 }
  0x7b   : > { %2886 = vmatpush3.bf16.msra.mxu1 %v3188_v33  ;;  %2981 = vmatprep.subr.bf16.mxu0 %v3189_v43  ;;  %v2631_v33 = vld [vmem:[%s3308_s16 + $0x38] sm:$0xe] }
  0x7c   : > { %2887 = vmatprep.subr.bf16.mxu1 %v3190_v0  ;;  %v2639_v44 = vrot.slane %v2631_v33, 9  ;;  %v1826_v48 = vrot.slane %v1824_v37, 5 }
  0x7e   : > { %2982 = vmatpush3.bf16.msra.mxu0 %v3189_v43  ;;  %v3201_v43 = vld [vmem:[%s3843_s1 + $0x208] sm:$0xff]   ;;  %v2029_v62 = vsel %vm3527_vm5, %v2639_v44, %v2028_v45  ;;  %v2670_v44 = vld [vmem:[%s3844_s2] ss:$0 sm:$0xff] }
  0x7f   : > { %2888 = vmatpush3.bf16.msra.mxu1 %v3190_v0  ;;  %2983 = vmatprep.subr.bf16.mxu0 %v3191_v52  ;;  %v2638_v0 = vrot.slane %v2630_v21, 9  ;;  %v2021_v21 = vsel %vm3527_vm5, %v2637_v28, %v2020_v32 }
  0x80   : > { %2889 = vmatprep.subr.bf16.mxu1 %v3193_v26 }
  0x81   : > { %v2025_v47 = vsel %vm3527_vm5, %v2638_v0, %v2024_v55 }
  0x82   : > { %2984 = vmatpush3.bf16.msra.mxu0 %v3191_v52  ;;  %v1808_v52 = vrot.slane %v1807_v42, 4  ;;  %v2660_v34 = vcombine.low %v2025_v47, %v2029_v62 }
  0x83   : > { %2890 = vmatpush3.bf16.msra.mxu1 %v3193_v26  ;;  %2985 = vmatprep.subr.bf16.mxu0 %v3195_v56  ;;  %v1822_v26 = vrot.slane %v1821_v30, 4 }
  0x84   : > { %2891 = vmatprep.subr.bf16.mxu1 %v3196_v15  ;;  %v1813_v17 = vsel %vm3353_vm2, %v1808_v52, %v1812_v63 }
  0x85   : > { %v1827_v27 = vsel %vm3353_vm2, %v1822_v26, %v1826_v48 }
  0x86   : > { %2986 = vmatpush3.bf16.msra.mxu0 %v3195_v56  ;;  %v2617_v46 = vcombine.low %v1813_v17, %v1827_v27  ;;  %v2632_v56 = vld [vmem:[%s3308_s16 + $0x40] sm:$0xe] }
  0x87   : > { %2892 = vmatpush3.bf16.msra.mxu1 %v3196_v15  ;;  %2987 = vmatprep.subr.bf16.mxu0 %v3197_v12  ;;  %v3208_v15 = vld [vmem:[%s3843_s1 + $0x230] sm:$0xff]   ;;  %v2640_v18 = vrot.slane %v2632_v56, 9 }
  0x88   : > { %3021 = vmatprep.subr.bf16.mxu1 %v3200_v11 }
  0x89   : > { %v2033_v1 = vsel %vm3527_vm5, %v2640_v18, %v2032_v14 }
  0x8a   : > { %2894 = vmatmul.mubr.bf16.vlgmr.msra.gmra.mrb[0].mxu1 %v3199_v35  ;;  %2988 = vmatpush3.bf16.msra.mxu0 %v3197_v12  ;;  %v2017_v12 = vsel %vm3527_vm5, %v2636_v60, %v2016_v25 }
  0x8b   : > { %3029 = vmatpush3.bf16.msra.mxu1 %v3200_v11  ;;  %2897 = vmatprep.mubr.bf16.mxu1 %v3202_v39  ;;  %v2659_v33 = vcombine.low %v2017_v12, %v2021_v21 }
  0x8c   : > { %3022 = vmatprep.subr.bf16.mxu1 %v3201_v43  ;;  %2997 = vmatprep.subr.bf16.mxu0 %v3200_v11 }
  0x8d   : > { %2990 = vmatmul.mubr.bf16.vlgmr.msra.gmra.mrb[0].mxu0 %v2615_v29 }
  0x8e   : > { %2998 = vmatpush3.bf16.msra.mxu0 %v3200_v11  ;;  %2993 = vmatprep.mubr.bf16.mxu0 %v2616_v13  ;;  %v2661_v11 = vcombine.low %v2033_v1, %v2037_v23 }
  0x8f   : > { %3030 = vmatpush3.bf16.msra.mxu1 %v3201_v43  ;;  %2999 = vmatprep.subr.bf16.mxu0 %v3201_v43 }
  0x90   : > { %3023 = vmatprep.subr.bf16.mxu1 %v3204_v58 }
  0x92   : > { %2898 = vmatmul.mubr.bf16.gmra.mrb[4].mxu1 %v3203_v59  ;;  %3000 = vmatpush3.bf16.msra.mxu0 %v3201_v43 }
  0x93   : > { %3031 = vmatpush3.bf16.msra.mxu1 %v3204_v58  ;;  %3017 = vmatprep.mubr.bf16.mxu1 %v2660_v34 }
  0x94   : > { %3024 = vmatprep.subr.bf16.mxu1 %v3205_v16  ;;  %3001 = vmatprep.subr.bf16.mxu0 %v3204_v58 }
  0x95   : > { %2994 = vmatmul.mubr.bf16.gmra.mrb[4].mxu0 %v2617_v46 }
  0x96   : > { %3002 = vmatpush3.bf16.msra.mxu0 %v3204_v58  ;;  %3013 = vmatprep.mubr.bf16.mxu0 %v2658_v50 }
  0x97   : > { %3032 = vmatpush3.bf16.msra.mxu1 %v3205_v16  ;;  %3003 = vmatprep.subr.bf16.mxu0 %v3205_v16 }
  0x98   : > { %3025 = vmatprep.subr.bf16.mxu1 %v3206_v38 }
  0x9a   : > { %3004 = vmatpush3.bf16.msra.mxu0 %v3205_v16 }
  0x9b   : > { %3033 = vmatpush3.bf16.msra.mxu1 %v3206_v38  ;;  %3005 = vmatprep.subr.bf16.mxu0 %v3206_v38 }
  0x9c   : > { %3026 = vmatprep.subr.bf16.mxu1 %v3207_v6 }
  0x9e   : > { %3006 = vmatpush3.bf16.msra.mxu0 %v3206_v38 }
  0x9f   : > { %3034 = vmatpush3.bf16.msra.mxu1 %v3207_v6  ;;  %3007 = vmatprep.subr.bf16.mxu0 %v3207_v6 }
  0xa0   : > { %3027 = vmatprep.subr.bf16.mxu1 %v3208_v15 }
  0xa2   : > { %3008 = vmatpush3.bf16.msra.mxu0 %v3207_v6 }
  0xa3   : > { %3035 = vmatpush3.bf16.msra.mxu1 %v3208_v15  ;;  %3009 = vmatprep.subr.bf16.mxu0 %v3208_v15 }
  0xa4   : > { %3028 = vmatprep.subr.bf16.mxu1 %v3209_v20 }
  0xa6   : > { %3010 = vmatpush3.bf16.msra.mxu0 %v3208_v15 }
  0xa7   : > { %3036 = vmatpush3.bf16.msra.mxu1 %v3209_v20  ;;  %3011 = vmatprep.subr.bf16.mxu0 %v3209_v20 }
  0xaa   : > { %3018 = vmatmul.mubr.bf16.vlgmr.msra.gmra.mrb[8].mxu1 %v2661_v11  ;;  %3012 = vmatpush3.bf16.msra.mxu0 %v3209_v20 }
  0xad   : > { %3014 = vmatmul.mubr.bf16.vlgmr.msra.gmra.mrb[0].mxu0 %v2659_v33 }
 0x15d   : > { %v2895_v35 = vpop.f32.mrb[0].mxu1 }
 0x15e   : > { %v998_v51 = vpop.f32.mrb[1].mxu1 }
 0x15f   : > { %v2896_v31 = vpop.f32.mrb[2].mxu1 }
 0x160   : > { %v1001_v57 = vpop.f32.mrb[3].mxu1 }
 0x165   : > { %v2899_v2 = vpop.f32.mrb[4].mxu1 }
 0x166   : > { %v1014_v36 = vpop.f32.mrb[5].mxu1 }
 0x167   : > { %v2900_v37 = vpop.f32.mrb[6].mxu1 }
 0x168   : > { %v1017_v39 = vpop.f32.mrb[7].mxu1  ;;  %v2995_v40 = vpop.f32.mrb[4].mxu0 }
 0x169   : > { %v3041_v41 = vadd.f32 %v2995_v40, %v2899_v2  ;;  %v1959_v42 = vpop.f32.mrb[5].mxu0 }
 0x16a   : > { %v3043_v30 = vadd.f32 %v1959_v42, %v1014_v36  ;;  %v2996_v43 = vpop.f32.mrb[6].mxu0 }
 0x16b   : > { %v3045_v8 = vadd.f32 %v2996_v43, %v2900_v37  ;;  %v1962_v0 = vpop.f32.mrb[7].mxu0 }
 0x16c   : > { %v3047_v55 = vadd.f32 %v1962_v0, %v1017_v39 }
 0x17d   : > { %v3019_v45 = vpop.f32.mrb[8].mxu1 }
 0x17e   : > { %v3042_v29 = vadd.f32 %v3041_v41, %v3019_v45  ;;  %v2169_v13 = vpop.f32.mrb[9].mxu1 }
 0x17f   : > { %v3044_v63 = vadd.f32 %v3043_v30, %v2169_v13  ;;  %v3020_v48 = vpop.f32.mrb[10].mxu1 }
 0x180   : > { %v2205_v49 = vadd.f32 %v3042_v29, %v2670_v44  ;;  %v3046_v53 = vadd.f32 %v3045_v8, %v3020_v48  ;;  %v2172_v52 = vpop.f32.mrb[11].mxu1  ;;  %v3015_v62 = vpop.f32.mrb[0].mxu0 }
 0x181   : > { %v2203_v26 = vadd.f32 %v3044_v63, %v2670_v44  ;;  %v3048_v47 = vadd.f32 %v3047_v55, %v2172_v52  ;;  %v3037_v59 = vadd.f32 %v3015_v62, %v2895_v35  ;;  %v2153_v3 = vpop.f32.mrb[1].mxu0 }
 0x182   : > { %v2206_v58 = vadd.f32 %v3046_v53, %v2670_v44  ;;  %v2213_v5 = vmax.f32 %v2205_v49, 0.0  ;;  %v3038_v7 = vadd.f32 %v2153_v3, %v998_v51  ;;  %v3016_v34 = vpop.f32.mrb[2].mxu0 }
 0x183   : > { %v2204_v4 = vadd.f32 %v3048_v47, %v2670_v44  ;;  %v2201_v27 = vadd.f32 %v3037_v59, %v2670_v44  ;;  %v2211_v16 = vmax.f32 %v2203_v26, 0.0  ;;  %v3039_v24 = vadd.f32 %v3016_v34, %v2896_v31  ;;  %v2156_v61 = vpop.f32.mrb[3].mxu0 }
 0x184   : > { %v2214_v17 = vmax.f32 %v2206_v58, 0.0  ;;  %v2199_v38 = vadd.f32 %v3038_v7, %v2670_v44  ;;  %v3040_v6 = vadd.f32 %v2156_v61, %v1001_v57 }
 0x185   : > { %v2212_v46 = vmax.f32 %v2204_v4, 0.0  ;;  %v2202_v15 = vadd.f32 %v3039_v24, %v2670_v44  ;;  %v2209_v14 = vmax.f32 %v2201_v27, 0.0 }
 0x186   : > { %v2692_v50 = vpack.c.bf16 %v2214_v17, %v2213_v5  ;;  %v2200_v10 = vadd.f32 %v3040_v6, %v2670_v44  ;;  %v2207_v18 = vmax.f32 %v2199_v38, 0.0 }
 0x187   : > { %v2687_v56 = vpack.c.bf16 %v2212_v46, %v2211_v16  ;;  %v2210_v54 = vmax.f32 %v2202_v15, 0.0 }
 0x188   : > { %2696 = vst [vmem:[%s221_s8 + $0x18] sm:$0xff] %v2692_v50   ;;  %v2208_v19 = vmax.f32 %v2200_v10, 0.0 }
 0x189   : > { %2695 = vst [vmem:[%s221_s8 + $0x10] sm:$0xff] %v2687_v56   ;;  %v2682_v20 = vpack.c.bf16 %v2210_v54, %v2209_v14 }
 0x18a   : > { %v2677_v22 = vpack.c.bf16 %v2208_v19, %v2207_v18 }
 0x18b   : > { %2694 = vst [vmem:[%s221_s8 + $0x8] sm:$0xff] %v2682_v20  }
 0x18c   : > { %2678 = vst [vmem:[%s221_s8] sm:$0xff] %v2677_v22  }
 0x18d PF: > { %s13_s14 = sadd.s32 1, %s3232_s14   ;;  %s3850_s12 = smov %s3228_s13 }
 0x18e   : > { %p10_p5 = scmp.ge.s32.totalorder %s13_s14, 4   ;;  %s3851_s13 = smov %s3853_s15 }
 0x190   :  { %12 = sbr.rel (!%p10_p5) target bundleno = 2 (0x2), region = 78 }

</bundles_post_ra>
